<compile_context>
chip_gen: v7x
topology: tpu7x:2x2x1
jax: 0.10.0
libtpu: 0.0.40
codegen_flags: <defaults>
</compile_context>

<pallas_src>
import jax
import jax.numpy as jnp
from jax.experimental import pallas as pl
from jax.experimental.pallas import tpu as pltpu


def _gaussian_noise_kernel(img_ref, noise_ref, out_ref):
    # img_ref/out_ref: (P, H*W) block of flattened image planes (lane-dense,
    # H*W = 224*224 = 392*128 -> unmasked full-width vst).
    # noise_ref: (1, H*W), constant block index -> stays resident in VMEM; the
    # size-1 sublane dim broadcasts across the P rows in the VPU.
    out_ref[...] = jnp.clip(img_ref[...] + noise_ref[...], 0.0, 1.0).astype(out_ref.dtype)


def _round_up_mult8(x):
    return ((x + 7) // 8) * 8


def _vmem_capacity_bytes():
    """Physical VMEM of the attached TPU; conservative fallback if unknown."""
    try:
        return int(pltpu.get_tpu_info().vmem_capacity_bytes)
    except Exception:
        return 64 << 20   # v7x-sized fallback: safe on every generation


def _choose_planes_per_block(num_planes, plane_bytes, vmem_cap_bytes):
    """How many flattened (n, c) planes go into one grid step.

    Block budget is generation-aware: ~1/8 of physical VMEM per block so that
    double-buffered img+out (4 live blocks) stays around half of VMEM
    (~8 MiB blocks on v7x / 64 MiB, ~16 MiB on v5e/v6e / 128 MiB).  The block
    sublane dim is either the full plane count (tiny inputs, grid=(1,)) or a
    multiple of 8; for >=16 planes we force at least two grid steps so the
    "parallel" grid axis can shard across both v7x TensorCores.
    """
    max_block_bytes = max(plane_bytes, min(16 << 20, vmem_cap_bytes // 8))
    budget = max(1, int(max_block_bytes // plane_bytes))
    cap = max(8, (budget // 8) * 8)              # multiple of 8, >= 8

    if num_planes <= cap:
        if num_planes >= 16:
            # Force >= 2 grid steps (megacore on v7x), keep multiple-of-8 blocks.
            return min(cap, _round_up_mult8(pl.cdiv(num_planes, 2)))
        return num_planes                        # block == full dim -> grid=(1,)
    return cap


def gaussian_noise_transform(img, noise):
    """img: (N, C, H, W) float32 in [0, 1]; noise: (H, W) float32 (pre-clipped to +-eps)."""
    N, C, H, W = img.shape
    assert noise.shape == (H, W)

    num_planes = N * C
    hw = H * W                                   # 224*224 = 50176 = 392*128 (lane-dense)
    img_flat = img.reshape(num_planes, hw)       # glue reshapes stay outside the kernel
    noise_flat = noise.astype(img.dtype).reshape(1, hw)

    itemsize = img.dtype.itemsize
    plane_bytes = hw * itemsize
    noise_bytes = hw * itemsize

    vmem_cap = _vmem_capacity_bytes()
    planes_per_block = _choose_planes_per_block(num_planes, plane_bytes, vmem_cap)
    block_bytes = planes_per_block * plane_bytes
    grid = (pl.cdiv(num_planes, planes_per_block),)

    # Explicit scoped-VMEM budget: double-buffered img + out blocks, the
    # double-buffered (tiny) noise row, plus 4 MiB headroom.  Never below
    # 16 MiB, never above physical VMEM.
    vmem_limit = int(min(vmem_cap,
                         max(16 << 20, 4 * block_bytes + 2 * noise_bytes + (4 << 20))))

    cost = pl.CostEstimate(
        flops=2 * num_planes * hw,               # add + clamp per element
        transcendentals=0,
        bytes_accessed=(2 * num_planes * hw + hw) * itemsize,
    )

    out_flat = pl.pallas_call(
        _gaussian_noise_kernel,
        out_shape=jax.ShapeDtypeStruct((num_planes, hw), img.dtype),
        grid_spec=pltpu.PrefetchScalarGridSpec(
            num_scalar_prefetch=0,
            grid=grid,
            in_specs=[
                pl.BlockSpec((planes_per_block, hw), lambda p: (p, 0)),
                pl.BlockSpec((1, hw), lambda p: (0, 0)),   # constant index -> resident
            ],
            out_specs=pl.BlockSpec((planes_per_block, hw), lambda p: (p, 0)),
        ),
        compiler_params=pltpu.CompilerParams(
            dimension_semantics=("parallel",),   # shard grid steps across TCs on v7x
            vmem_limit_bytes=vmem_limit,
        ),
        cost_estimate=cost,
    )(img_flat, noise_flat)

    return out_flat.reshape(N, C, H, W)


def make_noise(key, epsilon=0.03, mean=0.0, std=1.0, size=224):
    # Mirrors __init__: randn((224, 224)) * std + mean, clipped to [-eps, eps].
    noise = jax.random.normal(key, (size, size), dtype=jnp.float32) * std + mean
    return jnp.clip(noise, -epsilon, epsilon)


if __name__ == "__main__":
    key = jax.random.PRNGKey(0)
    k_noise, k_img = jax.random.split(key)

    epsilon = 0.03
    H = W = 224           # noise size is hardcoded to (224, 224) in the module's __init__
    N, C = 2, 3           # small batch/channels

    noise = make_noise(k_noise, epsilon=epsilon, size=H)
    img = jax.random.uniform(k_img, (N, C, H, W), dtype=jnp.float32)

    out = gaussian_noise_transform(img, noise)
    out = jax.block_until_ready(out)

    # Correctness check against plain-JAX reference.
    ref = jnp.clip(img + noise[None, None, :, :], 0.0, 1.0)
    assert out.shape == img.shape
    assert jnp.allclose(out, ref, atol=1e-6), "mismatch vs reference"

    print("KERNEL_OK")
</pallas_src>

<mosaic_0001>
module attributes {stable_mosaic.version = 11 : i64} {
  func.func @_gaussian_noise_kernel(%arg0: i32, %arg1: memref<6x50176xf32, #tpu.memory_space<vmem>>, %arg2: memref<1x50176xf32, #tpu.memory_space<vmem>>, %arg3: memref<6x50176xf32, #tpu.memory_space<vmem>>) attributes {dimension_semantics = [#tpu.dimension_semantics<parallel>], iteration_bounds = array<i64: 1>, scalar_prefetch = 0 : i64, scratch_operands = 0 : i64, tpu.core_type = #tpu.core_type<tc>, window_params = [{transform_indices = @transform_0, window_bounds = array<i64: 6, 50176>}, {pipeline_mode = #tpu.pipeline_mode<synchronous>, transform_indices = @transform_1, window_bounds = array<i64: 1, 50176>}, {transform_indices = @transform_2, window_bounds = array<i64: 6, 50176>}]} {
    %c0 = arith.constant 0 : index
    %c0_0 = arith.constant 0 : index
    %0 = vector.load %arg1[%c0, %c0_0] : memref<6x50176xf32, #tpu.memory_space<vmem>>, vector<6x50176xf32>
    %c0_1 = arith.constant 0 : index
    %c0_2 = arith.constant 0 : index
    %1 = vector.load %arg2[%c0_1, %c0_2] : memref<1x50176xf32, #tpu.memory_space<vmem>>, vector<1x50176xf32>
    %2 = vector.broadcast %1 : vector<1x50176xf32> to vector<6x50176xf32>
    %3 = arith.addf %0, %2 : vector<6x50176xf32>
    %cst = arith.constant 0.000000e+00 : f32
    %cst_3 = arith.constant 1.000000e+00 : f32
    %4 = vector.broadcast %cst : f32 to vector<6x50176xf32>
    %5 = arith.maximumf %4, %3 : vector<6x50176xf32>
    %6 = vector.broadcast %cst_3 : f32 to vector<6x50176xf32>
    %7 = arith.minimumf %6, %5 : vector<6x50176xf32>
    %c0_4 = arith.constant 0 : index
    %c0_5 = arith.constant 0 : index
    %8 = vector.load %arg3[%c0_4, %c0_5] : memref<6x50176xf32, #tpu.memory_space<vmem>>, vector<6x50176xf32>
    tpu.vector_store %arg3[%c0_4, %c0_5], %7 {strides = array<i32>} : memref<6x50176xf32, #tpu.memory_space<vmem>>, vector<6x50176xf32>,
    return
  }
  func.func @transform_0(%arg0: i32) -> (i32, i32) {
    %c0_i32 = arith.constant 0 : i32
    %c0_i32_0 = arith.constant 0 : i32
    return %arg0, %c0_i32 : i32, i32
  }
  func.func @transform_1(%arg0: i32) -> (i32, i32) {
    %c0_i32 = arith.constant 0 : i32
    %c0_i32_0 = arith.constant 0 : i32
    %c0_i32_1 = arith.constant 0 : i32
    return %c0_i32, %c0_i32_0 : i32, i32
  }
  func.func @transform_2(%arg0: i32) -> (i32, i32) {
    %c0_i32 = arith.constant 0 : i32
    %c0_i32_0 = arith.constant 0 : i32
    return %arg0, %c0_i32 : i32, i32
  }
}

</mosaic_0001>

<bundles_post_ra>
// kernel: tpu_custom_call.1
= control target key start
LH: loop header
LB: loop body
LE: loop exit
PB: predicated region body
PF: predicated region fallthrough
CT: control target
= control target key end

     0   :  { %7 = vsyncpa [#allocation3], 0  ;;  %s4607_s0 = inlined_call_operand.hbm [shape: f32[6,50176], index: 0, kind: input, shape index: {}]   ;;  %s4608_s1 = inlined_call_operand.hbm [shape: f32[1,50176], index: 1, kind: input, shape index: {}]   ;;  %s4609_s2 = inlined_call_operand.hbm [shape: f32[6,50176], index: 2, kind: output, shape index: {}]  }
   0x1   :  { %8 = vsyncpa [#allocation6], 0 }
   0x2   :  { %9 = vsyncpa [#allocation4], 0  ;;  %s4145_s9 = smov [#allocation2]   ;;  %s4146_s11 = smov [#allocation5]  }
   0x3   :  { %s16_s10 = sshll.u32 %s4145_s9, 4  ;;  %s26_s12 = sshll.u32 %s4146_s11, 4  ;;  %s17_s10 = int_to_ptr.vmem [resolvable:$true] %s16_s10  ;;  %s27_s12 = int_to_ptr.vmem [resolvable:$true] %s26_s12 }
   0x4   :  { %s4073_s15 = scalar_lea.hbm %s4607_s0, 50176 }
   0x5   :  { %p4074_p0 = scmp.ne.s32.totalorder %s4607_s0, %s4073_s15  ;;  %p4077_p1 = scmp.lt.u32.totalorder %s4073_s15, %s4607_s0 }
   0x7   :  { %p4079_p2 = pnand %p4077_p1, %p4074_p0 }
   0x9   :  { %4082 = shalt.err (!%p4079_p2)
}
   0xa   :  { %s4083_s20 = scalar_lea.vmem %s17_s10, 50176  ;;  %p4088_p4 = scmp.lt.s32.totalorder %s17_s10, %s17_s10 }
   0xb   :  { %p4084_p3 = scmp.ne.s32.totalorder %s17_s10, %s4083_s20  ;;  %p4089_p5 = scmp.lt.s32.totalorder %s4083_s20, %s4083_s20 }
   0xd   :  { %p4090_p6 = por %p4089_p5, %p4088_p4 }
   0xf   :  { %p4091_p7 = pnand %p4090_p6, %p4084_p3 }
  0x11   :  { %4094 = shalt.err (!%p4091_p7)
}
  0x12   :  { %19 = dma.hbm_to_vmem [thread:$0]  %s4607_s0, 50176, %s17_s10, [#allocation3]  }
  0x13   :  { %s4095_s25 = scalar_lea.hbm %s4608_s1, 6272 }
  0x14   :  { %p4096_p8 = scmp.ne.s32.totalorder %s4608_s1, %s4095_s25  ;;  %p4099_p9 = scmp.lt.u32.totalorder %s4095_s25, %s4608_s1 }
  0x16   :  { %p4101_p10 = pnand %p4099_p9, %p4096_p8 }
  0x18   :  { %4104 = shalt.err (!%p4101_p10)
}
  0x19   :  { %s4105_s30 = scalar_lea.vmem %s27_s12, 6272  ;;  %p4110_p12 = scmp.lt.s32.totalorder %s27_s12, %s27_s12 }
  0x1a   :  { %p4106_p11 = scmp.ne.s32.totalorder %s27_s12, %s4105_s30  ;;  %p4111_p13 = scmp.lt.s32.totalorder %s4105_s30, %s4105_s30 }
  0x1c   :  { %p4112_p0 = por %p4111_p13, %p4110_p12 }
  0x1e   :  { %p4113_p1 = pnand %p4112_p0, %p4106_p11 }
  0x20   :  { %4116 = shalt.err (!%p4113_p1)
}
  0x21   :  { %29 = dma.hbm_to_vmem [thread:$0]  %s4608_s1, 6272, %s27_s12, [#allocation6]  }
  0x22   :  { %4139 = dma.done.wait [#allocation3], 50176  }
  0x23   :  { %4140 = vsyncadd [#allocation3], 4294917120 }
  0x24   :  { %4141 = dma.done.wait [#allocation6], 6272  }
  0x25   :  { %4142 = vsyncadd [#allocation6], 4294961024  ;;  %v526_v0 = vlaneseq  ;;  %v36_v10 = vld [vmem:[#allocation2] sm:$0x3f]  ;;  %v37_v12 = vld [vmem:[#allocation2 + $0x8] sm:$0x3f] }
  0x26   :  { %v428_v11 = vld [vmem:[#allocation5] sm:$0xff]  ;;  %v38_v15 = vld [vmem:[#allocation2 + $0x10] sm:$0x3f]  ;;  %v39_v17 = vld [vmem:[#allocation2 + $0x18] sm:$0x3f]  ;;  %s4147_s1 = smov [#allocation7]  }
  0x27   :  { %v527_v1 = vshrl.u32 %v526_v0, 7  ;;  %v40_v19 = vld [vmem:[#allocation2 + $0x20] sm:$0x3f]  ;;  %v41_v21 = vld [vmem:[#allocation2 + $0x28] sm:$0x3f]  ;;  %s4060_s4 = sshll.u32 %s4147_s1, 4  ;;  %s4061_s4 = int_to_ptr.vmem [resolvable:$true] %s4060_s4 }
  0x28   :  { %v42_v23 = vld [vmem:[#allocation2 + $0x30] sm:$0x3f]  ;;  %v43_v25 = vld [vmem:[#allocation2 + $0x38] sm:$0x3f]  ;;  %v429_v39 = vld [vmem:[#allocation5 + $0x8] sm:$0xff]  ;;  %s4117_s5 = scalar_lea.vmem %s4061_s4, 50176  ;;  %p4122_p3 = scmp.lt.s32.totalorder %s4061_s4, %s4061_s4 }
  0x29   :  { %v4187_v2 = vsub.s32 0, %v527_v1  ;;  %v4189_v3 = vsub.s32 1, %v527_v1  ;;  %v4191_v4 = vsub.s32 2, %v527_v1  ;;  %v4193_v5 = vsub.s32 3, %v527_v1  ;;  %v44_v44 = vld [vmem:[#allocation2 + $0x40] sm:$0x3f]  ;;  %p4118_p2 = scmp.ne.s32.totalorder %s4061_s4, %s4117_s5  ;;  %p4123_p4 = scmp.lt.s32.totalorder %s4117_s5, %s4117_s5 }
  0x2a   :  { %v4195_v6 = vsub.s32 4, %v527_v1  ;;  %v4197_v7 = vsub.s32 5, %v527_v1  ;;  %v4199_v8 = vsub.s32 6, %v527_v1  ;;  %v4201_v9 = vsub.s32 7, %v527_v1  ;;  %v45_v45 = vld [vmem:[#allocation2 + $0x48] sm:$0x3f] }
  0x2b   :  { %v529_v13 = vrot.slane %v428_v11, %v4187_v2  ;;  %v533_v14 = vrot.slane %v428_v11, %v4189_v3  ;;  %v537_v16 = vrot.slane %v428_v11, %v4191_v4  ;;  %v541_v18 = vrot.slane %v428_v11, %v4193_v5  ;;  %v46_v46 = vld [vmem:[#allocation2 + $0x50] sm:$0x3f]  ;;  %v47_v51 = vld [vmem:[#allocation2 + $0x58] sm:$0x3f]  ;;  %v48_v56 = vld [vmem:[#allocation2 + $0x60] sm:$0x3f]  ;;  %p4124_p5 = por %p4123_p4, %p4122_p3 }
  0x2c   :  { %v545_v20 = vrot.slane %v428_v11, %v4195_v6  ;;  %v549_v22 = vrot.slane %v428_v11, %v4197_v7  ;;  %v553_v24 = vrot.slane %v428_v11, %v4199_v8  ;;  %v557_v26 = vrot.slane %v428_v11, %v4201_v9  ;;  %v49_v61 = vld [vmem:[#allocation2 + $0x68] sm:$0x3f]  ;;  %v50_v62 = vld [vmem:[#allocation2 + $0x70] sm:$0x3f]  ;;  %v51_v63 = vld [vmem:[#allocation2 + $0x78] sm:$0x3f] }
  0x2d   :  { %v2486_v27 = vadd.f32 %v529_v13, %v36_v10  ;;  %v2487_v28 = vadd.f32 %v533_v14, %v37_v12  ;;  %v2488_v29 = vadd.f32 %v537_v16, %v38_v15  ;;  %v2489_v30 = vadd.f32 %v541_v18, %v39_v17  ;;  %p4125_p6 = pnand %p4124_p5, %p4118_p2 }
  0x2e   :  { %v2490_v31 = vadd.f32 %v545_v20, %v40_v19  ;;  %v2491_v32 = vadd.f32 %v549_v22, %v41_v21  ;;  %v2492_v33 = vadd.f32 %v553_v24, %v42_v23  ;;  %v2493_v34 = vadd.f32 %v557_v26, %v43_v25  ;;  %v430_v24 = vld [vmem:[#allocation5 + $0x10] sm:$0xff] }
  0x2f   :  { %v2878_v35 = vmax.f32 %v2486_v27, 0.0  ;;  %v2879_v36 = vmax.f32 %v2487_v28, 0.0  ;;  %v2880_v37 = vmax.f32 %v2488_v29, 0.0  ;;  %v2881_v38 = vmax.f32 %v2489_v30, 0.0  ;;  %v52_v29 = vld [vmem:[#allocation2 + $0x80] sm:$0x3f] }
  0x30   :  { %v2882_v40 = vmax.f32 %v2490_v31, 0.0  ;;  %v2883_v41 = vmax.f32 %v2491_v32, 0.0  ;;  %v2884_v42 = vmax.f32 %v2492_v33, 0.0  ;;  %v2885_v43 = vmax.f32 %v2493_v34, 0.0  ;;  %v53_v30 = vld [vmem:[#allocation2 + $0x88] sm:$0x3f] }
  0x31   :  { %v3270_v47 = vmin.f32 %v2878_v35, 1.0  ;;  %v3271_v48 = vmin.f32 %v2879_v36, 1.0  ;;  %v3272_v49 = vmin.f32 %v2880_v37, 1.0  ;;  %v3273_v50 = vmin.f32 %v2881_v38, 1.0  ;;  %v54_v31 = vld [vmem:[#allocation2 + $0x90] sm:$0x3f] }
  0x32   :  { %v3274_v52 = vmin.f32 %v2882_v40, 1.0  ;;  %v3275_v53 = vmin.f32 %v2883_v41, 1.0  ;;  %v3276_v54 = vmin.f32 %v2884_v42, 1.0  ;;  %v3277_v55 = vmin.f32 %v2885_v43, 1.0  ;;  %v55_v36 = vld [vmem:[#allocation2 + $0x98] sm:$0x3f] }
  0x33   :  { %3662 = vst [vmem:[#allocation7] sm:$0x3f] %v3270_v47  ;;  %3663 = vst [vmem:[#allocation7 + $0x8] sm:$0x3f] %v3271_v48  ;;  %v561_v57 = vrot.slane %v429_v39, %v4187_v2  ;;  %v565_v58 = vrot.slane %v429_v39, %v4189_v3  ;;  %v569_v59 = vrot.slane %v429_v39, %v4191_v4  ;;  %v56_v41 = vld [vmem:[#allocation2 + $0xa0] sm:$0x3f] }
  0x34   :  { %3664 = vst [vmem:[#allocation7 + $0x10] sm:$0x3f] %v3272_v49  ;;  %3665 = vst [vmem:[#allocation7 + $0x18] sm:$0x3f] %v3273_v50  ;;  %v573_v60 = vrot.slane %v429_v39, %v4193_v5  ;;  %v577_v0 = vrot.slane %v429_v39, %v4195_v6  ;;  %v581_v1 = vrot.slane %v429_v39, %v4197_v7  ;;  %v58_v47 = vld [vmem:[#allocation2 + $0xb0] sm:$0x3f] }
  0x35   :  { %3666 = vst [vmem:[#allocation7 + $0x20] sm:$0x3f] %v3274_v52  ;;  %3667 = vst [vmem:[#allocation7 + $0x28] sm:$0x3f] %v3275_v53  ;;  %v585_v10 = vrot.slane %v429_v39, %v4199_v8  ;;  %v589_v11 = vrot.slane %v429_v39, %v4201_v9  ;;  %v2494_v12 = vadd.f32 %v561_v57, %v44_v44  ;;  %v59_v48 = vld [vmem:[#allocation2 + $0xb8] sm:$0x3f] }
  0x36   :  { %3668 = vst [vmem:[#allocation7 + $0x30] sm:$0x3f] %v3276_v54  ;;  %3669 = vst [vmem:[#allocation7 + $0x38] sm:$0x3f] %v3277_v55  ;;  %v2495_v13 = vadd.f32 %v565_v58, %v45_v45  ;;  %v2496_v14 = vadd.f32 %v569_v59, %v46_v46  ;;  %v2497_v15 = vadd.f32 %v573_v60, %v47_v51  ;;  %v57_v46 = vld [vmem:[#allocation2 + $0xa8] sm:$0x3f] }
  0x37   :  { %v2498_v16 = vadd.f32 %v577_v0, %v48_v56  ;;  %v2499_v17 = vadd.f32 %v581_v1, %v49_v61  ;;  %v2500_v18 = vadd.f32 %v585_v10, %v50_v62  ;;  %v2501_v19 = vadd.f32 %v589_v11, %v51_v63  ;;  %v431_v1 = vld [vmem:[#allocation5 + $0x18] sm:$0xff] }
  0x38   :  { %v2886_v20 = vmax.f32 %v2494_v12, 0.0  ;;  %v2887_v21 = vmax.f32 %v2495_v13, 0.0  ;;  %v2888_v22 = vmax.f32 %v2496_v14, 0.0  ;;  %v2889_v23 = vmax.f32 %v2497_v15, 0.0  ;;  %v60_v14 = vld [vmem:[#allocation2 + $0xc0] sm:$0x3f] }
  0x39   :  { %v2890_v25 = vmax.f32 %v2498_v16, 0.0  ;;  %v2891_v26 = vmax.f32 %v2499_v17, 0.0  ;;  %v2892_v27 = vmax.f32 %v2500_v18, 0.0  ;;  %v2893_v28 = vmax.f32 %v2501_v19, 0.0  ;;  %v61_v15 = vld [vmem:[#allocation2 + $0xc8] sm:$0x3f] }
  0x3a   :  { %v3278_v32 = vmin.f32 %v2886_v20, 1.0  ;;  %v3279_v33 = vmin.f32 %v2887_v21, 1.0  ;;  %v3280_v34 = vmin.f32 %v2888_v22, 1.0  ;;  %v3281_v35 = vmin.f32 %v2889_v23, 1.0  ;;  %v62_v16 = vld [vmem:[#allocation2 + $0xd0] sm:$0x3f] }
  0x3b   :  { %v3282_v37 = vmin.f32 %v2890_v25, 1.0  ;;  %v3283_v38 = vmin.f32 %v2891_v26, 1.0  ;;  %v3284_v39 = vmin.f32 %v2892_v27, 1.0  ;;  %v3285_v40 = vmin.f32 %v2893_v28, 1.0  ;;  %v63_v21 = vld [vmem:[#allocation2 + $0xd8] sm:$0x3f] }
  0x3c   :  { %3670 = vst [vmem:[#allocation7 + $0x40] sm:$0x3f] %v3278_v32  ;;  %3671 = vst [vmem:[#allocation7 + $0x48] sm:$0x3f] %v3279_v33  ;;  %v593_v42 = vrot.slane %v430_v24, %v4187_v2  ;;  %v597_v43 = vrot.slane %v430_v24, %v4189_v3  ;;  %v601_v44 = vrot.slane %v430_v24, %v4191_v4  ;;  %v64_v26 = vld [vmem:[#allocation2 + $0xe0] sm:$0x3f] }
  0x3d   :  { %3672 = vst [vmem:[#allocation7 + $0x50] sm:$0x3f] %v3280_v34  ;;  %3673 = vst [vmem:[#allocation7 + $0x58] sm:$0x3f] %v3281_v35  ;;  %v605_v45 = vrot.slane %v430_v24, %v4193_v5  ;;  %v609_v49 = vrot.slane %v430_v24, %v4195_v6  ;;  %v613_v50 = vrot.slane %v430_v24, %v4197_v7  ;;  %v66_v32 = vld [vmem:[#allocation2 + $0xf0] sm:$0x3f] }
  0x3e   :  { %3674 = vst [vmem:[#allocation7 + $0x60] sm:$0x3f] %v3282_v37  ;;  %3675 = vst [vmem:[#allocation7 + $0x68] sm:$0x3f] %v3283_v38  ;;  %v617_v51 = vrot.slane %v430_v24, %v4199_v8  ;;  %v621_v52 = vrot.slane %v430_v24, %v4201_v9  ;;  %v2502_v53 = vadd.f32 %v593_v42, %v52_v29  ;;  %v67_v33 = vld [vmem:[#allocation2 + $0xf8] sm:$0x3f] }
  0x3f   :  { %3676 = vst [vmem:[#allocation7 + $0x70] sm:$0x3f] %v3284_v39  ;;  %3677 = vst [vmem:[#allocation7 + $0x78] sm:$0x3f] %v3285_v40  ;;  %v2503_v54 = vadd.f32 %v597_v43, %v53_v30  ;;  %v2504_v55 = vadd.f32 %v601_v44, %v54_v31  ;;  %v2505_v56 = vadd.f32 %v605_v45, %v55_v36  ;;  %v65_v31 = vld [vmem:[#allocation2 + $0xe8] sm:$0x3f] }
  0x40   :  { %v2506_v57 = vadd.f32 %v609_v49, %v56_v41  ;;  %v2507_v58 = vadd.f32 %v613_v50, %v57_v46  ;;  %v2508_v59 = vadd.f32 %v617_v51, %v58_v47  ;;  %v2509_v60 = vadd.f32 %v621_v52, %v59_v48  ;;  %v432_v50 = vld [vmem:[#allocation5 + $0x20] sm:$0xff] }
  0x41   :  { %v2894_v61 = vmax.f32 %v2502_v53, 0.0  ;;  %v2895_v62 = vmax.f32 %v2503_v54, 0.0  ;;  %v2896_v63 = vmax.f32 %v2504_v55, 0.0  ;;  %v2897_v0 = vmax.f32 %v2505_v56, 0.0  ;;  %v68_v55 = vld [vmem:[#allocation2 + $0x100] sm:$0x3f] }
  0x42   :  { %v2898_v10 = vmax.f32 %v2506_v57, 0.0  ;;  %v2899_v11 = vmax.f32 %v2507_v58, 0.0  ;;  %v2900_v12 = vmax.f32 %v2508_v59, 0.0  ;;  %v2901_v13 = vmax.f32 %v2509_v60, 0.0  ;;  %v69_v56 = vld [vmem:[#allocation2 + $0x108] sm:$0x3f] }
  0x43   :  { %v3286_v17 = vmin.f32 %v2894_v61, 1.0  ;;  %v3287_v18 = vmin.f32 %v2895_v62, 1.0  ;;  %v3288_v19 = vmin.f32 %v2896_v63, 1.0  ;;  %v3289_v20 = vmin.f32 %v2897_v0, 1.0  ;;  %v70_v57 = vld [vmem:[#allocation2 + $0x110] sm:$0x3f] }
  0x44   :  { %v3290_v22 = vmin.f32 %v2898_v10, 1.0  ;;  %v3291_v23 = vmin.f32 %v2899_v11, 1.0  ;;  %v3292_v24 = vmin.f32 %v2900_v12, 1.0  ;;  %v3293_v25 = vmin.f32 %v2901_v13, 1.0  ;;  %v71_v62 = vld [vmem:[#allocation2 + $0x118] sm:$0x3f] }
  0x45   :  { %3678 = vst [vmem:[#allocation7 + $0x80] sm:$0x3f] %v3286_v17  ;;  %3679 = vst [vmem:[#allocation7 + $0x88] sm:$0x3f] %v3287_v18  ;;  %v625_v27 = vrot.slane %v431_v1, %v4187_v2  ;;  %v629_v28 = vrot.slane %v431_v1, %v4189_v3  ;;  %v633_v29 = vrot.slane %v431_v1, %v4191_v4  ;;  %v72_v11 = vld [vmem:[#allocation2 + $0x120] sm:$0x3f] }
  0x46   :  { %3680 = vst [vmem:[#allocation7 + $0x90] sm:$0x3f] %v3288_v19  ;;  %3681 = vst [vmem:[#allocation7 + $0x98] sm:$0x3f] %v3289_v20  ;;  %v637_v30 = vrot.slane %v431_v1, %v4193_v5  ;;  %v641_v34 = vrot.slane %v431_v1, %v4195_v6  ;;  %v645_v35 = vrot.slane %v431_v1, %v4197_v7  ;;  %v74_v17 = vld [vmem:[#allocation2 + $0x130] sm:$0x3f] }
  0x47   :  { %3682 = vst [vmem:[#allocation7 + $0xa0] sm:$0x3f] %v3290_v22  ;;  %3683 = vst [vmem:[#allocation7 + $0xa8] sm:$0x3f] %v3291_v23  ;;  %v649_v36 = vrot.slane %v431_v1, %v4199_v8  ;;  %v653_v37 = vrot.slane %v431_v1, %v4201_v9  ;;  %v2510_v38 = vadd.f32 %v625_v27, %v60_v14  ;;  %v75_v18 = vld [vmem:[#allocation2 + $0x138] sm:$0x3f] }
  0x48   :  { %3684 = vst [vmem:[#allocation7 + $0xb0] sm:$0x3f] %v3292_v24  ;;  %3685 = vst [vmem:[#allocation7 + $0xb8] sm:$0x3f] %v3293_v25  ;;  %v2511_v39 = vadd.f32 %v629_v28, %v61_v15  ;;  %v2512_v40 = vadd.f32 %v633_v29, %v62_v16  ;;  %v2513_v41 = vadd.f32 %v637_v30, %v63_v21  ;;  %v73_v16 = vld [vmem:[#allocation2 + $0x128] sm:$0x3f] }
  0x49   :  { %v2514_v42 = vadd.f32 %v641_v34, %v64_v26  ;;  %v2515_v43 = vadd.f32 %v645_v35, %v65_v31  ;;  %v2516_v44 = vadd.f32 %v649_v36, %v66_v32  ;;  %v2517_v45 = vadd.f32 %v653_v37, %v67_v33  ;;  %v433_v35 = vld [vmem:[#allocation5 + $0x28] sm:$0xff] }
  0x4a   :  { %v2902_v46 = vmax.f32 %v2510_v38, 0.0  ;;  %v2903_v47 = vmax.f32 %v2511_v39, 0.0  ;;  %v2904_v48 = vmax.f32 %v2512_v40, 0.0  ;;  %v2905_v49 = vmax.f32 %v2513_v41, 0.0  ;;  %v76_v40 = vld [vmem:[#allocation2 + $0x140] sm:$0x3f] }
  0x4b   :  { %v2906_v51 = vmax.f32 %v2514_v42, 0.0  ;;  %v2907_v52 = vmax.f32 %v2515_v43, 0.0  ;;  %v2908_v53 = vmax.f32 %v2516_v44, 0.0  ;;  %v2909_v54 = vmax.f32 %v2517_v45, 0.0  ;;  %v77_v41 = vld [vmem:[#allocation2 + $0x148] sm:$0x3f] }
  0x4c   :  { %v3294_v58 = vmin.f32 %v2902_v46, 1.0  ;;  %v3295_v59 = vmin.f32 %v2903_v47, 1.0  ;;  %v3296_v60 = vmin.f32 %v2904_v48, 1.0  ;;  %v3297_v61 = vmin.f32 %v2905_v49, 1.0  ;;  %v78_v42 = vld [vmem:[#allocation2 + $0x150] sm:$0x3f] }
  0x4d   :  { %v3298_v63 = vmin.f32 %v2906_v51, 1.0  ;;  %v3299_v0 = vmin.f32 %v2907_v52, 1.0  ;;  %v3300_v1 = vmin.f32 %v2908_v53, 1.0  ;;  %v3301_v10 = vmin.f32 %v2909_v54, 1.0  ;;  %v79_v47 = vld [vmem:[#allocation2 + $0x158] sm:$0x3f] }
  0x4e   :  { %3686 = vst [vmem:[#allocation7 + $0xc0] sm:$0x3f] %v3294_v58  ;;  %3687 = vst [vmem:[#allocation7 + $0xc8] sm:$0x3f] %v3295_v59  ;;  %v657_v12 = vrot.slane %v432_v50, %v4187_v2  ;;  %v661_v13 = vrot.slane %v432_v50, %v4189_v3  ;;  %v665_v14 = vrot.slane %v432_v50, %v4191_v4  ;;  %v80_v52 = vld [vmem:[#allocation2 + $0x160] sm:$0x3f] }
  0x4f   :  { %3688 = vst [vmem:[#allocation7 + $0xd0] sm:$0x3f] %v3296_v60  ;;  %3689 = vst [vmem:[#allocation7 + $0xd8] sm:$0x3f] %v3297_v61  ;;  %v669_v15 = vrot.slane %v432_v50, %v4193_v5  ;;  %v673_v19 = vrot.slane %v432_v50, %v4195_v6  ;;  %v677_v20 = vrot.slane %v432_v50, %v4197_v7  ;;  %v82_v58 = vld [vmem:[#allocation2 + $0x170] sm:$0x3f] }
  0x50   :  { %3690 = vst [vmem:[#allocation7 + $0xe0] sm:$0x3f] %v3298_v63  ;;  %3691 = vst [vmem:[#allocation7 + $0xe8] sm:$0x3f] %v3299_v0  ;;  %v681_v21 = vrot.slane %v432_v50, %v4199_v8  ;;  %v685_v22 = vrot.slane %v432_v50, %v4201_v9  ;;  %v2518_v23 = vadd.f32 %v657_v12, %v68_v55  ;;  %v83_v59 = vld [vmem:[#allocation2 + $0x178] sm:$0x3f] }
  0x51   :  { %3692 = vst [vmem:[#allocation7 + $0xf0] sm:$0x3f] %v3300_v1  ;;  %3693 = vst [vmem:[#allocation7 + $0xf8] sm:$0x3f] %v3301_v10  ;;  %v2519_v24 = vadd.f32 %v661_v13, %v69_v56  ;;  %v2520_v25 = vadd.f32 %v665_v14, %v70_v57  ;;  %v2521_v26 = vadd.f32 %v669_v15, %v71_v62  ;;  %v81_v57 = vld [vmem:[#allocation2 + $0x168] sm:$0x3f] }
  0x52   :  { %v2522_v27 = vadd.f32 %v673_v19, %v72_v11  ;;  %v2523_v28 = vadd.f32 %v677_v20, %v73_v16  ;;  %v2524_v29 = vadd.f32 %v681_v21, %v74_v17  ;;  %v2525_v30 = vadd.f32 %v685_v22, %v75_v18  ;;  %v434_v20 = vld [vmem:[#allocation5 + $0x30] sm:$0xff] }
  0x53   :  { %v2910_v31 = vmax.f32 %v2518_v23, 0.0  ;;  %v2911_v32 = vmax.f32 %v2519_v24, 0.0  ;;  %v2912_v33 = vmax.f32 %v2520_v25, 0.0  ;;  %v2913_v34 = vmax.f32 %v2521_v26, 0.0  ;;  %v84_v25 = vld [vmem:[#allocation2 + $0x180] sm:$0x3f] }
  0x54   :  { %v2914_v36 = vmax.f32 %v2522_v27, 0.0  ;;  %v2915_v37 = vmax.f32 %v2523_v28, 0.0  ;;  %v2916_v38 = vmax.f32 %v2524_v29, 0.0  ;;  %v2917_v39 = vmax.f32 %v2525_v30, 0.0  ;;  %v85_v26 = vld [vmem:[#allocation2 + $0x188] sm:$0x3f] }
  0x55   :  { %v3302_v43 = vmin.f32 %v2910_v31, 1.0  ;;  %v3303_v44 = vmin.f32 %v2911_v32, 1.0  ;;  %v3304_v45 = vmin.f32 %v2912_v33, 1.0  ;;  %v3305_v46 = vmin.f32 %v2913_v34, 1.0  ;;  %v86_v27 = vld [vmem:[#allocation2 + $0x190] sm:$0x3f] }
  0x56   :  { %v3306_v48 = vmin.f32 %v2914_v36, 1.0  ;;  %v3307_v49 = vmin.f32 %v2915_v37, 1.0  ;;  %v3308_v50 = vmin.f32 %v2916_v38, 1.0  ;;  %v3309_v51 = vmin.f32 %v2917_v39, 1.0  ;;  %v87_v32 = vld [vmem:[#allocation2 + $0x198] sm:$0x3f] }
  0x57   :  { %3694 = vst [vmem:[#allocation7 + $0x100] sm:$0x3f] %v3302_v43  ;;  %3695 = vst [vmem:[#allocation7 + $0x108] sm:$0x3f] %v3303_v44  ;;  %v689_v53 = vrot.slane %v433_v35, %v4187_v2  ;;  %v693_v54 = vrot.slane %v433_v35, %v4189_v3  ;;  %v697_v55 = vrot.slane %v433_v35, %v4191_v4  ;;  %v88_v37 = vld [vmem:[#allocation2 + $0x1a0] sm:$0x3f] }
  0x58   :  { %3696 = vst [vmem:[#allocation7 + $0x110] sm:$0x3f] %v3304_v45  ;;  %3697 = vst [vmem:[#allocation7 + $0x118] sm:$0x3f] %v3305_v46  ;;  %v701_v56 = vrot.slane %v433_v35, %v4193_v5  ;;  %v705_v60 = vrot.slane %v433_v35, %v4195_v6  ;;  %v709_v61 = vrot.slane %v433_v35, %v4197_v7  ;;  %v90_v43 = vld [vmem:[#allocation2 + $0x1b0] sm:$0x3f] }
  0x59   :  { %3698 = vst [vmem:[#allocation7 + $0x120] sm:$0x3f] %v3306_v48  ;;  %3699 = vst [vmem:[#allocation7 + $0x128] sm:$0x3f] %v3307_v49  ;;  %v713_v62 = vrot.slane %v433_v35, %v4199_v8  ;;  %v717_v63 = vrot.slane %v433_v35, %v4201_v9  ;;  %v2526_v0 = vadd.f32 %v689_v53, %v76_v40  ;;  %v91_v44 = vld [vmem:[#allocation2 + $0x1b8] sm:$0x3f] }
  0x5a   :  { %3700 = vst [vmem:[#allocation7 + $0x130] sm:$0x3f] %v3308_v50  ;;  %3701 = vst [vmem:[#allocation7 + $0x138] sm:$0x3f] %v3309_v51  ;;  %v2527_v1 = vadd.f32 %v693_v54, %v77_v41  ;;  %v2528_v10 = vadd.f32 %v697_v55, %v78_v42  ;;  %v2529_v11 = vadd.f32 %v701_v56, %v79_v47  ;;  %v89_v42 = vld [vmem:[#allocation2 + $0x1a8] sm:$0x3f] }
  0x5b   :  { %v2530_v12 = vadd.f32 %v705_v60, %v80_v52  ;;  %v2531_v13 = vadd.f32 %v709_v61, %v81_v57  ;;  %v2532_v14 = vadd.f32 %v713_v62, %v82_v58  ;;  %v2533_v15 = vadd.f32 %v717_v63, %v83_v59  ;;  %v435_v61 = vld [vmem:[#allocation5 + $0x38] sm:$0xff] }
  0x5c   :  { %v2918_v16 = vmax.f32 %v2526_v0, 0.0  ;;  %v2919_v17 = vmax.f32 %v2527_v1, 0.0  ;;  %v2920_v18 = vmax.f32 %v2528_v10, 0.0  ;;  %v2921_v19 = vmax.f32 %v2529_v11, 0.0  ;;  %v92_v10 = vld [vmem:[#allocation2 + $0x1c0] sm:$0x3f] }
  0x5d   :  { %v2922_v21 = vmax.f32 %v2530_v12, 0.0  ;;  %v2923_v22 = vmax.f32 %v2531_v13, 0.0  ;;  %v2924_v23 = vmax.f32 %v2532_v14, 0.0  ;;  %v2925_v24 = vmax.f32 %v2533_v15, 0.0  ;;  %v93_v11 = vld [vmem:[#allocation2 + $0x1c8] sm:$0x3f] }
  0x5e   :  { %v3310_v28 = vmin.f32 %v2918_v16, 1.0  ;;  %v3311_v29 = vmin.f32 %v2919_v17, 1.0  ;;  %v3312_v30 = vmin.f32 %v2920_v18, 1.0  ;;  %v3313_v31 = vmin.f32 %v2921_v19, 1.0  ;;  %v94_v12 = vld [vmem:[#allocation2 + $0x1d0] sm:$0x3f] }
  0x5f   :  { %v3314_v33 = vmin.f32 %v2922_v21, 1.0  ;;  %v3315_v34 = vmin.f32 %v2923_v22, 1.0  ;;  %v3316_v35 = vmin.f32 %v2924_v23, 1.0  ;;  %v3317_v36 = vmin.f32 %v2925_v24, 1.0  ;;  %v95_v17 = vld [vmem:[#allocation2 + $0x1d8] sm:$0x3f] }
  0x60   :  { %3702 = vst [vmem:[#allocation7 + $0x140] sm:$0x3f] %v3310_v28  ;;  %3703 = vst [vmem:[#allocation7 + $0x148] sm:$0x3f] %v3311_v29  ;;  %v721_v38 = vrot.slane %v434_v20, %v4187_v2  ;;  %v725_v39 = vrot.slane %v434_v20, %v4189_v3  ;;  %v729_v40 = vrot.slane %v434_v20, %v4191_v4  ;;  %v96_v22 = vld [vmem:[#allocation2 + $0x1e0] sm:$0x3f] }
  0x61   :  { %3704 = vst [vmem:[#allocation7 + $0x150] sm:$0x3f] %v3312_v30  ;;  %3705 = vst [vmem:[#allocation7 + $0x158] sm:$0x3f] %v3313_v31  ;;  %v733_v41 = vrot.slane %v434_v20, %v4193_v5  ;;  %v737_v45 = vrot.slane %v434_v20, %v4195_v6  ;;  %v741_v46 = vrot.slane %v434_v20, %v4197_v7  ;;  %v98_v28 = vld [vmem:[#allocation2 + $0x1f0] sm:$0x3f] }
  0x62   :  { %3706 = vst [vmem:[#allocation7 + $0x160] sm:$0x3f] %v3314_v33  ;;  %3707 = vst [vmem:[#allocation7 + $0x168] sm:$0x3f] %v3315_v34  ;;  %v745_v47 = vrot.slane %v434_v20, %v4199_v8  ;;  %v749_v48 = vrot.slane %v434_v20, %v4201_v9  ;;  %v2534_v49 = vadd.f32 %v721_v38, %v84_v25  ;;  %v99_v29 = vld [vmem:[#allocation2 + $0x1f8] sm:$0x3f] }
  0x63   :  { %3708 = vst [vmem:[#allocation7 + $0x170] sm:$0x3f] %v3316_v35  ;;  %3709 = vst [vmem:[#allocation7 + $0x178] sm:$0x3f] %v3317_v36  ;;  %v2535_v50 = vadd.f32 %v725_v39, %v85_v26  ;;  %v2536_v51 = vadd.f32 %v729_v40, %v86_v27  ;;  %v2537_v52 = vadd.f32 %v733_v41, %v87_v32  ;;  %v97_v27 = vld [vmem:[#allocation2 + $0x1e8] sm:$0x3f] }
  0x64   :  { %v2538_v53 = vadd.f32 %v737_v45, %v88_v37  ;;  %v2539_v54 = vadd.f32 %v741_v46, %v89_v42  ;;  %v2540_v55 = vadd.f32 %v745_v47, %v90_v43  ;;  %v2541_v56 = vadd.f32 %v749_v48, %v91_v44  ;;  %v436_v46 = vld [vmem:[#allocation5 + $0x40] sm:$0xff] }
  0x65   :  { %v2926_v57 = vmax.f32 %v2534_v49, 0.0  ;;  %v2927_v58 = vmax.f32 %v2535_v50, 0.0  ;;  %v2928_v59 = vmax.f32 %v2536_v51, 0.0  ;;  %v2929_v60 = vmax.f32 %v2537_v52, 0.0  ;;  %v100_v51 = vld [vmem:[#allocation2 + $0x200] sm:$0x3f] }
  0x66   :  { %v2930_v62 = vmax.f32 %v2538_v53, 0.0  ;;  %v2931_v63 = vmax.f32 %v2539_v54, 0.0  ;;  %v2932_v0 = vmax.f32 %v2540_v55, 0.0  ;;  %v2933_v1 = vmax.f32 %v2541_v56, 0.0  ;;  %v101_v52 = vld [vmem:[#allocation2 + $0x208] sm:$0x3f] }
  0x67   :  { %v3318_v13 = vmin.f32 %v2926_v57, 1.0  ;;  %v3319_v14 = vmin.f32 %v2927_v58, 1.0  ;;  %v3320_v15 = vmin.f32 %v2928_v59, 1.0  ;;  %v3321_v16 = vmin.f32 %v2929_v60, 1.0  ;;  %v102_v53 = vld [vmem:[#allocation2 + $0x210] sm:$0x3f] }
  0x68   :  { %v3322_v18 = vmin.f32 %v2930_v62, 1.0  ;;  %v3323_v19 = vmin.f32 %v2931_v63, 1.0  ;;  %v3324_v20 = vmin.f32 %v2932_v0, 1.0  ;;  %v3325_v21 = vmin.f32 %v2933_v1, 1.0  ;;  %v103_v58 = vld [vmem:[#allocation2 + $0x218] sm:$0x3f] }
  0x69   :  { %3710 = vst [vmem:[#allocation7 + $0x180] sm:$0x3f] %v3318_v13  ;;  %3711 = vst [vmem:[#allocation7 + $0x188] sm:$0x3f] %v3319_v14  ;;  %v753_v23 = vrot.slane %v435_v61, %v4187_v2  ;;  %v757_v24 = vrot.slane %v435_v61, %v4189_v3  ;;  %v761_v25 = vrot.slane %v435_v61, %v4191_v4  ;;  %v104_v63 = vld [vmem:[#allocation2 + $0x220] sm:$0x3f] }
  0x6a   :  { %3712 = vst [vmem:[#allocation7 + $0x190] sm:$0x3f] %v3320_v15  ;;  %3713 = vst [vmem:[#allocation7 + $0x198] sm:$0x3f] %v3321_v16  ;;  %v765_v26 = vrot.slane %v435_v61, %v4193_v5  ;;  %v769_v30 = vrot.slane %v435_v61, %v4195_v6  ;;  %v773_v31 = vrot.slane %v435_v61, %v4197_v7  ;;  %v106_v13 = vld [vmem:[#allocation2 + $0x230] sm:$0x3f] }
  0x6b   :  { %3714 = vst [vmem:[#allocation7 + $0x1a0] sm:$0x3f] %v3322_v18  ;;  %3715 = vst [vmem:[#allocation7 + $0x1a8] sm:$0x3f] %v3323_v19  ;;  %v777_v32 = vrot.slane %v435_v61, %v4199_v8  ;;  %v781_v33 = vrot.slane %v435_v61, %v4201_v9  ;;  %v2542_v34 = vadd.f32 %v753_v23, %v92_v10  ;;  %v107_v14 = vld [vmem:[#allocation2 + $0x238] sm:$0x3f] }
  0x6c   :  { %3716 = vst [vmem:[#allocation7 + $0x1b0] sm:$0x3f] %v3324_v20  ;;  %3717 = vst [vmem:[#allocation7 + $0x1b8] sm:$0x3f] %v3325_v21  ;;  %v2543_v35 = vadd.f32 %v757_v24, %v93_v11  ;;  %v2544_v36 = vadd.f32 %v761_v25, %v94_v12  ;;  %v2545_v37 = vadd.f32 %v765_v26, %v95_v17  ;;  %v105_v12 = vld [vmem:[#allocation2 + $0x228] sm:$0x3f] }
  0x6d   :  { %v2546_v38 = vadd.f32 %v769_v30, %v96_v22  ;;  %v2547_v39 = vadd.f32 %v773_v31, %v97_v27  ;;  %v2548_v40 = vadd.f32 %v777_v32, %v98_v28  ;;  %v2549_v41 = vadd.f32 %v781_v33, %v99_v29  ;;  %v437_v31 = vld [vmem:[#allocation5 + $0x48] sm:$0xff] }
  0x6e   :  { %v2934_v42 = vmax.f32 %v2542_v34, 0.0  ;;  %v2935_v43 = vmax.f32 %v2543_v35, 0.0  ;;  %v2936_v44 = vmax.f32 %v2544_v36, 0.0  ;;  %v2937_v45 = vmax.f32 %v2545_v37, 0.0  ;;  %v108_v36 = vld [vmem:[#allocation2 + $0x240] sm:$0x3f] }
  0x6f   :  { %v2938_v47 = vmax.f32 %v2546_v38, 0.0  ;;  %v2939_v48 = vmax.f32 %v2547_v39, 0.0  ;;  %v2940_v49 = vmax.f32 %v2548_v40, 0.0  ;;  %v2941_v50 = vmax.f32 %v2549_v41, 0.0  ;;  %v109_v37 = vld [vmem:[#allocation2 + $0x248] sm:$0x3f] }
  0x70   :  { %v3326_v54 = vmin.f32 %v2934_v42, 1.0  ;;  %v3327_v55 = vmin.f32 %v2935_v43, 1.0  ;;  %v3328_v56 = vmin.f32 %v2936_v44, 1.0  ;;  %v3329_v57 = vmin.f32 %v2937_v45, 1.0  ;;  %v110_v38 = vld [vmem:[#allocation2 + $0x250] sm:$0x3f] }
  0x71   :  { %v3330_v59 = vmin.f32 %v2938_v47, 1.0  ;;  %v3331_v60 = vmin.f32 %v2939_v48, 1.0  ;;  %v3332_v61 = vmin.f32 %v2940_v49, 1.0  ;;  %v3333_v62 = vmin.f32 %v2941_v50, 1.0  ;;  %v111_v43 = vld [vmem:[#allocation2 + $0x258] sm:$0x3f] }
  0x72   :  { %3718 = vst [vmem:[#allocation7 + $0x1c0] sm:$0x3f] %v3326_v54  ;;  %3719 = vst [vmem:[#allocation7 + $0x1c8] sm:$0x3f] %v3327_v55  ;;  %v785_v0 = vrot.slane %v436_v46, %v4187_v2  ;;  %v789_v1 = vrot.slane %v436_v46, %v4189_v3  ;;  %v793_v10 = vrot.slane %v436_v46, %v4191_v4  ;;  %v112_v48 = vld [vmem:[#allocation2 + $0x260] sm:$0x3f] }
  0x73   :  { %3720 = vst [vmem:[#allocation7 + $0x1d0] sm:$0x3f] %v3328_v56  ;;  %3721 = vst [vmem:[#allocation7 + $0x1d8] sm:$0x3f] %v3329_v57  ;;  %v797_v11 = vrot.slane %v436_v46, %v4193_v5  ;;  %v801_v15 = vrot.slane %v436_v46, %v4195_v6  ;;  %v805_v16 = vrot.slane %v436_v46, %v4197_v7  ;;  %v114_v54 = vld [vmem:[#allocation2 + $0x270] sm:$0x3f] }
  0x74   :  { %3722 = vst [vmem:[#allocation7 + $0x1e0] sm:$0x3f] %v3330_v59  ;;  %3723 = vst [vmem:[#allocation7 + $0x1e8] sm:$0x3f] %v3331_v60  ;;  %v809_v17 = vrot.slane %v436_v46, %v4199_v8  ;;  %v813_v18 = vrot.slane %v436_v46, %v4201_v9  ;;  %v2550_v19 = vadd.f32 %v785_v0, %v100_v51  ;;  %v115_v55 = vld [vmem:[#allocation2 + $0x278] sm:$0x3f] }
  0x75   :  { %3724 = vst [vmem:[#allocation7 + $0x1f0] sm:$0x3f] %v3332_v61  ;;  %3725 = vst [vmem:[#allocation7 + $0x1f8] sm:$0x3f] %v3333_v62  ;;  %v2551_v20 = vadd.f32 %v789_v1, %v101_v52  ;;  %v2552_v21 = vadd.f32 %v793_v10, %v102_v53  ;;  %v2553_v22 = vadd.f32 %v797_v11, %v103_v58  ;;  %v113_v53 = vld [vmem:[#allocation2 + $0x268] sm:$0x3f] }
  0x76   :  { %v2554_v23 = vadd.f32 %v801_v15, %v104_v63  ;;  %v2555_v24 = vadd.f32 %v805_v16, %v105_v12  ;;  %v2556_v25 = vadd.f32 %v809_v17, %v106_v13  ;;  %v2557_v26 = vadd.f32 %v813_v18, %v107_v14  ;;  %v438_v16 = vld [vmem:[#allocation5 + $0x50] sm:$0xff] }
  0x77   :  { %v2942_v27 = vmax.f32 %v2550_v19, 0.0  ;;  %v2943_v28 = vmax.f32 %v2551_v20, 0.0  ;;  %v2944_v29 = vmax.f32 %v2552_v21, 0.0  ;;  %v2945_v30 = vmax.f32 %v2553_v22, 0.0  ;;  %v116_v21 = vld [vmem:[#allocation2 + $0x280] sm:$0x3f] }
  0x78   :  { %v2946_v32 = vmax.f32 %v2554_v23, 0.0  ;;  %v2947_v33 = vmax.f32 %v2555_v24, 0.0  ;;  %v2948_v34 = vmax.f32 %v2556_v25, 0.0  ;;  %v2949_v35 = vmax.f32 %v2557_v26, 0.0  ;;  %v117_v22 = vld [vmem:[#allocation2 + $0x288] sm:$0x3f] }
  0x79   :  { %v3334_v39 = vmin.f32 %v2942_v27, 1.0  ;;  %v3335_v40 = vmin.f32 %v2943_v28, 1.0  ;;  %v3336_v41 = vmin.f32 %v2944_v29, 1.0  ;;  %v3337_v42 = vmin.f32 %v2945_v30, 1.0  ;;  %v118_v23 = vld [vmem:[#allocation2 + $0x290] sm:$0x3f] }
  0x7a   :  { %v3338_v44 = vmin.f32 %v2946_v32, 1.0  ;;  %v3339_v45 = vmin.f32 %v2947_v33, 1.0  ;;  %v3340_v46 = vmin.f32 %v2948_v34, 1.0  ;;  %v3341_v47 = vmin.f32 %v2949_v35, 1.0  ;;  %v119_v28 = vld [vmem:[#allocation2 + $0x298] sm:$0x3f] }
  0x7b   :  { %3726 = vst [vmem:[#allocation7 + $0x200] sm:$0x3f] %v3334_v39  ;;  %3727 = vst [vmem:[#allocation7 + $0x208] sm:$0x3f] %v3335_v40  ;;  %v817_v49 = vrot.slane %v437_v31, %v4187_v2  ;;  %v821_v50 = vrot.slane %v437_v31, %v4189_v3  ;;  %v825_v51 = vrot.slane %v437_v31, %v4191_v4  ;;  %v120_v33 = vld [vmem:[#allocation2 + $0x2a0] sm:$0x3f] }
  0x7c   :  { %3728 = vst [vmem:[#allocation7 + $0x210] sm:$0x3f] %v3336_v41  ;;  %3729 = vst [vmem:[#allocation7 + $0x218] sm:$0x3f] %v3337_v42  ;;  %v829_v52 = vrot.slane %v437_v31, %v4193_v5  ;;  %v833_v56 = vrot.slane %v437_v31, %v4195_v6  ;;  %v837_v57 = vrot.slane %v437_v31, %v4197_v7  ;;  %v122_v39 = vld [vmem:[#allocation2 + $0x2b0] sm:$0x3f] }
  0x7d   :  { %3730 = vst [vmem:[#allocation7 + $0x220] sm:$0x3f] %v3338_v44  ;;  %3731 = vst [vmem:[#allocation7 + $0x228] sm:$0x3f] %v3339_v45  ;;  %v841_v58 = vrot.slane %v437_v31, %v4199_v8  ;;  %v845_v59 = vrot.slane %v437_v31, %v4201_v9  ;;  %v2558_v60 = vadd.f32 %v817_v49, %v108_v36  ;;  %v123_v40 = vld [vmem:[#allocation2 + $0x2b8] sm:$0x3f] }
  0x7e   :  { %3732 = vst [vmem:[#allocation7 + $0x230] sm:$0x3f] %v3340_v46  ;;  %3733 = vst [vmem:[#allocation7 + $0x238] sm:$0x3f] %v3341_v47  ;;  %v2559_v61 = vadd.f32 %v821_v50, %v109_v37  ;;  %v2560_v62 = vadd.f32 %v825_v51, %v110_v38  ;;  %v2561_v63 = vadd.f32 %v829_v52, %v111_v43  ;;  %v121_v38 = vld [vmem:[#allocation2 + $0x2a8] sm:$0x3f] }
  0x7f   :  { %v2562_v0 = vadd.f32 %v833_v56, %v112_v48  ;;  %v2563_v1 = vadd.f32 %v837_v57, %v113_v53  ;;  %v2564_v10 = vadd.f32 %v841_v58, %v114_v54  ;;  %v2565_v11 = vadd.f32 %v845_v59, %v115_v55  ;;  %v439_v57 = vld [vmem:[#allocation5 + $0x58] sm:$0xff] }
  0x80   :  { %v2950_v12 = vmax.f32 %v2558_v60, 0.0  ;;  %v2951_v13 = vmax.f32 %v2559_v61, 0.0  ;;  %v2952_v14 = vmax.f32 %v2560_v62, 0.0  ;;  %v2953_v15 = vmax.f32 %v2561_v63, 0.0  ;;  %v124_v62 = vld [vmem:[#allocation2 + $0x2c0] sm:$0x3f] }
  0x81   :  { %v2954_v17 = vmax.f32 %v2562_v0, 0.0  ;;  %v2955_v18 = vmax.f32 %v2563_v1, 0.0  ;;  %v2956_v19 = vmax.f32 %v2564_v10, 0.0  ;;  %v2957_v20 = vmax.f32 %v2565_v11, 0.0  ;;  %v125_v63 = vld [vmem:[#allocation2 + $0x2c8] sm:$0x3f] }
  0x82   :  { %v3342_v24 = vmin.f32 %v2950_v12, 1.0  ;;  %v3343_v25 = vmin.f32 %v2951_v13, 1.0  ;;  %v3344_v26 = vmin.f32 %v2952_v14, 1.0  ;;  %v3345_v27 = vmin.f32 %v2953_v15, 1.0  ;;  %v126_v0 = vld [vmem:[#allocation2 + $0x2d0] sm:$0x3f] }
  0x83   :  { %v3346_v29 = vmin.f32 %v2954_v17, 1.0  ;;  %v3347_v30 = vmin.f32 %v2955_v18, 1.0  ;;  %v3348_v31 = vmin.f32 %v2956_v19, 1.0  ;;  %v3349_v32 = vmin.f32 %v2957_v20, 1.0  ;;  %v127_v13 = vld [vmem:[#allocation2 + $0x2d8] sm:$0x3f] }
  0x84   :  { %3734 = vst [vmem:[#allocation7 + $0x240] sm:$0x3f] %v3342_v24  ;;  %3735 = vst [vmem:[#allocation7 + $0x248] sm:$0x3f] %v3343_v25  ;;  %v849_v34 = vrot.slane %v438_v16, %v4187_v2  ;;  %v853_v35 = vrot.slane %v438_v16, %v4189_v3  ;;  %v857_v36 = vrot.slane %v438_v16, %v4191_v4  ;;  %v128_v18 = vld [vmem:[#allocation2 + $0x2e0] sm:$0x3f] }
  0x85   :  { %3736 = vst [vmem:[#allocation7 + $0x250] sm:$0x3f] %v3344_v26  ;;  %3737 = vst [vmem:[#allocation7 + $0x258] sm:$0x3f] %v3345_v27  ;;  %v861_v37 = vrot.slane %v438_v16, %v4193_v5  ;;  %v865_v41 = vrot.slane %v438_v16, %v4195_v6  ;;  %v869_v42 = vrot.slane %v438_v16, %v4197_v7  ;;  %v130_v24 = vld [vmem:[#allocation2 + $0x2f0] sm:$0x3f] }
  0x86   :  { %3738 = vst [vmem:[#allocation7 + $0x260] sm:$0x3f] %v3346_v29  ;;  %3739 = vst [vmem:[#allocation7 + $0x268] sm:$0x3f] %v3347_v30  ;;  %v873_v43 = vrot.slane %v438_v16, %v4199_v8  ;;  %v877_v44 = vrot.slane %v438_v16, %v4201_v9  ;;  %v2566_v45 = vadd.f32 %v849_v34, %v116_v21  ;;  %v131_v25 = vld [vmem:[#allocation2 + $0x2f8] sm:$0x3f] }
  0x87   :  { %3740 = vst [vmem:[#allocation7 + $0x270] sm:$0x3f] %v3348_v31  ;;  %3741 = vst [vmem:[#allocation7 + $0x278] sm:$0x3f] %v3349_v32  ;;  %v2567_v46 = vadd.f32 %v853_v35, %v117_v22  ;;  %v2568_v47 = vadd.f32 %v857_v36, %v118_v23  ;;  %v2569_v48 = vadd.f32 %v861_v37, %v119_v28  ;;  %v129_v23 = vld [vmem:[#allocation2 + $0x2e8] sm:$0x3f] }
  0x88   :  { %v2570_v49 = vadd.f32 %v865_v41, %v120_v33  ;;  %v2571_v50 = vadd.f32 %v869_v42, %v121_v38  ;;  %v2572_v51 = vadd.f32 %v873_v43, %v122_v39  ;;  %v2573_v52 = vadd.f32 %v877_v44, %v123_v40  ;;  %v440_v42 = vld [vmem:[#allocation5 + $0x60] sm:$0xff] }
  0x89   :  { %v2958_v53 = vmax.f32 %v2566_v45, 0.0  ;;  %v2959_v54 = vmax.f32 %v2567_v46, 0.0  ;;  %v2960_v55 = vmax.f32 %v2568_v47, 0.0  ;;  %v2961_v56 = vmax.f32 %v2569_v48, 0.0  ;;  %v132_v47 = vld [vmem:[#allocation2 + $0x300] sm:$0x3f] }
  0x8a   :  { %v2962_v58 = vmax.f32 %v2570_v49, 0.0  ;;  %v2963_v59 = vmax.f32 %v2571_v50, 0.0  ;;  %v2964_v60 = vmax.f32 %v2572_v51, 0.0  ;;  %v2965_v61 = vmax.f32 %v2573_v52, 0.0  ;;  %v133_v48 = vld [vmem:[#allocation2 + $0x308] sm:$0x3f] }
  0x8b   :  { %v3350_v1 = vmin.f32 %v2958_v53, 1.0  ;;  %v3351_v10 = vmin.f32 %v2959_v54, 1.0  ;;  %v3352_v11 = vmin.f32 %v2960_v55, 1.0  ;;  %v3353_v12 = vmin.f32 %v2961_v56, 1.0  ;;  %v134_v49 = vld [vmem:[#allocation2 + $0x310] sm:$0x3f] }
  0x8c   :  { %v3354_v14 = vmin.f32 %v2962_v58, 1.0  ;;  %v3355_v15 = vmin.f32 %v2963_v59, 1.0  ;;  %v3356_v16 = vmin.f32 %v2964_v60, 1.0  ;;  %v3357_v17 = vmin.f32 %v2965_v61, 1.0  ;;  %v135_v54 = vld [vmem:[#allocation2 + $0x318] sm:$0x3f] }
  0x8d   :  { %3742 = vst [vmem:[#allocation7 + $0x280] sm:$0x3f] %v3350_v1  ;;  %3743 = vst [vmem:[#allocation7 + $0x288] sm:$0x3f] %v3351_v10  ;;  %v881_v19 = vrot.slane %v439_v57, %v4187_v2  ;;  %v885_v20 = vrot.slane %v439_v57, %v4189_v3  ;;  %v889_v21 = vrot.slane %v439_v57, %v4191_v4  ;;  %v136_v59 = vld [vmem:[#allocation2 + $0x320] sm:$0x3f] }
  0x8e   :  { %3744 = vst [vmem:[#allocation7 + $0x290] sm:$0x3f] %v3352_v11  ;;  %3745 = vst [vmem:[#allocation7 + $0x298] sm:$0x3f] %v3353_v12  ;;  %v893_v22 = vrot.slane %v439_v57, %v4193_v5  ;;  %v897_v26 = vrot.slane %v439_v57, %v4195_v6  ;;  %v901_v27 = vrot.slane %v439_v57, %v4197_v7  ;;  %v138_v1 = vld [vmem:[#allocation2 + $0x330] sm:$0x3f] }
  0x8f   :  { %3746 = vst [vmem:[#allocation7 + $0x2a0] sm:$0x3f] %v3354_v14  ;;  %3747 = vst [vmem:[#allocation7 + $0x2a8] sm:$0x3f] %v3355_v15  ;;  %v905_v28 = vrot.slane %v439_v57, %v4199_v8  ;;  %v909_v29 = vrot.slane %v439_v57, %v4201_v9  ;;  %v2574_v30 = vadd.f32 %v881_v19, %v124_v62  ;;  %v139_v10 = vld [vmem:[#allocation2 + $0x338] sm:$0x3f] }
  0x90   :  { %3748 = vst [vmem:[#allocation7 + $0x2b0] sm:$0x3f] %v3356_v16  ;;  %3749 = vst [vmem:[#allocation7 + $0x2b8] sm:$0x3f] %v3357_v17  ;;  %v2575_v31 = vadd.f32 %v885_v20, %v125_v63  ;;  %v2576_v32 = vadd.f32 %v889_v21, %v126_v0  ;;  %v2577_v33 = vadd.f32 %v893_v22, %v127_v13  ;;  %v137_v0 = vld [vmem:[#allocation2 + $0x328] sm:$0x3f] }
  0x91   :  { %v2578_v34 = vadd.f32 %v897_v26, %v128_v18  ;;  %v2579_v35 = vadd.f32 %v901_v27, %v129_v23  ;;  %v2580_v36 = vadd.f32 %v905_v28, %v130_v24  ;;  %v2581_v37 = vadd.f32 %v909_v29, %v131_v25  ;;  %v441_v27 = vld [vmem:[#allocation5 + $0x68] sm:$0xff] }
  0x92   :  { %v2966_v38 = vmax.f32 %v2574_v30, 0.0  ;;  %v2967_v39 = vmax.f32 %v2575_v31, 0.0  ;;  %v2968_v40 = vmax.f32 %v2576_v32, 0.0  ;;  %v2969_v41 = vmax.f32 %v2577_v33, 0.0  ;;  %v140_v32 = vld [vmem:[#allocation2 + $0x340] sm:$0x3f] }
  0x93   :  { %v2970_v43 = vmax.f32 %v2578_v34, 0.0  ;;  %v2971_v44 = vmax.f32 %v2579_v35, 0.0  ;;  %v2972_v45 = vmax.f32 %v2580_v36, 0.0  ;;  %v2973_v46 = vmax.f32 %v2581_v37, 0.0  ;;  %v141_v33 = vld [vmem:[#allocation2 + $0x348] sm:$0x3f] }
  0x94   :  { %v3358_v50 = vmin.f32 %v2966_v38, 1.0  ;;  %v3359_v51 = vmin.f32 %v2967_v39, 1.0  ;;  %v3360_v52 = vmin.f32 %v2968_v40, 1.0  ;;  %v3361_v53 = vmin.f32 %v2969_v41, 1.0  ;;  %v142_v34 = vld [vmem:[#allocation2 + $0x350] sm:$0x3f] }
  0x95   :  { %v3362_v55 = vmin.f32 %v2970_v43, 1.0  ;;  %v3363_v56 = vmin.f32 %v2971_v44, 1.0  ;;  %v3364_v57 = vmin.f32 %v2972_v45, 1.0  ;;  %v3365_v58 = vmin.f32 %v2973_v46, 1.0  ;;  %v143_v39 = vld [vmem:[#allocation2 + $0x358] sm:$0x3f] }
  0x96   :  { %3750 = vst [vmem:[#allocation7 + $0x2c0] sm:$0x3f] %v3358_v50  ;;  %3751 = vst [vmem:[#allocation7 + $0x2c8] sm:$0x3f] %v3359_v51  ;;  %v913_v60 = vrot.slane %v440_v42, %v4187_v2  ;;  %v917_v61 = vrot.slane %v440_v42, %v4189_v3  ;;  %v921_v62 = vrot.slane %v440_v42, %v4191_v4  ;;  %v144_v44 = vld [vmem:[#allocation2 + $0x360] sm:$0x3f] }
  0x97   :  { %3752 = vst [vmem:[#allocation7 + $0x2d0] sm:$0x3f] %v3360_v52  ;;  %3753 = vst [vmem:[#allocation7 + $0x2d8] sm:$0x3f] %v3361_v53  ;;  %v925_v63 = vrot.slane %v440_v42, %v4193_v5  ;;  %v929_v11 = vrot.slane %v440_v42, %v4195_v6  ;;  %v933_v12 = vrot.slane %v440_v42, %v4197_v7  ;;  %v146_v50 = vld [vmem:[#allocation2 + $0x370] sm:$0x3f] }
  0x98   :  { %3754 = vst [vmem:[#allocation7 + $0x2e0] sm:$0x3f] %v3362_v55  ;;  %3755 = vst [vmem:[#allocation7 + $0x2e8] sm:$0x3f] %v3363_v56  ;;  %v937_v13 = vrot.slane %v440_v42, %v4199_v8  ;;  %v941_v14 = vrot.slane %v440_v42, %v4201_v9  ;;  %v2582_v15 = vadd.f32 %v913_v60, %v132_v47  ;;  %v147_v51 = vld [vmem:[#allocation2 + $0x378] sm:$0x3f] }
  0x99   :  { %3756 = vst [vmem:[#allocation7 + $0x2f0] sm:$0x3f] %v3364_v57  ;;  %3757 = vst [vmem:[#allocation7 + $0x2f8] sm:$0x3f] %v3365_v58  ;;  %v2583_v16 = vadd.f32 %v917_v61, %v133_v48  ;;  %v2584_v17 = vadd.f32 %v921_v62, %v134_v49  ;;  %v2585_v18 = vadd.f32 %v925_v63, %v135_v54  ;;  %v145_v49 = vld [vmem:[#allocation2 + $0x368] sm:$0x3f] }
  0x9a   :  { %v2586_v19 = vadd.f32 %v929_v11, %v136_v59  ;;  %v2587_v20 = vadd.f32 %v933_v12, %v137_v0  ;;  %v2588_v21 = vadd.f32 %v937_v13, %v138_v1  ;;  %v2589_v22 = vadd.f32 %v941_v14, %v139_v10  ;;  %v442_v12 = vld [vmem:[#allocation5 + $0x70] sm:$0xff] }
  0x9b   :  { %v2974_v23 = vmax.f32 %v2582_v15, 0.0  ;;  %v2975_v24 = vmax.f32 %v2583_v16, 0.0  ;;  %v2976_v25 = vmax.f32 %v2584_v17, 0.0  ;;  %v2977_v26 = vmax.f32 %v2585_v18, 0.0  ;;  %v148_v17 = vld [vmem:[#allocation2 + $0x380] sm:$0x3f] }
  0x9c   :  { %v2978_v28 = vmax.f32 %v2586_v19, 0.0  ;;  %v2979_v29 = vmax.f32 %v2587_v20, 0.0  ;;  %v2980_v30 = vmax.f32 %v2588_v21, 0.0  ;;  %v2981_v31 = vmax.f32 %v2589_v22, 0.0  ;;  %v149_v18 = vld [vmem:[#allocation2 + $0x388] sm:$0x3f] }
  0x9d   :  { %v3366_v35 = vmin.f32 %v2974_v23, 1.0  ;;  %v3367_v36 = vmin.f32 %v2975_v24, 1.0  ;;  %v3368_v37 = vmin.f32 %v2976_v25, 1.0  ;;  %v3369_v38 = vmin.f32 %v2977_v26, 1.0  ;;  %v150_v19 = vld [vmem:[#allocation2 + $0x390] sm:$0x3f] }
  0x9e   :  { %v3370_v40 = vmin.f32 %v2978_v28, 1.0  ;;  %v3371_v41 = vmin.f32 %v2979_v29, 1.0  ;;  %v3372_v42 = vmin.f32 %v2980_v30, 1.0  ;;  %v3373_v43 = vmin.f32 %v2981_v31, 1.0  ;;  %v151_v24 = vld [vmem:[#allocation2 + $0x398] sm:$0x3f] }
  0x9f   :  { %3758 = vst [vmem:[#allocation7 + $0x300] sm:$0x3f] %v3366_v35  ;;  %3759 = vst [vmem:[#allocation7 + $0x308] sm:$0x3f] %v3367_v36  ;;  %v945_v45 = vrot.slane %v441_v27, %v4187_v2  ;;  %v949_v46 = vrot.slane %v441_v27, %v4189_v3  ;;  %v953_v47 = vrot.slane %v441_v27, %v4191_v4  ;;  %v152_v29 = vld [vmem:[#allocation2 + $0x3a0] sm:$0x3f] }
  0xa0   :  { %3760 = vst [vmem:[#allocation7 + $0x310] sm:$0x3f] %v3368_v37  ;;  %3761 = vst [vmem:[#allocation7 + $0x318] sm:$0x3f] %v3369_v38  ;;  %v957_v48 = vrot.slane %v441_v27, %v4193_v5  ;;  %v961_v52 = vrot.slane %v441_v27, %v4195_v6  ;;  %v965_v53 = vrot.slane %v441_v27, %v4197_v7  ;;  %v154_v35 = vld [vmem:[#allocation2 + $0x3b0] sm:$0x3f] }
  0xa1   :  { %3762 = vst [vmem:[#allocation7 + $0x320] sm:$0x3f] %v3370_v40  ;;  %3763 = vst [vmem:[#allocation7 + $0x328] sm:$0x3f] %v3371_v41  ;;  %v969_v54 = vrot.slane %v441_v27, %v4199_v8  ;;  %v973_v55 = vrot.slane %v441_v27, %v4201_v9  ;;  %v2590_v56 = vadd.f32 %v945_v45, %v140_v32  ;;  %v155_v36 = vld [vmem:[#allocation2 + $0x3b8] sm:$0x3f] }
  0xa2   :  { %3764 = vst [vmem:[#allocation7 + $0x330] sm:$0x3f] %v3372_v42  ;;  %3765 = vst [vmem:[#allocation7 + $0x338] sm:$0x3f] %v3373_v43  ;;  %v2591_v57 = vadd.f32 %v949_v46, %v141_v33  ;;  %v2592_v58 = vadd.f32 %v953_v47, %v142_v34  ;;  %v2593_v59 = vadd.f32 %v957_v48, %v143_v39  ;;  %v153_v34 = vld [vmem:[#allocation2 + $0x3a8] sm:$0x3f] }
  0xa3   :  { %v2594_v60 = vadd.f32 %v961_v52, %v144_v44  ;;  %v2595_v61 = vadd.f32 %v965_v53, %v145_v49  ;;  %v2596_v62 = vadd.f32 %v969_v54, %v146_v50  ;;  %v2597_v63 = vadd.f32 %v973_v55, %v147_v51  ;;  %v443_v53 = vld [vmem:[#allocation5 + $0x78] sm:$0xff] }
  0xa4   :  { %v2982_v0 = vmax.f32 %v2590_v56, 0.0  ;;  %v2983_v1 = vmax.f32 %v2591_v57, 0.0  ;;  %v2984_v10 = vmax.f32 %v2592_v58, 0.0  ;;  %v2985_v11 = vmax.f32 %v2593_v59, 0.0  ;;  %v156_v58 = vld [vmem:[#allocation2 + $0x3c0] sm:$0x3f] }
  0xa5   :  { %v2986_v13 = vmax.f32 %v2594_v60, 0.0  ;;  %v2987_v14 = vmax.f32 %v2595_v61, 0.0  ;;  %v2988_v15 = vmax.f32 %v2596_v62, 0.0  ;;  %v2989_v16 = vmax.f32 %v2597_v63, 0.0  ;;  %v157_v59 = vld [vmem:[#allocation2 + $0x3c8] sm:$0x3f] }
  0xa6   :  { %v3374_v20 = vmin.f32 %v2982_v0, 1.0  ;;  %v3375_v21 = vmin.f32 %v2983_v1, 1.0  ;;  %v3376_v22 = vmin.f32 %v2984_v10, 1.0  ;;  %v3377_v23 = vmin.f32 %v2985_v11, 1.0  ;;  %v158_v60 = vld [vmem:[#allocation2 + $0x3d0] sm:$0x3f] }
  0xa7   :  { %v3378_v25 = vmin.f32 %v2986_v13, 1.0  ;;  %v3379_v26 = vmin.f32 %v2987_v14, 1.0  ;;  %v3380_v27 = vmin.f32 %v2988_v15, 1.0  ;;  %v3381_v28 = vmin.f32 %v2989_v16, 1.0  ;;  %v159_v1 = vld [vmem:[#allocation2 + $0x3d8] sm:$0x3f] }
  0xa8   :  { %3766 = vst [vmem:[#allocation7 + $0x340] sm:$0x3f] %v3374_v20  ;;  %3767 = vst [vmem:[#allocation7 + $0x348] sm:$0x3f] %v3375_v21  ;;  %v977_v30 = vrot.slane %v442_v12, %v4187_v2  ;;  %v981_v31 = vrot.slane %v442_v12, %v4189_v3  ;;  %v985_v32 = vrot.slane %v442_v12, %v4191_v4  ;;  %v160_v14 = vld [vmem:[#allocation2 + $0x3e0] sm:$0x3f] }
  0xa9   :  { %3768 = vst [vmem:[#allocation7 + $0x350] sm:$0x3f] %v3376_v22  ;;  %3769 = vst [vmem:[#allocation7 + $0x358] sm:$0x3f] %v3377_v23  ;;  %v989_v33 = vrot.slane %v442_v12, %v4193_v5  ;;  %v993_v37 = vrot.slane %v442_v12, %v4195_v6  ;;  %v997_v38 = vrot.slane %v442_v12, %v4197_v7  ;;  %v162_v20 = vld [vmem:[#allocation2 + $0x3f0] sm:$0x3f] }
  0xaa   :  { %3770 = vst [vmem:[#allocation7 + $0x360] sm:$0x3f] %v3378_v25  ;;  %3771 = vst [vmem:[#allocation7 + $0x368] sm:$0x3f] %v3379_v26  ;;  %v1001_v39 = vrot.slane %v442_v12, %v4199_v8  ;;  %v1005_v40 = vrot.slane %v442_v12, %v4201_v9  ;;  %v2598_v41 = vadd.f32 %v977_v30, %v148_v17  ;;  %v163_v21 = vld [vmem:[#allocation2 + $0x3f8] sm:$0x3f] }
  0xab   :  { %3772 = vst [vmem:[#allocation7 + $0x370] sm:$0x3f] %v3380_v27  ;;  %3773 = vst [vmem:[#allocation7 + $0x378] sm:$0x3f] %v3381_v28  ;;  %v2599_v42 = vadd.f32 %v981_v31, %v149_v18  ;;  %v2600_v43 = vadd.f32 %v985_v32, %v150_v19  ;;  %v2601_v44 = vadd.f32 %v989_v33, %v151_v24  ;;  %v161_v19 = vld [vmem:[#allocation2 + $0x3e8] sm:$0x3f] }
  0xac   :  { %v2602_v45 = vadd.f32 %v993_v37, %v152_v29  ;;  %v2603_v46 = vadd.f32 %v997_v38, %v153_v34  ;;  %v2604_v47 = vadd.f32 %v1001_v39, %v154_v35  ;;  %v2605_v48 = vadd.f32 %v1005_v40, %v155_v36  ;;  %v444_v38 = vld [vmem:[#allocation5 + $0x80] sm:$0xff] }
  0xad   :  { %v2990_v49 = vmax.f32 %v2598_v41, 0.0  ;;  %v2991_v50 = vmax.f32 %v2599_v42, 0.0  ;;  %v2992_v51 = vmax.f32 %v2600_v43, 0.0  ;;  %v2993_v52 = vmax.f32 %v2601_v44, 0.0  ;;  %v164_v43 = vld [vmem:[#allocation2 + $0x400] sm:$0x3f] }
  0xae   :  { %v2994_v54 = vmax.f32 %v2602_v45, 0.0  ;;  %v2995_v55 = vmax.f32 %v2603_v46, 0.0  ;;  %v2996_v56 = vmax.f32 %v2604_v47, 0.0  ;;  %v2997_v57 = vmax.f32 %v2605_v48, 0.0  ;;  %v165_v44 = vld [vmem:[#allocation2 + $0x408] sm:$0x3f] }
  0xaf   :  { %v3382_v61 = vmin.f32 %v2990_v49, 1.0  ;;  %v3383_v62 = vmin.f32 %v2991_v50, 1.0  ;;  %v3384_v63 = vmin.f32 %v2992_v51, 1.0  ;;  %v3385_v0 = vmin.f32 %v2993_v52, 1.0  ;;  %v166_v45 = vld [vmem:[#allocation2 + $0x410] sm:$0x3f] }
  0xb0   :  { %v3386_v10 = vmin.f32 %v2994_v54, 1.0  ;;  %v3387_v11 = vmin.f32 %v2995_v55, 1.0  ;;  %v3388_v12 = vmin.f32 %v2996_v56, 1.0  ;;  %v3389_v13 = vmin.f32 %v2997_v57, 1.0  ;;  %v167_v50 = vld [vmem:[#allocation2 + $0x418] sm:$0x3f] }
  0xb1   :  { %3774 = vst [vmem:[#allocation7 + $0x380] sm:$0x3f] %v3382_v61  ;;  %3775 = vst [vmem:[#allocation7 + $0x388] sm:$0x3f] %v3383_v62  ;;  %v1009_v15 = vrot.slane %v443_v53, %v4187_v2  ;;  %v1013_v16 = vrot.slane %v443_v53, %v4189_v3  ;;  %v1017_v17 = vrot.slane %v443_v53, %v4191_v4  ;;  %v168_v55 = vld [vmem:[#allocation2 + $0x420] sm:$0x3f] }
  0xb2   :  { %3776 = vst [vmem:[#allocation7 + $0x390] sm:$0x3f] %v3384_v63  ;;  %3777 = vst [vmem:[#allocation7 + $0x398] sm:$0x3f] %v3385_v0  ;;  %v1021_v18 = vrot.slane %v443_v53, %v4193_v5  ;;  %v1025_v22 = vrot.slane %v443_v53, %v4195_v6  ;;  %v1029_v23 = vrot.slane %v443_v53, %v4197_v7  ;;  %v170_v61 = vld [vmem:[#allocation2 + $0x430] sm:$0x3f] }
  0xb3   :  { %3778 = vst [vmem:[#allocation7 + $0x3a0] sm:$0x3f] %v3386_v10  ;;  %3779 = vst [vmem:[#allocation7 + $0x3a8] sm:$0x3f] %v3387_v11  ;;  %v1033_v24 = vrot.slane %v443_v53, %v4199_v8  ;;  %v1037_v25 = vrot.slane %v443_v53, %v4201_v9  ;;  %v2606_v26 = vadd.f32 %v1009_v15, %v156_v58  ;;  %v171_v62 = vld [vmem:[#allocation2 + $0x438] sm:$0x3f] }
  0xb4   :  { %3780 = vst [vmem:[#allocation7 + $0x3b0] sm:$0x3f] %v3388_v12  ;;  %3781 = vst [vmem:[#allocation7 + $0x3b8] sm:$0x3f] %v3389_v13  ;;  %v2607_v27 = vadd.f32 %v1013_v16, %v157_v59  ;;  %v2608_v28 = vadd.f32 %v1017_v17, %v158_v60  ;;  %v2609_v29 = vadd.f32 %v1021_v18, %v159_v1  ;;  %v169_v60 = vld [vmem:[#allocation2 + $0x428] sm:$0x3f] }
  0xb5   :  { %v2610_v30 = vadd.f32 %v1025_v22, %v160_v14  ;;  %v2611_v31 = vadd.f32 %v1029_v23, %v161_v19  ;;  %v2612_v32 = vadd.f32 %v1033_v24, %v162_v20  ;;  %v2613_v33 = vadd.f32 %v1037_v25, %v163_v21  ;;  %v445_v23 = vld [vmem:[#allocation5 + $0x88] sm:$0xff] }
  0xb6   :  { %v2998_v34 = vmax.f32 %v2606_v26, 0.0  ;;  %v2999_v35 = vmax.f32 %v2607_v27, 0.0  ;;  %v3000_v36 = vmax.f32 %v2608_v28, 0.0  ;;  %v3001_v37 = vmax.f32 %v2609_v29, 0.0  ;;  %v172_v28 = vld [vmem:[#allocation2 + $0x440] sm:$0x3f] }
  0xb7   :  { %v3002_v39 = vmax.f32 %v2610_v30, 0.0  ;;  %v3003_v40 = vmax.f32 %v2611_v31, 0.0  ;;  %v3004_v41 = vmax.f32 %v2612_v32, 0.0  ;;  %v3005_v42 = vmax.f32 %v2613_v33, 0.0  ;;  %v173_v29 = vld [vmem:[#allocation2 + $0x448] sm:$0x3f] }
  0xb8   :  { %v3390_v46 = vmin.f32 %v2998_v34, 1.0  ;;  %v3391_v47 = vmin.f32 %v2999_v35, 1.0  ;;  %v3392_v48 = vmin.f32 %v3000_v36, 1.0  ;;  %v3393_v49 = vmin.f32 %v3001_v37, 1.0  ;;  %v174_v30 = vld [vmem:[#allocation2 + $0x450] sm:$0x3f] }
  0xb9   :  { %v3394_v51 = vmin.f32 %v3002_v39, 1.0  ;;  %v3395_v52 = vmin.f32 %v3003_v40, 1.0  ;;  %v3396_v53 = vmin.f32 %v3004_v41, 1.0  ;;  %v3397_v54 = vmin.f32 %v3005_v42, 1.0  ;;  %v175_v35 = vld [vmem:[#allocation2 + $0x458] sm:$0x3f] }
  0xba   :  { %3782 = vst [vmem:[#allocation7 + $0x3c0] sm:$0x3f] %v3390_v46  ;;  %3783 = vst [vmem:[#allocation7 + $0x3c8] sm:$0x3f] %v3391_v47  ;;  %v1041_v56 = vrot.slane %v444_v38, %v4187_v2  ;;  %v1045_v57 = vrot.slane %v444_v38, %v4189_v3  ;;  %v1049_v58 = vrot.slane %v444_v38, %v4191_v4  ;;  %v176_v40 = vld [vmem:[#allocation2 + $0x460] sm:$0x3f] }
  0xbb   :  { %3784 = vst [vmem:[#allocation7 + $0x3d0] sm:$0x3f] %v3392_v48  ;;  %3785 = vst [vmem:[#allocation7 + $0x3d8] sm:$0x3f] %v3393_v49  ;;  %v1053_v59 = vrot.slane %v444_v38, %v4193_v5  ;;  %v1057_v63 = vrot.slane %v444_v38, %v4195_v6  ;;  %v1061_v0 = vrot.slane %v444_v38, %v4197_v7  ;;  %v178_v46 = vld [vmem:[#allocation2 + $0x470] sm:$0x3f] }
  0xbc   :  { %3786 = vst [vmem:[#allocation7 + $0x3e0] sm:$0x3f] %v3394_v51  ;;  %3787 = vst [vmem:[#allocation7 + $0x3e8] sm:$0x3f] %v3395_v52  ;;  %v1065_v1 = vrot.slane %v444_v38, %v4199_v8  ;;  %v1069_v10 = vrot.slane %v444_v38, %v4201_v9  ;;  %v2614_v11 = vadd.f32 %v1041_v56, %v164_v43  ;;  %v179_v47 = vld [vmem:[#allocation2 + $0x478] sm:$0x3f] }
  0xbd   :  { %3788 = vst [vmem:[#allocation7 + $0x3f0] sm:$0x3f] %v3396_v53  ;;  %3789 = vst [vmem:[#allocation7 + $0x3f8] sm:$0x3f] %v3397_v54  ;;  %v2615_v12 = vadd.f32 %v1045_v57, %v165_v44  ;;  %v2616_v13 = vadd.f32 %v1049_v58, %v166_v45  ;;  %v2617_v14 = vadd.f32 %v1053_v59, %v167_v50  ;;  %v177_v45 = vld [vmem:[#allocation2 + $0x468] sm:$0x3f] }
  0xbe   :  { %v2618_v15 = vadd.f32 %v1057_v63, %v168_v55  ;;  %v2619_v16 = vadd.f32 %v1061_v0, %v169_v60  ;;  %v2620_v17 = vadd.f32 %v1065_v1, %v170_v61  ;;  %v2621_v18 = vadd.f32 %v1069_v10, %v171_v62  ;;  %v446_v0 = vld [vmem:[#allocation5 + $0x90] sm:$0xff] }
  0xbf   :  { %v3006_v19 = vmax.f32 %v2614_v11, 0.0  ;;  %v3007_v20 = vmax.f32 %v2615_v12, 0.0  ;;  %v3008_v21 = vmax.f32 %v2616_v13, 0.0  ;;  %v3009_v22 = vmax.f32 %v2617_v14, 0.0  ;;  %v180_v13 = vld [vmem:[#allocation2 + $0x480] sm:$0x3f] }
  0xc0   :  { %v3010_v24 = vmax.f32 %v2618_v15, 0.0  ;;  %v3011_v25 = vmax.f32 %v2619_v16, 0.0  ;;  %v3012_v26 = vmax.f32 %v2620_v17, 0.0  ;;  %v3013_v27 = vmax.f32 %v2621_v18, 0.0  ;;  %v181_v14 = vld [vmem:[#allocation2 + $0x488] sm:$0x3f] }
  0xc1   :  { %v3398_v31 = vmin.f32 %v3006_v19, 1.0  ;;  %v3399_v32 = vmin.f32 %v3007_v20, 1.0  ;;  %v3400_v33 = vmin.f32 %v3008_v21, 1.0  ;;  %v3401_v34 = vmin.f32 %v3009_v22, 1.0  ;;  %v182_v15 = vld [vmem:[#allocation2 + $0x490] sm:$0x3f] }
  0xc2   :  { %v3402_v36 = vmin.f32 %v3010_v24, 1.0  ;;  %v3403_v37 = vmin.f32 %v3011_v25, 1.0  ;;  %v3404_v38 = vmin.f32 %v3012_v26, 1.0  ;;  %v3405_v39 = vmin.f32 %v3013_v27, 1.0  ;;  %v183_v20 = vld [vmem:[#allocation2 + $0x498] sm:$0x3f] }
  0xc3   :  { %3790 = vst [vmem:[#allocation7 + $0x400] sm:$0x3f] %v3398_v31  ;;  %3791 = vst [vmem:[#allocation7 + $0x408] sm:$0x3f] %v3399_v32  ;;  %v1073_v41 = vrot.slane %v445_v23, %v4187_v2  ;;  %v1077_v42 = vrot.slane %v445_v23, %v4189_v3  ;;  %v1081_v43 = vrot.slane %v445_v23, %v4191_v4  ;;  %v184_v25 = vld [vmem:[#allocation2 + $0x4a0] sm:$0x3f] }
  0xc4   :  { %3792 = vst [vmem:[#allocation7 + $0x410] sm:$0x3f] %v3400_v33  ;;  %3793 = vst [vmem:[#allocation7 + $0x418] sm:$0x3f] %v3401_v34  ;;  %v1085_v44 = vrot.slane %v445_v23, %v4193_v5  ;;  %v1089_v48 = vrot.slane %v445_v23, %v4195_v6  ;;  %v1093_v49 = vrot.slane %v445_v23, %v4197_v7  ;;  %v186_v31 = vld [vmem:[#allocation2 + $0x4b0] sm:$0x3f] }
  0xc5   :  { %3794 = vst [vmem:[#allocation7 + $0x420] sm:$0x3f] %v3402_v36  ;;  %3795 = vst [vmem:[#allocation7 + $0x428] sm:$0x3f] %v3403_v37  ;;  %v1097_v50 = vrot.slane %v445_v23, %v4199_v8  ;;  %v1101_v51 = vrot.slane %v445_v23, %v4201_v9  ;;  %v2622_v52 = vadd.f32 %v1073_v41, %v172_v28  ;;  %v187_v32 = vld [vmem:[#allocation2 + $0x4b8] sm:$0x3f] }
  0xc6   :  { %3796 = vst [vmem:[#allocation7 + $0x430] sm:$0x3f] %v3404_v38  ;;  %3797 = vst [vmem:[#allocation7 + $0x438] sm:$0x3f] %v3405_v39  ;;  %v2623_v53 = vadd.f32 %v1077_v42, %v173_v29  ;;  %v2624_v54 = vadd.f32 %v1081_v43, %v174_v30  ;;  %v2625_v55 = vadd.f32 %v1085_v44, %v175_v35  ;;  %v185_v30 = vld [vmem:[#allocation2 + $0x4a8] sm:$0x3f] }
  0xc7   :  { %v2626_v56 = vadd.f32 %v1089_v48, %v176_v40  ;;  %v2627_v57 = vadd.f32 %v1093_v49, %v177_v45  ;;  %v2628_v58 = vadd.f32 %v1097_v50, %v178_v46  ;;  %v2629_v59 = vadd.f32 %v1101_v51, %v179_v47  ;;  %v447_v49 = vld [vmem:[#allocation5 + $0x98] sm:$0xff] }
  0xc8   :  { %v3014_v60 = vmax.f32 %v2622_v52, 0.0  ;;  %v3015_v61 = vmax.f32 %v2623_v53, 0.0  ;;  %v3016_v62 = vmax.f32 %v2624_v54, 0.0  ;;  %v3017_v63 = vmax.f32 %v2625_v55, 0.0  ;;  %v188_v54 = vld [vmem:[#allocation2 + $0x4c0] sm:$0x3f] }
  0xc9   :  { %v3018_v1 = vmax.f32 %v2626_v56, 0.0  ;;  %v3019_v10 = vmax.f32 %v2627_v57, 0.0  ;;  %v3020_v11 = vmax.f32 %v2628_v58, 0.0  ;;  %v3021_v12 = vmax.f32 %v2629_v59, 0.0  ;;  %v189_v55 = vld [vmem:[#allocation2 + $0x4c8] sm:$0x3f] }
  0xca   :  { %v3406_v16 = vmin.f32 %v3014_v60, 1.0  ;;  %v3407_v17 = vmin.f32 %v3015_v61, 1.0  ;;  %v3408_v18 = vmin.f32 %v3016_v62, 1.0  ;;  %v3409_v19 = vmin.f32 %v3017_v63, 1.0  ;;  %v190_v56 = vld [vmem:[#allocation2 + $0x4d0] sm:$0x3f] }
  0xcb   :  { %v3410_v21 = vmin.f32 %v3018_v1, 1.0  ;;  %v3411_v22 = vmin.f32 %v3019_v10, 1.0  ;;  %v3412_v23 = vmin.f32 %v3020_v11, 1.0  ;;  %v3413_v24 = vmin.f32 %v3021_v12, 1.0  ;;  %v191_v61 = vld [vmem:[#allocation2 + $0x4d8] sm:$0x3f] }
  0xcc   :  { %3798 = vst [vmem:[#allocation7 + $0x440] sm:$0x3f] %v3406_v16  ;;  %3799 = vst [vmem:[#allocation7 + $0x448] sm:$0x3f] %v3407_v17  ;;  %v1105_v26 = vrot.slane %v446_v0, %v4187_v2  ;;  %v1109_v27 = vrot.slane %v446_v0, %v4189_v3  ;;  %v1113_v28 = vrot.slane %v446_v0, %v4191_v4  ;;  %v192_v10 = vld [vmem:[#allocation2 + $0x4e0] sm:$0x3f] }
  0xcd   :  { %3800 = vst [vmem:[#allocation7 + $0x450] sm:$0x3f] %v3408_v18  ;;  %3801 = vst [vmem:[#allocation7 + $0x458] sm:$0x3f] %v3409_v19  ;;  %v1117_v29 = vrot.slane %v446_v0, %v4193_v5  ;;  %v1121_v33 = vrot.slane %v446_v0, %v4195_v6  ;;  %v1125_v34 = vrot.slane %v446_v0, %v4197_v7  ;;  %v194_v16 = vld [vmem:[#allocation2 + $0x4f0] sm:$0x3f] }
  0xce   :  { %3802 = vst [vmem:[#allocation7 + $0x460] sm:$0x3f] %v3410_v21  ;;  %3803 = vst [vmem:[#allocation7 + $0x468] sm:$0x3f] %v3411_v22  ;;  %v1129_v35 = vrot.slane %v446_v0, %v4199_v8  ;;  %v1133_v36 = vrot.slane %v446_v0, %v4201_v9  ;;  %v2630_v37 = vadd.f32 %v1105_v26, %v180_v13  ;;  %v195_v17 = vld [vmem:[#allocation2 + $0x4f8] sm:$0x3f] }
  0xcf   :  { %3804 = vst [vmem:[#allocation7 + $0x470] sm:$0x3f] %v3412_v23  ;;  %3805 = vst [vmem:[#allocation7 + $0x478] sm:$0x3f] %v3413_v24  ;;  %v2631_v38 = vadd.f32 %v1109_v27, %v181_v14  ;;  %v2632_v39 = vadd.f32 %v1113_v28, %v182_v15  ;;  %v2633_v40 = vadd.f32 %v1117_v29, %v183_v20  ;;  %v193_v15 = vld [vmem:[#allocation2 + $0x4e8] sm:$0x3f] }
  0xd0   :  { %v2634_v41 = vadd.f32 %v1121_v33, %v184_v25  ;;  %v2635_v42 = vadd.f32 %v1125_v34, %v185_v30  ;;  %v2636_v43 = vadd.f32 %v1129_v35, %v186_v31  ;;  %v2637_v44 = vadd.f32 %v1133_v36, %v187_v32  ;;  %v448_v34 = vld [vmem:[#allocation5 + $0xa0] sm:$0xff] }
  0xd1   :  { %v3022_v45 = vmax.f32 %v2630_v37, 0.0  ;;  %v3023_v46 = vmax.f32 %v2631_v38, 0.0  ;;  %v3024_v47 = vmax.f32 %v2632_v39, 0.0  ;;  %v3025_v48 = vmax.f32 %v2633_v40, 0.0  ;;  %v196_v39 = vld [vmem:[#allocation2 + $0x500] sm:$0x3f] }
  0xd2   :  { %v3026_v50 = vmax.f32 %v2634_v41, 0.0  ;;  %v3027_v51 = vmax.f32 %v2635_v42, 0.0  ;;  %v3028_v52 = vmax.f32 %v2636_v43, 0.0  ;;  %v3029_v53 = vmax.f32 %v2637_v44, 0.0  ;;  %v197_v40 = vld [vmem:[#allocation2 + $0x508] sm:$0x3f] }
  0xd3   :  { %v3414_v57 = vmin.f32 %v3022_v45, 1.0  ;;  %v3415_v58 = vmin.f32 %v3023_v46, 1.0  ;;  %v3416_v59 = vmin.f32 %v3024_v47, 1.0  ;;  %v3417_v60 = vmin.f32 %v3025_v48, 1.0  ;;  %v198_v41 = vld [vmem:[#allocation2 + $0x510] sm:$0x3f] }
  0xd4   :  { %v3418_v62 = vmin.f32 %v3026_v50, 1.0  ;;  %v3419_v63 = vmin.f32 %v3027_v51, 1.0  ;;  %v3420_v0 = vmin.f32 %v3028_v52, 1.0  ;;  %v3421_v1 = vmin.f32 %v3029_v53, 1.0  ;;  %v199_v46 = vld [vmem:[#allocation2 + $0x518] sm:$0x3f] }
  0xd5   :  { %3806 = vst [vmem:[#allocation7 + $0x480] sm:$0x3f] %v3414_v57  ;;  %3807 = vst [vmem:[#allocation7 + $0x488] sm:$0x3f] %v3415_v58  ;;  %v1137_v11 = vrot.slane %v447_v49, %v4187_v2  ;;  %v1141_v12 = vrot.slane %v447_v49, %v4189_v3  ;;  %v1145_v13 = vrot.slane %v447_v49, %v4191_v4  ;;  %v200_v51 = vld [vmem:[#allocation2 + $0x520] sm:$0x3f] }
  0xd6   :  { %3808 = vst [vmem:[#allocation7 + $0x490] sm:$0x3f] %v3416_v59  ;;  %3809 = vst [vmem:[#allocation7 + $0x498] sm:$0x3f] %v3417_v60  ;;  %v1149_v14 = vrot.slane %v447_v49, %v4193_v5  ;;  %v1153_v18 = vrot.slane %v447_v49, %v4195_v6  ;;  %v1157_v19 = vrot.slane %v447_v49, %v4197_v7  ;;  %v202_v57 = vld [vmem:[#allocation2 + $0x530] sm:$0x3f] }
  0xd7   :  { %3810 = vst [vmem:[#allocation7 + $0x4a0] sm:$0x3f] %v3418_v62  ;;  %3811 = vst [vmem:[#allocation7 + $0x4a8] sm:$0x3f] %v3419_v63  ;;  %v1161_v20 = vrot.slane %v447_v49, %v4199_v8  ;;  %v1165_v21 = vrot.slane %v447_v49, %v4201_v9  ;;  %v2638_v22 = vadd.f32 %v1137_v11, %v188_v54  ;;  %v203_v58 = vld [vmem:[#allocation2 + $0x538] sm:$0x3f] }
  0xd8   :  { %3812 = vst [vmem:[#allocation7 + $0x4b0] sm:$0x3f] %v3420_v0  ;;  %3813 = vst [vmem:[#allocation7 + $0x4b8] sm:$0x3f] %v3421_v1  ;;  %v2639_v23 = vadd.f32 %v1141_v12, %v189_v55  ;;  %v2640_v24 = vadd.f32 %v1145_v13, %v190_v56  ;;  %v2641_v25 = vadd.f32 %v1149_v14, %v191_v61  ;;  %v201_v56 = vld [vmem:[#allocation2 + $0x528] sm:$0x3f] }
  0xd9   :  { %v2642_v26 = vadd.f32 %v1153_v18, %v192_v10  ;;  %v2643_v27 = vadd.f32 %v1157_v19, %v193_v15  ;;  %v2644_v28 = vadd.f32 %v1161_v20, %v194_v16  ;;  %v2645_v29 = vadd.f32 %v1165_v21, %v195_v17  ;;  %v449_v19 = vld [vmem:[#allocation5 + $0xa8] sm:$0xff] }
  0xda   :  { %v3030_v30 = vmax.f32 %v2638_v22, 0.0  ;;  %v3031_v31 = vmax.f32 %v2639_v23, 0.0  ;;  %v3032_v32 = vmax.f32 %v2640_v24, 0.0  ;;  %v3033_v33 = vmax.f32 %v2641_v25, 0.0  ;;  %v204_v24 = vld [vmem:[#allocation2 + $0x540] sm:$0x3f] }
  0xdb   :  { %v3034_v35 = vmax.f32 %v2642_v26, 0.0  ;;  %v3035_v36 = vmax.f32 %v2643_v27, 0.0  ;;  %v3036_v37 = vmax.f32 %v2644_v28, 0.0  ;;  %v3037_v38 = vmax.f32 %v2645_v29, 0.0  ;;  %v205_v25 = vld [vmem:[#allocation2 + $0x548] sm:$0x3f] }
  0xdc   :  { %v3422_v42 = vmin.f32 %v3030_v30, 1.0  ;;  %v3423_v43 = vmin.f32 %v3031_v31, 1.0  ;;  %v3424_v44 = vmin.f32 %v3032_v32, 1.0  ;;  %v3425_v45 = vmin.f32 %v3033_v33, 1.0  ;;  %v206_v26 = vld [vmem:[#allocation2 + $0x550] sm:$0x3f] }
  0xdd   :  { %v3426_v47 = vmin.f32 %v3034_v35, 1.0  ;;  %v3427_v48 = vmin.f32 %v3035_v36, 1.0  ;;  %v3428_v49 = vmin.f32 %v3036_v37, 1.0  ;;  %v3429_v50 = vmin.f32 %v3037_v38, 1.0  ;;  %v207_v31 = vld [vmem:[#allocation2 + $0x558] sm:$0x3f] }
  0xde   :  { %3814 = vst [vmem:[#allocation7 + $0x4c0] sm:$0x3f] %v3422_v42  ;;  %3815 = vst [vmem:[#allocation7 + $0x4c8] sm:$0x3f] %v3423_v43  ;;  %v1169_v52 = vrot.slane %v448_v34, %v4187_v2  ;;  %v1173_v53 = vrot.slane %v448_v34, %v4189_v3  ;;  %v1177_v54 = vrot.slane %v448_v34, %v4191_v4  ;;  %v208_v36 = vld [vmem:[#allocation2 + $0x560] sm:$0x3f] }
  0xdf   :  { %3816 = vst [vmem:[#allocation7 + $0x4d0] sm:$0x3f] %v3424_v44  ;;  %3817 = vst [vmem:[#allocation7 + $0x4d8] sm:$0x3f] %v3425_v45  ;;  %v1181_v55 = vrot.slane %v448_v34, %v4193_v5  ;;  %v1185_v59 = vrot.slane %v448_v34, %v4195_v6  ;;  %v1189_v60 = vrot.slane %v448_v34, %v4197_v7  ;;  %v210_v42 = vld [vmem:[#allocation2 + $0x570] sm:$0x3f] }
  0xe0   :  { %3818 = vst [vmem:[#allocation7 + $0x4e0] sm:$0x3f] %v3426_v47  ;;  %3819 = vst [vmem:[#allocation7 + $0x4e8] sm:$0x3f] %v3427_v48  ;;  %v1193_v61 = vrot.slane %v448_v34, %v4199_v8  ;;  %v1197_v62 = vrot.slane %v448_v34, %v4201_v9  ;;  %v2646_v63 = vadd.f32 %v1169_v52, %v196_v39  ;;  %v211_v43 = vld [vmem:[#allocation2 + $0x578] sm:$0x3f] }
  0xe1   :  { %3820 = vst [vmem:[#allocation7 + $0x4f0] sm:$0x3f] %v3428_v49  ;;  %3821 = vst [vmem:[#allocation7 + $0x4f8] sm:$0x3f] %v3429_v50  ;;  %v2647_v0 = vadd.f32 %v1173_v53, %v197_v40  ;;  %v2648_v1 = vadd.f32 %v1177_v54, %v198_v41  ;;  %v2649_v10 = vadd.f32 %v1181_v55, %v199_v46  ;;  %v209_v41 = vld [vmem:[#allocation2 + $0x568] sm:$0x3f] }
  0xe2   :  { %v2650_v11 = vadd.f32 %v1185_v59, %v200_v51  ;;  %v2651_v12 = vadd.f32 %v1189_v60, %v201_v56  ;;  %v2652_v13 = vadd.f32 %v1193_v61, %v202_v57  ;;  %v2653_v14 = vadd.f32 %v1197_v62, %v203_v58  ;;  %v450_v60 = vld [vmem:[#allocation5 + $0xb0] sm:$0xff] }
  0xe3   :  { %v3038_v15 = vmax.f32 %v2646_v63, 0.0  ;;  %v3039_v16 = vmax.f32 %v2647_v0, 0.0  ;;  %v3040_v17 = vmax.f32 %v2648_v1, 0.0  ;;  %v3041_v18 = vmax.f32 %v2649_v10, 0.0  ;;  %v212_v1 = vld [vmem:[#allocation2 + $0x580] sm:$0x3f] }
  0xe4   :  { %v3042_v20 = vmax.f32 %v2650_v11, 0.0  ;;  %v3043_v21 = vmax.f32 %v2651_v12, 0.0  ;;  %v3044_v22 = vmax.f32 %v2652_v13, 0.0  ;;  %v3045_v23 = vmax.f32 %v2653_v14, 0.0  ;;  %v213_v10 = vld [vmem:[#allocation2 + $0x588] sm:$0x3f] }
  0xe5   :  { %v3430_v27 = vmin.f32 %v3038_v15, 1.0  ;;  %v3431_v28 = vmin.f32 %v3039_v16, 1.0  ;;  %v3432_v29 = vmin.f32 %v3040_v17, 1.0  ;;  %v3433_v30 = vmin.f32 %v3041_v18, 1.0  ;;  %v214_v11 = vld [vmem:[#allocation2 + $0x590] sm:$0x3f] }
  0xe6   :  { %v3434_v32 = vmin.f32 %v3042_v20, 1.0  ;;  %v3435_v33 = vmin.f32 %v3043_v21, 1.0  ;;  %v3436_v34 = vmin.f32 %v3044_v22, 1.0  ;;  %v3437_v35 = vmin.f32 %v3045_v23, 1.0  ;;  %v215_v16 = vld [vmem:[#allocation2 + $0x598] sm:$0x3f] }
  0xe7   :  { %3822 = vst [vmem:[#allocation7 + $0x500] sm:$0x3f] %v3430_v27  ;;  %3823 = vst [vmem:[#allocation7 + $0x508] sm:$0x3f] %v3431_v28  ;;  %v1201_v37 = vrot.slane %v449_v19, %v4187_v2  ;;  %v1205_v38 = vrot.slane %v449_v19, %v4189_v3  ;;  %v1209_v39 = vrot.slane %v449_v19, %v4191_v4  ;;  %v216_v21 = vld [vmem:[#allocation2 + $0x5a0] sm:$0x3f] }
  0xe8   :  { %3824 = vst [vmem:[#allocation7 + $0x510] sm:$0x3f] %v3432_v29  ;;  %3825 = vst [vmem:[#allocation7 + $0x518] sm:$0x3f] %v3433_v30  ;;  %v1213_v40 = vrot.slane %v449_v19, %v4193_v5  ;;  %v1217_v44 = vrot.slane %v449_v19, %v4195_v6  ;;  %v1221_v45 = vrot.slane %v449_v19, %v4197_v7  ;;  %v218_v27 = vld [vmem:[#allocation2 + $0x5b0] sm:$0x3f] }
  0xe9   :  { %3826 = vst [vmem:[#allocation7 + $0x520] sm:$0x3f] %v3434_v32  ;;  %3827 = vst [vmem:[#allocation7 + $0x528] sm:$0x3f] %v3435_v33  ;;  %v1225_v46 = vrot.slane %v449_v19, %v4199_v8  ;;  %v1229_v47 = vrot.slane %v449_v19, %v4201_v9  ;;  %v2654_v48 = vadd.f32 %v1201_v37, %v204_v24  ;;  %v219_v28 = vld [vmem:[#allocation2 + $0x5b8] sm:$0x3f] }
  0xea   :  { %3828 = vst [vmem:[#allocation7 + $0x530] sm:$0x3f] %v3436_v34  ;;  %3829 = vst [vmem:[#allocation7 + $0x538] sm:$0x3f] %v3437_v35  ;;  %v2655_v49 = vadd.f32 %v1205_v38, %v205_v25  ;;  %v2656_v50 = vadd.f32 %v1209_v39, %v206_v26  ;;  %v2657_v51 = vadd.f32 %v1213_v40, %v207_v31  ;;  %v217_v26 = vld [vmem:[#allocation2 + $0x5a8] sm:$0x3f] }
  0xeb   :  { %v2658_v52 = vadd.f32 %v1217_v44, %v208_v36  ;;  %v2659_v53 = vadd.f32 %v1221_v45, %v209_v41  ;;  %v2660_v54 = vadd.f32 %v1225_v46, %v210_v42  ;;  %v2661_v55 = vadd.f32 %v1229_v47, %v211_v43  ;;  %v451_v45 = vld [vmem:[#allocation5 + $0xb8] sm:$0xff] }
  0xec   :  { %v3046_v56 = vmax.f32 %v2654_v48, 0.0  ;;  %v3047_v57 = vmax.f32 %v2655_v49, 0.0  ;;  %v3048_v58 = vmax.f32 %v2656_v50, 0.0  ;;  %v3049_v59 = vmax.f32 %v2657_v51, 0.0  ;;  %v220_v50 = vld [vmem:[#allocation2 + $0x5c0] sm:$0x3f] }
  0xed   :  { %v3050_v61 = vmax.f32 %v2658_v52, 0.0  ;;  %v3051_v62 = vmax.f32 %v2659_v53, 0.0  ;;  %v3052_v63 = vmax.f32 %v2660_v54, 0.0  ;;  %v3053_v0 = vmax.f32 %v2661_v55, 0.0  ;;  %v221_v51 = vld [vmem:[#allocation2 + $0x5c8] sm:$0x3f] }
  0xee   :  { %v3438_v12 = vmin.f32 %v3046_v56, 1.0  ;;  %v3439_v13 = vmin.f32 %v3047_v57, 1.0  ;;  %v3440_v14 = vmin.f32 %v3048_v58, 1.0  ;;  %v3441_v15 = vmin.f32 %v3049_v59, 1.0  ;;  %v222_v52 = vld [vmem:[#allocation2 + $0x5d0] sm:$0x3f] }
  0xef   :  { %v3442_v17 = vmin.f32 %v3050_v61, 1.0  ;;  %v3443_v18 = vmin.f32 %v3051_v62, 1.0  ;;  %v3444_v19 = vmin.f32 %v3052_v63, 1.0  ;;  %v3445_v20 = vmin.f32 %v3053_v0, 1.0  ;;  %v223_v57 = vld [vmem:[#allocation2 + $0x5d8] sm:$0x3f] }
  0xf0   :  { %3830 = vst [vmem:[#allocation7 + $0x540] sm:$0x3f] %v3438_v12  ;;  %3831 = vst [vmem:[#allocation7 + $0x548] sm:$0x3f] %v3439_v13  ;;  %v1233_v22 = vrot.slane %v450_v60, %v4187_v2  ;;  %v1237_v23 = vrot.slane %v450_v60, %v4189_v3  ;;  %v1241_v24 = vrot.slane %v450_v60, %v4191_v4  ;;  %v224_v62 = vld [vmem:[#allocation2 + $0x5e0] sm:$0x3f] }
  0xf1   :  { %3832 = vst [vmem:[#allocation7 + $0x550] sm:$0x3f] %v3440_v14  ;;  %3833 = vst [vmem:[#allocation7 + $0x558] sm:$0x3f] %v3441_v15  ;;  %v1245_v25 = vrot.slane %v450_v60, %v4193_v5  ;;  %v1249_v29 = vrot.slane %v450_v60, %v4195_v6  ;;  %v1253_v30 = vrot.slane %v450_v60, %v4197_v7  ;;  %v226_v12 = vld [vmem:[#allocation2 + $0x5f0] sm:$0x3f] }
  0xf2   :  { %3834 = vst [vmem:[#allocation7 + $0x560] sm:$0x3f] %v3442_v17  ;;  %3835 = vst [vmem:[#allocation7 + $0x568] sm:$0x3f] %v3443_v18  ;;  %v1257_v31 = vrot.slane %v450_v60, %v4199_v8  ;;  %v1261_v32 = vrot.slane %v450_v60, %v4201_v9  ;;  %v2662_v33 = vadd.f32 %v1233_v22, %v212_v1  ;;  %v227_v13 = vld [vmem:[#allocation2 + $0x5f8] sm:$0x3f] }
  0xf3   :  { %3836 = vst [vmem:[#allocation7 + $0x570] sm:$0x3f] %v3444_v19  ;;  %3837 = vst [vmem:[#allocation7 + $0x578] sm:$0x3f] %v3445_v20  ;;  %v2663_v34 = vadd.f32 %v1237_v23, %v213_v10  ;;  %v2664_v35 = vadd.f32 %v1241_v24, %v214_v11  ;;  %v2665_v36 = vadd.f32 %v1245_v25, %v215_v16  ;;  %v225_v11 = vld [vmem:[#allocation2 + $0x5e8] sm:$0x3f] }
  0xf4   :  { %v2666_v37 = vadd.f32 %v1249_v29, %v216_v21  ;;  %v2667_v38 = vadd.f32 %v1253_v30, %v217_v26  ;;  %v2668_v39 = vadd.f32 %v1257_v31, %v218_v27  ;;  %v2669_v40 = vadd.f32 %v1261_v32, %v219_v28  ;;  %v452_v30 = vld [vmem:[#allocation5 + $0xc0] sm:$0xff] }
  0xf5   :  { %v3054_v41 = vmax.f32 %v2662_v33, 0.0  ;;  %v3055_v42 = vmax.f32 %v2663_v34, 0.0  ;;  %v3056_v43 = vmax.f32 %v2664_v35, 0.0  ;;  %v3057_v44 = vmax.f32 %v2665_v36, 0.0  ;;  %v228_v35 = vld [vmem:[#allocation2 + $0x600] sm:$0x3f] }
  0xf6   :  { %v3058_v46 = vmax.f32 %v2666_v37, 0.0  ;;  %v3059_v47 = vmax.f32 %v2667_v38, 0.0  ;;  %v3060_v48 = vmax.f32 %v2668_v39, 0.0  ;;  %v3061_v49 = vmax.f32 %v2669_v40, 0.0  ;;  %v229_v36 = vld [vmem:[#allocation2 + $0x608] sm:$0x3f] }
  0xf7   :  { %v3446_v53 = vmin.f32 %v3054_v41, 1.0  ;;  %v3447_v54 = vmin.f32 %v3055_v42, 1.0  ;;  %v3448_v55 = vmin.f32 %v3056_v43, 1.0  ;;  %v3449_v56 = vmin.f32 %v3057_v44, 1.0  ;;  %v230_v37 = vld [vmem:[#allocation2 + $0x610] sm:$0x3f] }
  0xf8   :  { %v3450_v58 = vmin.f32 %v3058_v46, 1.0  ;;  %v3451_v59 = vmin.f32 %v3059_v47, 1.0  ;;  %v3452_v60 = vmin.f32 %v3060_v48, 1.0  ;;  %v3453_v61 = vmin.f32 %v3061_v49, 1.0  ;;  %v231_v42 = vld [vmem:[#allocation2 + $0x618] sm:$0x3f] }
  0xf9   :  { %3838 = vst [vmem:[#allocation7 + $0x580] sm:$0x3f] %v3446_v53  ;;  %3839 = vst [vmem:[#allocation7 + $0x588] sm:$0x3f] %v3447_v54  ;;  %v1265_v63 = vrot.slane %v451_v45, %v4187_v2  ;;  %v1269_v0 = vrot.slane %v451_v45, %v4189_v3  ;;  %v1273_v1 = vrot.slane %v451_v45, %v4191_v4  ;;  %v232_v47 = vld [vmem:[#allocation2 + $0x620] sm:$0x3f] }
  0xfa   :  { %3840 = vst [vmem:[#allocation7 + $0x590] sm:$0x3f] %v3448_v55  ;;  %3841 = vst [vmem:[#allocation7 + $0x598] sm:$0x3f] %v3449_v56  ;;  %v1277_v10 = vrot.slane %v451_v45, %v4193_v5  ;;  %v1281_v14 = vrot.slane %v451_v45, %v4195_v6  ;;  %v1285_v15 = vrot.slane %v451_v45, %v4197_v7  ;;  %v234_v53 = vld [vmem:[#allocation2 + $0x630] sm:$0x3f] }
  0xfb   :  { %3842 = vst [vmem:[#allocation7 + $0x5a0] sm:$0x3f] %v3450_v58  ;;  %3843 = vst [vmem:[#allocation7 + $0x5a8] sm:$0x3f] %v3451_v59  ;;  %v1289_v16 = vrot.slane %v451_v45, %v4199_v8  ;;  %v1293_v17 = vrot.slane %v451_v45, %v4201_v9  ;;  %v2670_v18 = vadd.f32 %v1265_v63, %v220_v50  ;;  %v235_v54 = vld [vmem:[#allocation2 + $0x638] sm:$0x3f] }
  0xfc   :  { %3844 = vst [vmem:[#allocation7 + $0x5b0] sm:$0x3f] %v3452_v60  ;;  %3845 = vst [vmem:[#allocation7 + $0x5b8] sm:$0x3f] %v3453_v61  ;;  %v2671_v19 = vadd.f32 %v1269_v0, %v221_v51  ;;  %v2672_v20 = vadd.f32 %v1273_v1, %v222_v52  ;;  %v2673_v21 = vadd.f32 %v1277_v10, %v223_v57  ;;  %v233_v52 = vld [vmem:[#allocation2 + $0x628] sm:$0x3f] }
  0xfd   :  { %v2674_v22 = vadd.f32 %v1281_v14, %v224_v62  ;;  %v2675_v23 = vadd.f32 %v1285_v15, %v225_v11  ;;  %v2676_v24 = vadd.f32 %v1289_v16, %v226_v12  ;;  %v2677_v25 = vadd.f32 %v1293_v17, %v227_v13  ;;  %v453_v15 = vld [vmem:[#allocation5 + $0xc8] sm:$0xff] }
  0xfe   :  { %v3062_v26 = vmax.f32 %v2670_v18, 0.0  ;;  %v3063_v27 = vmax.f32 %v2671_v19, 0.0  ;;  %v3064_v28 = vmax.f32 %v2672_v20, 0.0  ;;  %v3065_v29 = vmax.f32 %v2673_v21, 0.0  ;;  %v236_v20 = vld [vmem:[#allocation2 + $0x640] sm:$0x3f] }
  0xff   :  { %v3066_v31 = vmax.f32 %v2674_v22, 0.0  ;;  %v3067_v32 = vmax.f32 %v2675_v23, 0.0  ;;  %v3068_v33 = vmax.f32 %v2676_v24, 0.0  ;;  %v3069_v34 = vmax.f32 %v2677_v25, 0.0  ;;  %v237_v21 = vld [vmem:[#allocation2 + $0x648] sm:$0x3f] }
 0x100   :  { %v3454_v38 = vmin.f32 %v3062_v26, 1.0  ;;  %v3455_v39 = vmin.f32 %v3063_v27, 1.0  ;;  %v3456_v40 = vmin.f32 %v3064_v28, 1.0  ;;  %v3457_v41 = vmin.f32 %v3065_v29, 1.0  ;;  %v238_v22 = vld [vmem:[#allocation2 + $0x650] sm:$0x3f] }
 0x101   :  { %v3458_v43 = vmin.f32 %v3066_v31, 1.0  ;;  %v3459_v44 = vmin.f32 %v3067_v32, 1.0  ;;  %v3460_v45 = vmin.f32 %v3068_v33, 1.0  ;;  %v3461_v46 = vmin.f32 %v3069_v34, 1.0  ;;  %v239_v27 = vld [vmem:[#allocation2 + $0x658] sm:$0x3f] }
 0x102   :  { %3846 = vst [vmem:[#allocation7 + $0x5c0] sm:$0x3f] %v3454_v38  ;;  %3847 = vst [vmem:[#allocation7 + $0x5c8] sm:$0x3f] %v3455_v39  ;;  %v1297_v48 = vrot.slane %v452_v30, %v4187_v2  ;;  %v1301_v49 = vrot.slane %v452_v30, %v4189_v3  ;;  %v1305_v50 = vrot.slane %v452_v30, %v4191_v4  ;;  %v240_v32 = vld [vmem:[#allocation2 + $0x660] sm:$0x3f] }
 0x103   :  { %3848 = vst [vmem:[#allocation7 + $0x5d0] sm:$0x3f] %v3456_v40  ;;  %3849 = vst [vmem:[#allocation7 + $0x5d8] sm:$0x3f] %v3457_v41  ;;  %v1309_v51 = vrot.slane %v452_v30, %v4193_v5  ;;  %v1313_v55 = vrot.slane %v452_v30, %v4195_v6  ;;  %v1317_v56 = vrot.slane %v452_v30, %v4197_v7  ;;  %v242_v38 = vld [vmem:[#allocation2 + $0x670] sm:$0x3f] }
 0x104   :  { %3850 = vst [vmem:[#allocation7 + $0x5e0] sm:$0x3f] %v3458_v43  ;;  %3851 = vst [vmem:[#allocation7 + $0x5e8] sm:$0x3f] %v3459_v44  ;;  %v1321_v57 = vrot.slane %v452_v30, %v4199_v8  ;;  %v1325_v58 = vrot.slane %v452_v30, %v4201_v9  ;;  %v2678_v59 = vadd.f32 %v1297_v48, %v228_v35  ;;  %v243_v39 = vld [vmem:[#allocation2 + $0x678] sm:$0x3f] }
 0x105   :  { %3852 = vst [vmem:[#allocation7 + $0x5f0] sm:$0x3f] %v3460_v45  ;;  %3853 = vst [vmem:[#allocation7 + $0x5f8] sm:$0x3f] %v3461_v46  ;;  %v2679_v60 = vadd.f32 %v1301_v49, %v229_v36  ;;  %v2680_v61 = vadd.f32 %v1305_v50, %v230_v37  ;;  %v2681_v62 = vadd.f32 %v1309_v51, %v231_v42  ;;  %v241_v37 = vld [vmem:[#allocation2 + $0x668] sm:$0x3f] }
 0x106   :  { %v2682_v63 = vadd.f32 %v1313_v55, %v232_v47  ;;  %v2683_v0 = vadd.f32 %v1317_v56, %v233_v52  ;;  %v2684_v1 = vadd.f32 %v1321_v57, %v234_v53  ;;  %v2685_v10 = vadd.f32 %v1325_v58, %v235_v54  ;;  %v454_v56 = vld [vmem:[#allocation5 + $0xd0] sm:$0xff] }
 0x107   :  { %v3070_v11 = vmax.f32 %v2678_v59, 0.0  ;;  %v3071_v12 = vmax.f32 %v2679_v60, 0.0  ;;  %v3072_v13 = vmax.f32 %v2680_v61, 0.0  ;;  %v3073_v14 = vmax.f32 %v2681_v62, 0.0  ;;  %v244_v61 = vld [vmem:[#allocation2 + $0x680] sm:$0x3f] }
 0x108   :  { %v3074_v16 = vmax.f32 %v2682_v63, 0.0  ;;  %v3075_v17 = vmax.f32 %v2683_v0, 0.0  ;;  %v3076_v18 = vmax.f32 %v2684_v1, 0.0  ;;  %v3077_v19 = vmax.f32 %v2685_v10, 0.0  ;;  %v245_v62 = vld [vmem:[#allocation2 + $0x688] sm:$0x3f] }
 0x109   :  { %v3462_v23 = vmin.f32 %v3070_v11, 1.0  ;;  %v3463_v24 = vmin.f32 %v3071_v12, 1.0  ;;  %v3464_v25 = vmin.f32 %v3072_v13, 1.0  ;;  %v3465_v26 = vmin.f32 %v3073_v14, 1.0  ;;  %v246_v63 = vld [vmem:[#allocation2 + $0x690] sm:$0x3f] }
 0x10a   :  { %v3466_v28 = vmin.f32 %v3074_v16, 1.0  ;;  %v3467_v29 = vmin.f32 %v3075_v17, 1.0  ;;  %v3468_v30 = vmin.f32 %v3076_v18, 1.0  ;;  %v3469_v31 = vmin.f32 %v3077_v19, 1.0  ;;  %v247_v12 = vld [vmem:[#allocation2 + $0x698] sm:$0x3f] }
 0x10b   :  { %3854 = vst [vmem:[#allocation7 + $0x600] sm:$0x3f] %v3462_v23  ;;  %3855 = vst [vmem:[#allocation7 + $0x608] sm:$0x3f] %v3463_v24  ;;  %v1329_v33 = vrot.slane %v453_v15, %v4187_v2  ;;  %v1333_v34 = vrot.slane %v453_v15, %v4189_v3  ;;  %v1337_v35 = vrot.slane %v453_v15, %v4191_v4  ;;  %v248_v17 = vld [vmem:[#allocation2 + $0x6a0] sm:$0x3f] }
 0x10c   :  { %3856 = vst [vmem:[#allocation7 + $0x610] sm:$0x3f] %v3464_v25  ;;  %3857 = vst [vmem:[#allocation7 + $0x618] sm:$0x3f] %v3465_v26  ;;  %v1341_v36 = vrot.slane %v453_v15, %v4193_v5  ;;  %v1345_v40 = vrot.slane %v453_v15, %v4195_v6  ;;  %v1349_v41 = vrot.slane %v453_v15, %v4197_v7  ;;  %v250_v23 = vld [vmem:[#allocation2 + $0x6b0] sm:$0x3f] }
 0x10d   :  { %3858 = vst [vmem:[#allocation7 + $0x620] sm:$0x3f] %v3466_v28  ;;  %3859 = vst [vmem:[#allocation7 + $0x628] sm:$0x3f] %v3467_v29  ;;  %v1353_v42 = vrot.slane %v453_v15, %v4199_v8  ;;  %v1357_v43 = vrot.slane %v453_v15, %v4201_v9  ;;  %v2686_v44 = vadd.f32 %v1329_v33, %v236_v20  ;;  %v251_v24 = vld [vmem:[#allocation2 + $0x6b8] sm:$0x3f] }
 0x10e   :  { %3860 = vst [vmem:[#allocation7 + $0x630] sm:$0x3f] %v3468_v30  ;;  %3861 = vst [vmem:[#allocation7 + $0x638] sm:$0x3f] %v3469_v31  ;;  %v2687_v45 = vadd.f32 %v1333_v34, %v237_v21  ;;  %v2688_v46 = vadd.f32 %v1337_v35, %v238_v22  ;;  %v2689_v47 = vadd.f32 %v1341_v36, %v239_v27  ;;  %v249_v22 = vld [vmem:[#allocation2 + $0x6a8] sm:$0x3f] }
 0x10f   :  { %v2690_v48 = vadd.f32 %v1345_v40, %v240_v32  ;;  %v2691_v49 = vadd.f32 %v1349_v41, %v241_v37  ;;  %v2692_v50 = vadd.f32 %v1353_v42, %v242_v38  ;;  %v2693_v51 = vadd.f32 %v1357_v43, %v243_v39  ;;  %v455_v41 = vld [vmem:[#allocation5 + $0xd8] sm:$0xff] }
 0x110   :  { %v3078_v52 = vmax.f32 %v2686_v44, 0.0  ;;  %v3079_v53 = vmax.f32 %v2687_v45, 0.0  ;;  %v3080_v54 = vmax.f32 %v2688_v46, 0.0  ;;  %v3081_v55 = vmax.f32 %v2689_v47, 0.0  ;;  %v252_v46 = vld [vmem:[#allocation2 + $0x6c0] sm:$0x3f] }
 0x111   :  { %v3082_v57 = vmax.f32 %v2690_v48, 0.0  ;;  %v3083_v58 = vmax.f32 %v2691_v49, 0.0  ;;  %v3084_v59 = vmax.f32 %v2692_v50, 0.0  ;;  %v3085_v60 = vmax.f32 %v2693_v51, 0.0  ;;  %v253_v47 = vld [vmem:[#allocation2 + $0x6c8] sm:$0x3f] }
 0x112   :  { %v3470_v0 = vmin.f32 %v3078_v52, 1.0  ;;  %v3471_v1 = vmin.f32 %v3079_v53, 1.0  ;;  %v3472_v10 = vmin.f32 %v3080_v54, 1.0  ;;  %v3473_v11 = vmin.f32 %v3081_v55, 1.0  ;;  %v254_v48 = vld [vmem:[#allocation2 + $0x6d0] sm:$0x3f] }
 0x113   :  { %v3474_v13 = vmin.f32 %v3082_v57, 1.0  ;;  %v3475_v14 = vmin.f32 %v3083_v58, 1.0  ;;  %v3476_v15 = vmin.f32 %v3084_v59, 1.0  ;;  %v3477_v16 = vmin.f32 %v3085_v60, 1.0  ;;  %v255_v53 = vld [vmem:[#allocation2 + $0x6d8] sm:$0x3f] }
 0x114   :  { %3862 = vst [vmem:[#allocation7 + $0x640] sm:$0x3f] %v3470_v0  ;;  %3863 = vst [vmem:[#allocation7 + $0x648] sm:$0x3f] %v3471_v1  ;;  %v1361_v18 = vrot.slane %v454_v56, %v4187_v2  ;;  %v1365_v19 = vrot.slane %v454_v56, %v4189_v3  ;;  %v1369_v20 = vrot.slane %v454_v56, %v4191_v4  ;;  %v256_v58 = vld [vmem:[#allocation2 + $0x6e0] sm:$0x3f] }
 0x115   :  { %3864 = vst [vmem:[#allocation7 + $0x650] sm:$0x3f] %v3472_v10  ;;  %3865 = vst [vmem:[#allocation7 + $0x658] sm:$0x3f] %v3473_v11  ;;  %v1373_v21 = vrot.slane %v454_v56, %v4193_v5  ;;  %v1377_v25 = vrot.slane %v454_v56, %v4195_v6  ;;  %v1381_v26 = vrot.slane %v454_v56, %v4197_v7  ;;  %v258_v0 = vld [vmem:[#allocation2 + $0x6f0] sm:$0x3f] }
 0x116   :  { %3866 = vst [vmem:[#allocation7 + $0x660] sm:$0x3f] %v3474_v13  ;;  %3867 = vst [vmem:[#allocation7 + $0x668] sm:$0x3f] %v3475_v14  ;;  %v1385_v27 = vrot.slane %v454_v56, %v4199_v8  ;;  %v1389_v28 = vrot.slane %v454_v56, %v4201_v9  ;;  %v2694_v29 = vadd.f32 %v1361_v18, %v244_v61  ;;  %v259_v1 = vld [vmem:[#allocation2 + $0x6f8] sm:$0x3f] }
 0x117   :  { %3868 = vst [vmem:[#allocation7 + $0x670] sm:$0x3f] %v3476_v15  ;;  %3869 = vst [vmem:[#allocation7 + $0x678] sm:$0x3f] %v3477_v16  ;;  %v2695_v30 = vadd.f32 %v1365_v19, %v245_v62  ;;  %v2696_v31 = vadd.f32 %v1369_v20, %v246_v63  ;;  %v2697_v32 = vadd.f32 %v1373_v21, %v247_v12  ;;  %v257_v63 = vld [vmem:[#allocation2 + $0x6e8] sm:$0x3f] }
 0x118   :  { %v2698_v33 = vadd.f32 %v1377_v25, %v248_v17  ;;  %v2699_v34 = vadd.f32 %v1381_v26, %v249_v22  ;;  %v2700_v35 = vadd.f32 %v1385_v27, %v250_v23  ;;  %v2701_v36 = vadd.f32 %v1389_v28, %v251_v24  ;;  %v456_v26 = vld [vmem:[#allocation5 + $0xe0] sm:$0xff] }
 0x119   :  { %v3086_v37 = vmax.f32 %v2694_v29, 0.0  ;;  %v3087_v38 = vmax.f32 %v2695_v30, 0.0  ;;  %v3088_v39 = vmax.f32 %v2696_v31, 0.0  ;;  %v3089_v40 = vmax.f32 %v2697_v32, 0.0  ;;  %v260_v31 = vld [vmem:[#allocation2 + $0x700] sm:$0x3f] }
 0x11a   :  { %v3090_v42 = vmax.f32 %v2698_v33, 0.0  ;;  %v3091_v43 = vmax.f32 %v2699_v34, 0.0  ;;  %v3092_v44 = vmax.f32 %v2700_v35, 0.0  ;;  %v3093_v45 = vmax.f32 %v2701_v36, 0.0  ;;  %v261_v32 = vld [vmem:[#allocation2 + $0x708] sm:$0x3f] }
 0x11b   :  { %v3478_v49 = vmin.f32 %v3086_v37, 1.0  ;;  %v3479_v50 = vmin.f32 %v3087_v38, 1.0  ;;  %v3480_v51 = vmin.f32 %v3088_v39, 1.0  ;;  %v3481_v52 = vmin.f32 %v3089_v40, 1.0  ;;  %v262_v33 = vld [vmem:[#allocation2 + $0x710] sm:$0x3f] }
 0x11c   :  { %v3482_v54 = vmin.f32 %v3090_v42, 1.0  ;;  %v3483_v55 = vmin.f32 %v3091_v43, 1.0  ;;  %v3484_v56 = vmin.f32 %v3092_v44, 1.0  ;;  %v3485_v57 = vmin.f32 %v3093_v45, 1.0  ;;  %v263_v38 = vld [vmem:[#allocation2 + $0x718] sm:$0x3f] }
 0x11d   :  { %3870 = vst [vmem:[#allocation7 + $0x680] sm:$0x3f] %v3478_v49  ;;  %3871 = vst [vmem:[#allocation7 + $0x688] sm:$0x3f] %v3479_v50  ;;  %v1393_v59 = vrot.slane %v455_v41, %v4187_v2  ;;  %v1397_v60 = vrot.slane %v455_v41, %v4189_v3  ;;  %v1401_v61 = vrot.slane %v455_v41, %v4191_v4  ;;  %v264_v43 = vld [vmem:[#allocation2 + $0x720] sm:$0x3f] }
 0x11e   :  { %3872 = vst [vmem:[#allocation7 + $0x690] sm:$0x3f] %v3480_v51  ;;  %3873 = vst [vmem:[#allocation7 + $0x698] sm:$0x3f] %v3481_v52  ;;  %v1405_v62 = vrot.slane %v455_v41, %v4193_v5  ;;  %v1409_v10 = vrot.slane %v455_v41, %v4195_v6  ;;  %v1413_v11 = vrot.slane %v455_v41, %v4197_v7  ;;  %v266_v49 = vld [vmem:[#allocation2 + $0x730] sm:$0x3f] }
 0x11f   :  { %3874 = vst [vmem:[#allocation7 + $0x6a0] sm:$0x3f] %v3482_v54  ;;  %3875 = vst [vmem:[#allocation7 + $0x6a8] sm:$0x3f] %v3483_v55  ;;  %v1417_v12 = vrot.slane %v455_v41, %v4199_v8  ;;  %v1421_v13 = vrot.slane %v455_v41, %v4201_v9  ;;  %v2702_v14 = vadd.f32 %v1393_v59, %v252_v46  ;;  %v267_v50 = vld [vmem:[#allocation2 + $0x738] sm:$0x3f] }
 0x120   :  { %3876 = vst [vmem:[#allocation7 + $0x6b0] sm:$0x3f] %v3484_v56  ;;  %3877 = vst [vmem:[#allocation7 + $0x6b8] sm:$0x3f] %v3485_v57  ;;  %v2703_v15 = vadd.f32 %v1397_v60, %v253_v47  ;;  %v2704_v16 = vadd.f32 %v1401_v61, %v254_v48  ;;  %v2705_v17 = vadd.f32 %v1405_v62, %v255_v53  ;;  %v265_v48 = vld [vmem:[#allocation2 + $0x728] sm:$0x3f] }
 0x121   :  { %v2706_v18 = vadd.f32 %v1409_v10, %v256_v58  ;;  %v2707_v19 = vadd.f32 %v1413_v11, %v257_v63  ;;  %v2708_v20 = vadd.f32 %v1417_v12, %v258_v0  ;;  %v2709_v21 = vadd.f32 %v1421_v13, %v259_v1  ;;  %v457_v11 = vld [vmem:[#allocation5 + $0xe8] sm:$0xff] }
 0x122   :  { %v3094_v22 = vmax.f32 %v2702_v14, 0.0  ;;  %v3095_v23 = vmax.f32 %v2703_v15, 0.0  ;;  %v3096_v24 = vmax.f32 %v2704_v16, 0.0  ;;  %v3097_v25 = vmax.f32 %v2705_v17, 0.0  ;;  %v268_v16 = vld [vmem:[#allocation2 + $0x740] sm:$0x3f] }
 0x123   :  { %v3098_v27 = vmax.f32 %v2706_v18, 0.0  ;;  %v3099_v28 = vmax.f32 %v2707_v19, 0.0  ;;  %v3100_v29 = vmax.f32 %v2708_v20, 0.0  ;;  %v3101_v30 = vmax.f32 %v2709_v21, 0.0  ;;  %v269_v17 = vld [vmem:[#allocation2 + $0x748] sm:$0x3f] }
 0x124   :  { %v3486_v34 = vmin.f32 %v3094_v22, 1.0  ;;  %v3487_v35 = vmin.f32 %v3095_v23, 1.0  ;;  %v3488_v36 = vmin.f32 %v3096_v24, 1.0  ;;  %v3489_v37 = vmin.f32 %v3097_v25, 1.0  ;;  %v270_v18 = vld [vmem:[#allocation2 + $0x750] sm:$0x3f] }
 0x125   :  { %v3490_v39 = vmin.f32 %v3098_v27, 1.0  ;;  %v3491_v40 = vmin.f32 %v3099_v28, 1.0  ;;  %v3492_v41 = vmin.f32 %v3100_v29, 1.0  ;;  %v3493_v42 = vmin.f32 %v3101_v30, 1.0  ;;  %v271_v23 = vld [vmem:[#allocation2 + $0x758] sm:$0x3f] }
 0x126   :  { %3878 = vst [vmem:[#allocation7 + $0x6c0] sm:$0x3f] %v3486_v34  ;;  %3879 = vst [vmem:[#allocation7 + $0x6c8] sm:$0x3f] %v3487_v35  ;;  %v1425_v44 = vrot.slane %v456_v26, %v4187_v2  ;;  %v1429_v45 = vrot.slane %v456_v26, %v4189_v3  ;;  %v1433_v46 = vrot.slane %v456_v26, %v4191_v4  ;;  %v272_v28 = vld [vmem:[#allocation2 + $0x760] sm:$0x3f] }
 0x127   :  { %3880 = vst [vmem:[#allocation7 + $0x6d0] sm:$0x3f] %v3488_v36  ;;  %3881 = vst [vmem:[#allocation7 + $0x6d8] sm:$0x3f] %v3489_v37  ;;  %v1437_v47 = vrot.slane %v456_v26, %v4193_v5  ;;  %v1441_v51 = vrot.slane %v456_v26, %v4195_v6  ;;  %v1445_v52 = vrot.slane %v456_v26, %v4197_v7  ;;  %v274_v34 = vld [vmem:[#allocation2 + $0x770] sm:$0x3f] }
 0x128   :  { %3882 = vst [vmem:[#allocation7 + $0x6e0] sm:$0x3f] %v3490_v39  ;;  %3883 = vst [vmem:[#allocation7 + $0x6e8] sm:$0x3f] %v3491_v40  ;;  %v1449_v53 = vrot.slane %v456_v26, %v4199_v8  ;;  %v1453_v54 = vrot.slane %v456_v26, %v4201_v9  ;;  %v2710_v55 = vadd.f32 %v1425_v44, %v260_v31  ;;  %v275_v35 = vld [vmem:[#allocation2 + $0x778] sm:$0x3f] }
 0x129   :  { %3884 = vst [vmem:[#allocation7 + $0x6f0] sm:$0x3f] %v3492_v41  ;;  %3885 = vst [vmem:[#allocation7 + $0x6f8] sm:$0x3f] %v3493_v42  ;;  %v2711_v56 = vadd.f32 %v1429_v45, %v261_v32  ;;  %v2712_v57 = vadd.f32 %v1433_v46, %v262_v33  ;;  %v2713_v58 = vadd.f32 %v1437_v47, %v263_v38  ;;  %v273_v33 = vld [vmem:[#allocation2 + $0x768] sm:$0x3f] }
 0x12a   :  { %v2714_v59 = vadd.f32 %v1441_v51, %v264_v43  ;;  %v2715_v60 = vadd.f32 %v1445_v52, %v265_v48  ;;  %v2716_v61 = vadd.f32 %v1449_v53, %v266_v49  ;;  %v2717_v62 = vadd.f32 %v1453_v54, %v267_v50  ;;  %v458_v52 = vld [vmem:[#allocation5 + $0xf0] sm:$0xff] }
 0x12b   :  { %v3102_v63 = vmax.f32 %v2710_v55, 0.0  ;;  %v3103_v0 = vmax.f32 %v2711_v56, 0.0  ;;  %v3104_v1 = vmax.f32 %v2712_v57, 0.0  ;;  %v3105_v10 = vmax.f32 %v2713_v58, 0.0  ;;  %v276_v57 = vld [vmem:[#allocation2 + $0x780] sm:$0x3f] }
 0x12c   :  { %v3106_v12 = vmax.f32 %v2714_v59, 0.0  ;;  %v3107_v13 = vmax.f32 %v2715_v60, 0.0  ;;  %v3108_v14 = vmax.f32 %v2716_v61, 0.0  ;;  %v3109_v15 = vmax.f32 %v2717_v62, 0.0  ;;  %v277_v58 = vld [vmem:[#allocation2 + $0x788] sm:$0x3f] }
 0x12d   :  { %v3494_v19 = vmin.f32 %v3102_v63, 1.0  ;;  %v3495_v20 = vmin.f32 %v3103_v0, 1.0  ;;  %v3496_v21 = vmin.f32 %v3104_v1, 1.0  ;;  %v3497_v22 = vmin.f32 %v3105_v10, 1.0  ;;  %v278_v59 = vld [vmem:[#allocation2 + $0x790] sm:$0x3f] }
 0x12e   :  { %v3498_v24 = vmin.f32 %v3106_v12, 1.0  ;;  %v3499_v25 = vmin.f32 %v3107_v13, 1.0  ;;  %v3500_v26 = vmin.f32 %v3108_v14, 1.0  ;;  %v3501_v27 = vmin.f32 %v3109_v15, 1.0  ;;  %v279_v0 = vld [vmem:[#allocation2 + $0x798] sm:$0x3f] }
 0x12f   :  { %3886 = vst [vmem:[#allocation7 + $0x700] sm:$0x3f] %v3494_v19  ;;  %3887 = vst [vmem:[#allocation7 + $0x708] sm:$0x3f] %v3495_v20  ;;  %v1457_v29 = vrot.slane %v457_v11, %v4187_v2  ;;  %v1461_v30 = vrot.slane %v457_v11, %v4189_v3  ;;  %v1465_v31 = vrot.slane %v457_v11, %v4191_v4  ;;  %v280_v13 = vld [vmem:[#allocation2 + $0x7a0] sm:$0x3f] }
 0x130   :  { %3888 = vst [vmem:[#allocation7 + $0x710] sm:$0x3f] %v3496_v21  ;;  %3889 = vst [vmem:[#allocation7 + $0x718] sm:$0x3f] %v3497_v22  ;;  %v1469_v32 = vrot.slane %v457_v11, %v4193_v5  ;;  %v1473_v36 = vrot.slane %v457_v11, %v4195_v6  ;;  %v1477_v37 = vrot.slane %v457_v11, %v4197_v7  ;;  %v282_v19 = vld [vmem:[#allocation2 + $0x7b0] sm:$0x3f] }
 0x131   :  { %3890 = vst [vmem:[#allocation7 + $0x720] sm:$0x3f] %v3498_v24  ;;  %3891 = vst [vmem:[#allocation7 + $0x728] sm:$0x3f] %v3499_v25  ;;  %v1481_v38 = vrot.slane %v457_v11, %v4199_v8  ;;  %v1485_v39 = vrot.slane %v457_v11, %v4201_v9  ;;  %v2718_v40 = vadd.f32 %v1457_v29, %v268_v16  ;;  %v283_v20 = vld [vmem:[#allocation2 + $0x7b8] sm:$0x3f] }
 0x132   :  { %3892 = vst [vmem:[#allocation7 + $0x730] sm:$0x3f] %v3500_v26  ;;  %3893 = vst [vmem:[#allocation7 + $0x738] sm:$0x3f] %v3501_v27  ;;  %v2719_v41 = vadd.f32 %v1461_v30, %v269_v17  ;;  %v2720_v42 = vadd.f32 %v1465_v31, %v270_v18  ;;  %v2721_v43 = vadd.f32 %v1469_v32, %v271_v23  ;;  %v281_v18 = vld [vmem:[#allocation2 + $0x7a8] sm:$0x3f] }
 0x133   :  { %v2722_v44 = vadd.f32 %v1473_v36, %v272_v28  ;;  %v2723_v45 = vadd.f32 %v1477_v37, %v273_v33  ;;  %v2724_v46 = vadd.f32 %v1481_v38, %v274_v34  ;;  %v2725_v47 = vadd.f32 %v1485_v39, %v275_v35  ;;  %v459_v37 = vld [vmem:[#allocation5 + $0xf8] sm:$0xff] }
 0x134   :  { %v3110_v48 = vmax.f32 %v2718_v40, 0.0  ;;  %v3111_v49 = vmax.f32 %v2719_v41, 0.0  ;;  %v3112_v50 = vmax.f32 %v2720_v42, 0.0  ;;  %v3113_v51 = vmax.f32 %v2721_v43, 0.0  ;;  %v284_v42 = vld [vmem:[#allocation2 + $0x7c0] sm:$0x3f] }
 0x135   :  { %v3114_v53 = vmax.f32 %v2722_v44, 0.0  ;;  %v3115_v54 = vmax.f32 %v2723_v45, 0.0  ;;  %v3116_v55 = vmax.f32 %v2724_v46, 0.0  ;;  %v3117_v56 = vmax.f32 %v2725_v47, 0.0  ;;  %v285_v43 = vld [vmem:[#allocation2 + $0x7c8] sm:$0x3f] }
 0x136   :  { %v3502_v60 = vmin.f32 %v3110_v48, 1.0  ;;  %v3503_v61 = vmin.f32 %v3111_v49, 1.0  ;;  %v3504_v62 = vmin.f32 %v3112_v50, 1.0  ;;  %v3505_v63 = vmin.f32 %v3113_v51, 1.0  ;;  %v286_v44 = vld [vmem:[#allocation2 + $0x7d0] sm:$0x3f] }
 0x137   :  { %v3506_v1 = vmin.f32 %v3114_v53, 1.0  ;;  %v3507_v10 = vmin.f32 %v3115_v54, 1.0  ;;  %v3508_v11 = vmin.f32 %v3116_v55, 1.0  ;;  %v3509_v12 = vmin.f32 %v3117_v56, 1.0  ;;  %v287_v49 = vld [vmem:[#allocation2 + $0x7d8] sm:$0x3f] }
 0x138   :  { %3894 = vst [vmem:[#allocation7 + $0x740] sm:$0x3f] %v3502_v60  ;;  %3895 = vst [vmem:[#allocation7 + $0x748] sm:$0x3f] %v3503_v61  ;;  %v1489_v14 = vrot.slane %v458_v52, %v4187_v2  ;;  %v1493_v15 = vrot.slane %v458_v52, %v4189_v3  ;;  %v1497_v16 = vrot.slane %v458_v52, %v4191_v4  ;;  %v288_v54 = vld [vmem:[#allocation2 + $0x7e0] sm:$0x3f] }
 0x139   :  { %3896 = vst [vmem:[#allocation7 + $0x750] sm:$0x3f] %v3504_v62  ;;  %3897 = vst [vmem:[#allocation7 + $0x758] sm:$0x3f] %v3505_v63  ;;  %v1501_v17 = vrot.slane %v458_v52, %v4193_v5  ;;  %v1505_v21 = vrot.slane %v458_v52, %v4195_v6  ;;  %v1509_v22 = vrot.slane %v458_v52, %v4197_v7  ;;  %v290_v60 = vld [vmem:[#allocation2 + $0x7f0] sm:$0x3f] }
 0x13a   :  { %3898 = vst [vmem:[#allocation7 + $0x760] sm:$0x3f] %v3506_v1  ;;  %3899 = vst [vmem:[#allocation7 + $0x768] sm:$0x3f] %v3507_v10  ;;  %v1513_v23 = vrot.slane %v458_v52, %v4199_v8  ;;  %v1517_v24 = vrot.slane %v458_v52, %v4201_v9  ;;  %v2726_v25 = vadd.f32 %v1489_v14, %v276_v57  ;;  %v291_v61 = vld [vmem:[#allocation2 + $0x7f8] sm:$0x3f] }
 0x13b   :  { %3900 = vst [vmem:[#allocation7 + $0x770] sm:$0x3f] %v3508_v11  ;;  %3901 = vst [vmem:[#allocation7 + $0x778] sm:$0x3f] %v3509_v12  ;;  %v2727_v26 = vadd.f32 %v1493_v15, %v277_v58  ;;  %v2728_v27 = vadd.f32 %v1497_v16, %v278_v59  ;;  %v2729_v28 = vadd.f32 %v1501_v17, %v279_v0  ;;  %v289_v59 = vld [vmem:[#allocation2 + $0x7e8] sm:$0x3f] }
 0x13c   :  { %v2730_v29 = vadd.f32 %v1505_v21, %v280_v13  ;;  %v2731_v30 = vadd.f32 %v1509_v22, %v281_v18  ;;  %v2732_v31 = vadd.f32 %v1513_v23, %v282_v19  ;;  %v2733_v32 = vadd.f32 %v1517_v24, %v283_v20  ;;  %v460_v22 = vld [vmem:[#allocation5 + $0x100] sm:$0xff] }
 0x13d   :  { %v3118_v33 = vmax.f32 %v2726_v25, 0.0  ;;  %v3119_v34 = vmax.f32 %v2727_v26, 0.0  ;;  %v3120_v35 = vmax.f32 %v2728_v27, 0.0  ;;  %v3121_v36 = vmax.f32 %v2729_v28, 0.0  ;;  %v292_v27 = vld [vmem:[#allocation2 + $0x800] sm:$0x3f] }
 0x13e   :  { %v3122_v38 = vmax.f32 %v2730_v29, 0.0  ;;  %v3123_v39 = vmax.f32 %v2731_v30, 0.0  ;;  %v3124_v40 = vmax.f32 %v2732_v31, 0.0  ;;  %v3125_v41 = vmax.f32 %v2733_v32, 0.0  ;;  %v293_v28 = vld [vmem:[#allocation2 + $0x808] sm:$0x3f] }
 0x13f   :  { %v3510_v45 = vmin.f32 %v3118_v33, 1.0  ;;  %v3511_v46 = vmin.f32 %v3119_v34, 1.0  ;;  %v3512_v47 = vmin.f32 %v3120_v35, 1.0  ;;  %v3513_v48 = vmin.f32 %v3121_v36, 1.0  ;;  %v294_v29 = vld [vmem:[#allocation2 + $0x810] sm:$0x3f] }
 0x140   :  { %v3514_v50 = vmin.f32 %v3122_v38, 1.0  ;;  %v3515_v51 = vmin.f32 %v3123_v39, 1.0  ;;  %v3516_v52 = vmin.f32 %v3124_v40, 1.0  ;;  %v3517_v53 = vmin.f32 %v3125_v41, 1.0  ;;  %v295_v34 = vld [vmem:[#allocation2 + $0x818] sm:$0x3f] }
 0x141   :  { %3902 = vst [vmem:[#allocation7 + $0x780] sm:$0x3f] %v3510_v45  ;;  %3903 = vst [vmem:[#allocation7 + $0x788] sm:$0x3f] %v3511_v46  ;;  %v1521_v55 = vrot.slane %v459_v37, %v4187_v2  ;;  %v1525_v56 = vrot.slane %v459_v37, %v4189_v3  ;;  %v1529_v57 = vrot.slane %v459_v37, %v4191_v4  ;;  %v296_v39 = vld [vmem:[#allocation2 + $0x820] sm:$0x3f] }
 0x142   :  { %3904 = vst [vmem:[#allocation7 + $0x790] sm:$0x3f] %v3512_v47  ;;  %3905 = vst [vmem:[#allocation7 + $0x798] sm:$0x3f] %v3513_v48  ;;  %v1533_v58 = vrot.slane %v459_v37, %v4193_v5  ;;  %v1537_v62 = vrot.slane %v459_v37, %v4195_v6  ;;  %v1541_v63 = vrot.slane %v459_v37, %v4197_v7  ;;  %v298_v45 = vld [vmem:[#allocation2 + $0x830] sm:$0x3f] }
 0x143   :  { %3906 = vst [vmem:[#allocation7 + $0x7a0] sm:$0x3f] %v3514_v50  ;;  %3907 = vst [vmem:[#allocation7 + $0x7a8] sm:$0x3f] %v3515_v51  ;;  %v1545_v0 = vrot.slane %v459_v37, %v4199_v8  ;;  %v1549_v1 = vrot.slane %v459_v37, %v4201_v9  ;;  %v2734_v10 = vadd.f32 %v1521_v55, %v284_v42  ;;  %v299_v46 = vld [vmem:[#allocation2 + $0x838] sm:$0x3f] }
 0x144   :  { %3908 = vst [vmem:[#allocation7 + $0x7b0] sm:$0x3f] %v3516_v52  ;;  %3909 = vst [vmem:[#allocation7 + $0x7b8] sm:$0x3f] %v3517_v53  ;;  %v2735_v11 = vadd.f32 %v1525_v56, %v285_v43  ;;  %v2736_v12 = vadd.f32 %v1529_v57, %v286_v44  ;;  %v2737_v13 = vadd.f32 %v1533_v58, %v287_v49  ;;  %v297_v44 = vld [vmem:[#allocation2 + $0x828] sm:$0x3f] }
 0x145   :  { %v2738_v14 = vadd.f32 %v1537_v62, %v288_v54  ;;  %v2739_v15 = vadd.f32 %v1541_v63, %v289_v59  ;;  %v2740_v16 = vadd.f32 %v1545_v0, %v290_v60  ;;  %v2741_v17 = vadd.f32 %v1549_v1, %v291_v61  ;;  %v461_v63 = vld [vmem:[#allocation5 + $0x108] sm:$0xff] }
 0x146   :  { %v3126_v18 = vmax.f32 %v2734_v10, 0.0  ;;  %v3127_v19 = vmax.f32 %v2735_v11, 0.0  ;;  %v3128_v20 = vmax.f32 %v2736_v12, 0.0  ;;  %v3129_v21 = vmax.f32 %v2737_v13, 0.0  ;;  %v300_v12 = vld [vmem:[#allocation2 + $0x840] sm:$0x3f] }
 0x147   :  { %v3130_v23 = vmax.f32 %v2738_v14, 0.0  ;;  %v3131_v24 = vmax.f32 %v2739_v15, 0.0  ;;  %v3132_v25 = vmax.f32 %v2740_v16, 0.0  ;;  %v3133_v26 = vmax.f32 %v2741_v17, 0.0  ;;  %v301_v13 = vld [vmem:[#allocation2 + $0x848] sm:$0x3f] }
 0x148   :  { %v3518_v30 = vmin.f32 %v3126_v18, 1.0  ;;  %v3519_v31 = vmin.f32 %v3127_v19, 1.0  ;;  %v3520_v32 = vmin.f32 %v3128_v20, 1.0  ;;  %v3521_v33 = vmin.f32 %v3129_v21, 1.0  ;;  %v302_v14 = vld [vmem:[#allocation2 + $0x850] sm:$0x3f] }
 0x149   :  { %v3522_v35 = vmin.f32 %v3130_v23, 1.0  ;;  %v3523_v36 = vmin.f32 %v3131_v24, 1.0  ;;  %v3524_v37 = vmin.f32 %v3132_v25, 1.0  ;;  %v3525_v38 = vmin.f32 %v3133_v26, 1.0  ;;  %v303_v19 = vld [vmem:[#allocation2 + $0x858] sm:$0x3f] }
 0x14a   :  { %3910 = vst [vmem:[#allocation7 + $0x7c0] sm:$0x3f] %v3518_v30  ;;  %3911 = vst [vmem:[#allocation7 + $0x7c8] sm:$0x3f] %v3519_v31  ;;  %v1553_v40 = vrot.slane %v460_v22, %v4187_v2  ;;  %v1557_v41 = vrot.slane %v460_v22, %v4189_v3  ;;  %v1561_v42 = vrot.slane %v460_v22, %v4191_v4  ;;  %v304_v24 = vld [vmem:[#allocation2 + $0x860] sm:$0x3f] }
 0x14b   :  { %3912 = vst [vmem:[#allocation7 + $0x7d0] sm:$0x3f] %v3520_v32  ;;  %3913 = vst [vmem:[#allocation7 + $0x7d8] sm:$0x3f] %v3521_v33  ;;  %v1565_v43 = vrot.slane %v460_v22, %v4193_v5  ;;  %v1569_v47 = vrot.slane %v460_v22, %v4195_v6  ;;  %v1573_v48 = vrot.slane %v460_v22, %v4197_v7  ;;  %v306_v30 = vld [vmem:[#allocation2 + $0x870] sm:$0x3f] }
 0x14c   :  { %3914 = vst [vmem:[#allocation7 + $0x7e0] sm:$0x3f] %v3522_v35  ;;  %3915 = vst [vmem:[#allocation7 + $0x7e8] sm:$0x3f] %v3523_v36  ;;  %v1577_v49 = vrot.slane %v460_v22, %v4199_v8  ;;  %v1581_v50 = vrot.slane %v460_v22, %v4201_v9  ;;  %v2742_v51 = vadd.f32 %v1553_v40, %v292_v27  ;;  %v307_v31 = vld [vmem:[#allocation2 + $0x878] sm:$0x3f] }
 0x14d   :  { %3916 = vst [vmem:[#allocation7 + $0x7f0] sm:$0x3f] %v3524_v37  ;;  %3917 = vst [vmem:[#allocation7 + $0x7f8] sm:$0x3f] %v3525_v38  ;;  %v2743_v52 = vadd.f32 %v1557_v41, %v293_v28  ;;  %v2744_v53 = vadd.f32 %v1561_v42, %v294_v29  ;;  %v2745_v54 = vadd.f32 %v1565_v43, %v295_v34  ;;  %v305_v29 = vld [vmem:[#allocation2 + $0x868] sm:$0x3f] }
 0x14e   :  { %v2746_v55 = vadd.f32 %v1569_v47, %v296_v39  ;;  %v2747_v56 = vadd.f32 %v1573_v48, %v297_v44  ;;  %v2748_v57 = vadd.f32 %v1577_v49, %v298_v45  ;;  %v2749_v58 = vadd.f32 %v1581_v50, %v299_v46  ;;  %v462_v48 = vld [vmem:[#allocation5 + $0x110] sm:$0xff] }
 0x14f   :  { %v3134_v59 = vmax.f32 %v2742_v51, 0.0  ;;  %v3135_v60 = vmax.f32 %v2743_v52, 0.0  ;;  %v3136_v61 = vmax.f32 %v2744_v53, 0.0  ;;  %v3137_v62 = vmax.f32 %v2745_v54, 0.0  ;;  %v308_v53 = vld [vmem:[#allocation2 + $0x880] sm:$0x3f] }
 0x150   :  { %v3138_v0 = vmax.f32 %v2746_v55, 0.0  ;;  %v3139_v1 = vmax.f32 %v2747_v56, 0.0  ;;  %v3140_v10 = vmax.f32 %v2748_v57, 0.0  ;;  %v3141_v11 = vmax.f32 %v2749_v58, 0.0  ;;  %v309_v54 = vld [vmem:[#allocation2 + $0x888] sm:$0x3f] }
 0x151   :  { %v3526_v15 = vmin.f32 %v3134_v59, 1.0  ;;  %v3527_v16 = vmin.f32 %v3135_v60, 1.0  ;;  %v3528_v17 = vmin.f32 %v3136_v61, 1.0  ;;  %v3529_v18 = vmin.f32 %v3137_v62, 1.0  ;;  %v310_v55 = vld [vmem:[#allocation2 + $0x890] sm:$0x3f] }
 0x152   :  { %v3530_v20 = vmin.f32 %v3138_v0, 1.0  ;;  %v3531_v21 = vmin.f32 %v3139_v1, 1.0  ;;  %v3532_v22 = vmin.f32 %v3140_v10, 1.0  ;;  %v3533_v23 = vmin.f32 %v3141_v11, 1.0  ;;  %v311_v60 = vld [vmem:[#allocation2 + $0x898] sm:$0x3f] }
 0x153   :  { %3918 = vst [vmem:[#allocation7 + $0x800] sm:$0x3f] %v3526_v15  ;;  %3919 = vst [vmem:[#allocation7 + $0x808] sm:$0x3f] %v3527_v16  ;;  %v1585_v25 = vrot.slane %v461_v63, %v4187_v2  ;;  %v1589_v26 = vrot.slane %v461_v63, %v4189_v3  ;;  %v1593_v27 = vrot.slane %v461_v63, %v4191_v4  ;;  %v312_v1 = vld [vmem:[#allocation2 + $0x8a0] sm:$0x3f] }
 0x154   :  { %3920 = vst [vmem:[#allocation7 + $0x810] sm:$0x3f] %v3528_v17  ;;  %3921 = vst [vmem:[#allocation7 + $0x818] sm:$0x3f] %v3529_v18  ;;  %v1597_v28 = vrot.slane %v461_v63, %v4193_v5  ;;  %v1601_v32 = vrot.slane %v461_v63, %v4195_v6  ;;  %v1605_v33 = vrot.slane %v461_v63, %v4197_v7  ;;  %v314_v15 = vld [vmem:[#allocation2 + $0x8b0] sm:$0x3f] }
 0x155   :  { %3922 = vst [vmem:[#allocation7 + $0x820] sm:$0x3f] %v3530_v20  ;;  %3923 = vst [vmem:[#allocation7 + $0x828] sm:$0x3f] %v3531_v21  ;;  %v1609_v34 = vrot.slane %v461_v63, %v4199_v8  ;;  %v1613_v35 = vrot.slane %v461_v63, %v4201_v9  ;;  %v2750_v36 = vadd.f32 %v1585_v25, %v300_v12  ;;  %v315_v16 = vld [vmem:[#allocation2 + $0x8b8] sm:$0x3f] }
 0x156   :  { %3924 = vst [vmem:[#allocation7 + $0x830] sm:$0x3f] %v3532_v22  ;;  %3925 = vst [vmem:[#allocation7 + $0x838] sm:$0x3f] %v3533_v23  ;;  %v2751_v37 = vadd.f32 %v1589_v26, %v301_v13  ;;  %v2752_v38 = vadd.f32 %v1593_v27, %v302_v14  ;;  %v2753_v39 = vadd.f32 %v1597_v28, %v303_v19  ;;  %v313_v14 = vld [vmem:[#allocation2 + $0x8a8] sm:$0x3f] }
 0x157   :  { %v2754_v40 = vadd.f32 %v1601_v32, %v304_v24  ;;  %v2755_v41 = vadd.f32 %v1605_v33, %v305_v29  ;;  %v2756_v42 = vadd.f32 %v1609_v34, %v306_v30  ;;  %v2757_v43 = vadd.f32 %v1613_v35, %v307_v31  ;;  %v463_v33 = vld [vmem:[#allocation5 + $0x118] sm:$0xff] }
 0x158   :  { %v3142_v44 = vmax.f32 %v2750_v36, 0.0  ;;  %v3143_v45 = vmax.f32 %v2751_v37, 0.0  ;;  %v3144_v46 = vmax.f32 %v2752_v38, 0.0  ;;  %v3145_v47 = vmax.f32 %v2753_v39, 0.0  ;;  %v316_v38 = vld [vmem:[#allocation2 + $0x8c0] sm:$0x3f] }
 0x159   :  { %v3146_v49 = vmax.f32 %v2754_v40, 0.0  ;;  %v3147_v50 = vmax.f32 %v2755_v41, 0.0  ;;  %v3148_v51 = vmax.f32 %v2756_v42, 0.0  ;;  %v3149_v52 = vmax.f32 %v2757_v43, 0.0  ;;  %v317_v39 = vld [vmem:[#allocation2 + $0x8c8] sm:$0x3f] }
 0x15a   :  { %v3534_v56 = vmin.f32 %v3142_v44, 1.0  ;;  %v3535_v57 = vmin.f32 %v3143_v45, 1.0  ;;  %v3536_v58 = vmin.f32 %v3144_v46, 1.0  ;;  %v3537_v59 = vmin.f32 %v3145_v47, 1.0  ;;  %v318_v40 = vld [vmem:[#allocation2 + $0x8d0] sm:$0x3f] }
 0x15b   :  { %v3538_v61 = vmin.f32 %v3146_v49, 1.0  ;;  %v3539_v62 = vmin.f32 %v3147_v50, 1.0  ;;  %v3540_v63 = vmin.f32 %v3148_v51, 1.0  ;;  %v3541_v0 = vmin.f32 %v3149_v52, 1.0  ;;  %v319_v45 = vld [vmem:[#allocation2 + $0x8d8] sm:$0x3f] }
 0x15c   :  { %3926 = vst [vmem:[#allocation7 + $0x840] sm:$0x3f] %v3534_v56  ;;  %3927 = vst [vmem:[#allocation7 + $0x848] sm:$0x3f] %v3535_v57  ;;  %v1617_v10 = vrot.slane %v462_v48, %v4187_v2  ;;  %v1621_v11 = vrot.slane %v462_v48, %v4189_v3  ;;  %v1625_v12 = vrot.slane %v462_v48, %v4191_v4  ;;  %v320_v50 = vld [vmem:[#allocation2 + $0x8e0] sm:$0x3f] }
 0x15d   :  { %3928 = vst [vmem:[#allocation7 + $0x850] sm:$0x3f] %v3536_v58  ;;  %3929 = vst [vmem:[#allocation7 + $0x858] sm:$0x3f] %v3537_v59  ;;  %v1629_v13 = vrot.slane %v462_v48, %v4193_v5  ;;  %v1633_v17 = vrot.slane %v462_v48, %v4195_v6  ;;  %v1637_v18 = vrot.slane %v462_v48, %v4197_v7  ;;  %v322_v56 = vld [vmem:[#allocation2 + $0x8f0] sm:$0x3f] }
 0x15e   :  { %3930 = vst [vmem:[#allocation7 + $0x860] sm:$0x3f] %v3538_v61  ;;  %3931 = vst [vmem:[#allocation7 + $0x868] sm:$0x3f] %v3539_v62  ;;  %v1641_v19 = vrot.slane %v462_v48, %v4199_v8  ;;  %v1645_v20 = vrot.slane %v462_v48, %v4201_v9  ;;  %v2758_v21 = vadd.f32 %v1617_v10, %v308_v53  ;;  %v323_v57 = vld [vmem:[#allocation2 + $0x8f8] sm:$0x3f] }
 0x15f   :  { %3932 = vst [vmem:[#allocation7 + $0x870] sm:$0x3f] %v3540_v63  ;;  %3933 = vst [vmem:[#allocation7 + $0x878] sm:$0x3f] %v3541_v0  ;;  %v2759_v22 = vadd.f32 %v1621_v11, %v309_v54  ;;  %v2760_v23 = vadd.f32 %v1625_v12, %v310_v55  ;;  %v2761_v24 = vadd.f32 %v1629_v13, %v311_v60  ;;  %v321_v55 = vld [vmem:[#allocation2 + $0x8e8] sm:$0x3f] }
 0x160   :  { %v2762_v25 = vadd.f32 %v1633_v17, %v312_v1  ;;  %v2763_v26 = vadd.f32 %v1637_v18, %v313_v14  ;;  %v2764_v27 = vadd.f32 %v1641_v19, %v314_v15  ;;  %v2765_v28 = vadd.f32 %v1645_v20, %v315_v16  ;;  %v464_v18 = vld [vmem:[#allocation5 + $0x120] sm:$0xff] }
 0x161   :  { %v3150_v29 = vmax.f32 %v2758_v21, 0.0  ;;  %v3151_v30 = vmax.f32 %v2759_v22, 0.0  ;;  %v3152_v31 = vmax.f32 %v2760_v23, 0.0  ;;  %v3153_v32 = vmax.f32 %v2761_v24, 0.0  ;;  %v324_v23 = vld [vmem:[#allocation2 + $0x900] sm:$0x3f] }
 0x162   :  { %v3154_v34 = vmax.f32 %v2762_v25, 0.0  ;;  %v3155_v35 = vmax.f32 %v2763_v26, 0.0  ;;  %v3156_v36 = vmax.f32 %v2764_v27, 0.0  ;;  %v3157_v37 = vmax.f32 %v2765_v28, 0.0  ;;  %v325_v24 = vld [vmem:[#allocation2 + $0x908] sm:$0x3f] }
 0x163   :  { %v3542_v41 = vmin.f32 %v3150_v29, 1.0  ;;  %v3543_v42 = vmin.f32 %v3151_v30, 1.0  ;;  %v3544_v43 = vmin.f32 %v3152_v31, 1.0  ;;  %v3545_v44 = vmin.f32 %v3153_v32, 1.0  ;;  %v326_v25 = vld [vmem:[#allocation2 + $0x910] sm:$0x3f] }
 0x164   :  { %v3546_v46 = vmin.f32 %v3154_v34, 1.0  ;;  %v3547_v47 = vmin.f32 %v3155_v35, 1.0  ;;  %v3548_v48 = vmin.f32 %v3156_v36, 1.0  ;;  %v3549_v49 = vmin.f32 %v3157_v37, 1.0  ;;  %v327_v30 = vld [vmem:[#allocation2 + $0x918] sm:$0x3f] }
 0x165   :  { %3934 = vst [vmem:[#allocation7 + $0x880] sm:$0x3f] %v3542_v41  ;;  %3935 = vst [vmem:[#allocation7 + $0x888] sm:$0x3f] %v3543_v42  ;;  %v1649_v51 = vrot.slane %v463_v33, %v4187_v2  ;;  %v1653_v52 = vrot.slane %v463_v33, %v4189_v3  ;;  %v1657_v53 = vrot.slane %v463_v33, %v4191_v4  ;;  %v328_v35 = vld [vmem:[#allocation2 + $0x920] sm:$0x3f] }
 0x166   :  { %3936 = vst [vmem:[#allocation7 + $0x890] sm:$0x3f] %v3544_v43  ;;  %3937 = vst [vmem:[#allocation7 + $0x898] sm:$0x3f] %v3545_v44  ;;  %v1661_v54 = vrot.slane %v463_v33, %v4193_v5  ;;  %v1665_v58 = vrot.slane %v463_v33, %v4195_v6  ;;  %v1669_v59 = vrot.slane %v463_v33, %v4197_v7  ;;  %v330_v41 = vld [vmem:[#allocation2 + $0x930] sm:$0x3f] }
 0x167   :  { %3938 = vst [vmem:[#allocation7 + $0x8a0] sm:$0x3f] %v3546_v46  ;;  %3939 = vst [vmem:[#allocation7 + $0x8a8] sm:$0x3f] %v3547_v47  ;;  %v1673_v60 = vrot.slane %v463_v33, %v4199_v8  ;;  %v1677_v61 = vrot.slane %v463_v33, %v4201_v9  ;;  %v2766_v62 = vadd.f32 %v1649_v51, %v316_v38  ;;  %v331_v42 = vld [vmem:[#allocation2 + $0x938] sm:$0x3f] }
 0x168   :  { %3940 = vst [vmem:[#allocation7 + $0x8b0] sm:$0x3f] %v3548_v48  ;;  %3941 = vst [vmem:[#allocation7 + $0x8b8] sm:$0x3f] %v3549_v49  ;;  %v2767_v63 = vadd.f32 %v1653_v52, %v317_v39  ;;  %v2768_v0 = vadd.f32 %v1657_v53, %v318_v40  ;;  %v2769_v1 = vadd.f32 %v1661_v54, %v319_v45  ;;  %v329_v40 = vld [vmem:[#allocation2 + $0x928] sm:$0x3f] }
 0x169   :  { %v2770_v10 = vadd.f32 %v1665_v58, %v320_v50  ;;  %v2771_v11 = vadd.f32 %v1669_v59, %v321_v55  ;;  %v2772_v12 = vadd.f32 %v1673_v60, %v322_v56  ;;  %v2773_v13 = vadd.f32 %v1677_v61, %v323_v57  ;;  %v465_v59 = vld [vmem:[#allocation5 + $0x128] sm:$0xff] }
 0x16a   :  { %v3158_v14 = vmax.f32 %v2766_v62, 0.0  ;;  %v3159_v15 = vmax.f32 %v2767_v63, 0.0  ;;  %v3160_v16 = vmax.f32 %v2768_v0, 0.0  ;;  %v3161_v17 = vmax.f32 %v2769_v1, 0.0  ;;  %v332_v0 = vld [vmem:[#allocation2 + $0x940] sm:$0x3f] }
 0x16b   :  { %v3162_v19 = vmax.f32 %v2770_v10, 0.0  ;;  %v3163_v20 = vmax.f32 %v2771_v11, 0.0  ;;  %v3164_v21 = vmax.f32 %v2772_v12, 0.0  ;;  %v3165_v22 = vmax.f32 %v2773_v13, 0.0  ;;  %v333_v1 = vld [vmem:[#allocation2 + $0x948] sm:$0x3f] }
 0x16c   :  { %v3550_v26 = vmin.f32 %v3158_v14, 1.0  ;;  %v3551_v27 = vmin.f32 %v3159_v15, 1.0  ;;  %v3552_v28 = vmin.f32 %v3160_v16, 1.0  ;;  %v3553_v29 = vmin.f32 %v3161_v17, 1.0  ;;  %v334_v10 = vld [vmem:[#allocation2 + $0x950] sm:$0x3f] }
 0x16d   :  { %v3554_v31 = vmin.f32 %v3162_v19, 1.0  ;;  %v3555_v32 = vmin.f32 %v3163_v20, 1.0  ;;  %v3556_v33 = vmin.f32 %v3164_v21, 1.0  ;;  %v3557_v34 = vmin.f32 %v3165_v22, 1.0  ;;  %v335_v15 = vld [vmem:[#allocation2 + $0x958] sm:$0x3f] }
 0x16e   :  { %3942 = vst [vmem:[#allocation7 + $0x8c0] sm:$0x3f] %v3550_v26  ;;  %3943 = vst [vmem:[#allocation7 + $0x8c8] sm:$0x3f] %v3551_v27  ;;  %v1681_v36 = vrot.slane %v464_v18, %v4187_v2  ;;  %v1685_v37 = vrot.slane %v464_v18, %v4189_v3  ;;  %v1689_v38 = vrot.slane %v464_v18, %v4191_v4  ;;  %v336_v20 = vld [vmem:[#allocation2 + $0x960] sm:$0x3f] }
 0x16f   :  { %3944 = vst [vmem:[#allocation7 + $0x8d0] sm:$0x3f] %v3552_v28  ;;  %3945 = vst [vmem:[#allocation7 + $0x8d8] sm:$0x3f] %v3553_v29  ;;  %v1693_v39 = vrot.slane %v464_v18, %v4193_v5  ;;  %v1697_v43 = vrot.slane %v464_v18, %v4195_v6  ;;  %v1701_v44 = vrot.slane %v464_v18, %v4197_v7  ;;  %v338_v26 = vld [vmem:[#allocation2 + $0x970] sm:$0x3f] }
 0x170   :  { %3946 = vst [vmem:[#allocation7 + $0x8e0] sm:$0x3f] %v3554_v31  ;;  %3947 = vst [vmem:[#allocation7 + $0x8e8] sm:$0x3f] %v3555_v32  ;;  %v1705_v45 = vrot.slane %v464_v18, %v4199_v8  ;;  %v1709_v46 = vrot.slane %v464_v18, %v4201_v9  ;;  %v2774_v47 = vadd.f32 %v1681_v36, %v324_v23  ;;  %v339_v27 = vld [vmem:[#allocation2 + $0x978] sm:$0x3f] }
 0x171   :  { %3948 = vst [vmem:[#allocation7 + $0x8f0] sm:$0x3f] %v3556_v33  ;;  %3949 = vst [vmem:[#allocation7 + $0x8f8] sm:$0x3f] %v3557_v34  ;;  %v2775_v48 = vadd.f32 %v1685_v37, %v325_v24  ;;  %v2776_v49 = vadd.f32 %v1689_v38, %v326_v25  ;;  %v2777_v50 = vadd.f32 %v1693_v39, %v327_v30  ;;  %v337_v25 = vld [vmem:[#allocation2 + $0x968] sm:$0x3f] }
 0x172   :  { %v2778_v51 = vadd.f32 %v1697_v43, %v328_v35  ;;  %v2779_v52 = vadd.f32 %v1701_v44, %v329_v40  ;;  %v2780_v53 = vadd.f32 %v1705_v45, %v330_v41  ;;  %v2781_v54 = vadd.f32 %v1709_v46, %v331_v42  ;;  %v466_v44 = vld [vmem:[#allocation5 + $0x130] sm:$0xff] }
 0x173   :  { %v3166_v55 = vmax.f32 %v2774_v47, 0.0  ;;  %v3167_v56 = vmax.f32 %v2775_v48, 0.0  ;;  %v3168_v57 = vmax.f32 %v2776_v49, 0.0  ;;  %v3169_v58 = vmax.f32 %v2777_v50, 0.0  ;;  %v340_v49 = vld [vmem:[#allocation2 + $0x980] sm:$0x3f] }
 0x174   :  { %v3170_v60 = vmax.f32 %v2778_v51, 0.0  ;;  %v3171_v61 = vmax.f32 %v2779_v52, 0.0  ;;  %v3172_v62 = vmax.f32 %v2780_v53, 0.0  ;;  %v3173_v63 = vmax.f32 %v2781_v54, 0.0  ;;  %v341_v50 = vld [vmem:[#allocation2 + $0x988] sm:$0x3f] }
 0x175   :  { %v3558_v11 = vmin.f32 %v3166_v55, 1.0  ;;  %v3559_v12 = vmin.f32 %v3167_v56, 1.0  ;;  %v3560_v13 = vmin.f32 %v3168_v57, 1.0  ;;  %v3561_v14 = vmin.f32 %v3169_v58, 1.0  ;;  %v342_v51 = vld [vmem:[#allocation2 + $0x990] sm:$0x3f] }
 0x176   :  { %v3562_v16 = vmin.f32 %v3170_v60, 1.0  ;;  %v3563_v17 = vmin.f32 %v3171_v61, 1.0  ;;  %v3564_v18 = vmin.f32 %v3172_v62, 1.0  ;;  %v3565_v19 = vmin.f32 %v3173_v63, 1.0  ;;  %v343_v56 = vld [vmem:[#allocation2 + $0x998] sm:$0x3f] }
 0x177   :  { %3950 = vst [vmem:[#allocation7 + $0x900] sm:$0x3f] %v3558_v11  ;;  %3951 = vst [vmem:[#allocation7 + $0x908] sm:$0x3f] %v3559_v12  ;;  %v1713_v21 = vrot.slane %v465_v59, %v4187_v2  ;;  %v1717_v22 = vrot.slane %v465_v59, %v4189_v3  ;;  %v1721_v23 = vrot.slane %v465_v59, %v4191_v4  ;;  %v344_v61 = vld [vmem:[#allocation2 + $0x9a0] sm:$0x3f] }
 0x178   :  { %3952 = vst [vmem:[#allocation7 + $0x910] sm:$0x3f] %v3560_v13  ;;  %3953 = vst [vmem:[#allocation7 + $0x918] sm:$0x3f] %v3561_v14  ;;  %v1725_v24 = vrot.slane %v465_v59, %v4193_v5  ;;  %v1729_v28 = vrot.slane %v465_v59, %v4195_v6  ;;  %v1733_v29 = vrot.slane %v465_v59, %v4197_v7  ;;  %v346_v11 = vld [vmem:[#allocation2 + $0x9b0] sm:$0x3f] }
 0x179   :  { %3954 = vst [vmem:[#allocation7 + $0x920] sm:$0x3f] %v3562_v16  ;;  %3955 = vst [vmem:[#allocation7 + $0x928] sm:$0x3f] %v3563_v17  ;;  %v1737_v30 = vrot.slane %v465_v59, %v4199_v8  ;;  %v1741_v31 = vrot.slane %v465_v59, %v4201_v9  ;;  %v2782_v32 = vadd.f32 %v1713_v21, %v332_v0  ;;  %v347_v12 = vld [vmem:[#allocation2 + $0x9b8] sm:$0x3f] }
 0x17a   :  { %3956 = vst [vmem:[#allocation7 + $0x930] sm:$0x3f] %v3564_v18  ;;  %3957 = vst [vmem:[#allocation7 + $0x938] sm:$0x3f] %v3565_v19  ;;  %v2783_v33 = vadd.f32 %v1717_v22, %v333_v1  ;;  %v2784_v34 = vadd.f32 %v1721_v23, %v334_v10  ;;  %v2785_v35 = vadd.f32 %v1725_v24, %v335_v15  ;;  %v345_v10 = vld [vmem:[#allocation2 + $0x9a8] sm:$0x3f] }
 0x17b   :  { %v2786_v36 = vadd.f32 %v1729_v28, %v336_v20  ;;  %v2787_v37 = vadd.f32 %v1733_v29, %v337_v25  ;;  %v2788_v38 = vadd.f32 %v1737_v30, %v338_v26  ;;  %v2789_v39 = vadd.f32 %v1741_v31, %v339_v27  ;;  %v467_v29 = vld [vmem:[#allocation5 + $0x138] sm:$0xff] }
 0x17c   :  { %v3174_v40 = vmax.f32 %v2782_v32, 0.0  ;;  %v3175_v41 = vmax.f32 %v2783_v33, 0.0  ;;  %v3176_v42 = vmax.f32 %v2784_v34, 0.0  ;;  %v3177_v43 = vmax.f32 %v2785_v35, 0.0  ;;  %v348_v34 = vld [vmem:[#allocation2 + $0x9c0] sm:$0x3f] }
 0x17d   :  { %v3178_v45 = vmax.f32 %v2786_v36, 0.0  ;;  %v3179_v46 = vmax.f32 %v2787_v37, 0.0  ;;  %v3180_v47 = vmax.f32 %v2788_v38, 0.0  ;;  %v3181_v48 = vmax.f32 %v2789_v39, 0.0  ;;  %v349_v35 = vld [vmem:[#allocation2 + $0x9c8] sm:$0x3f] }
 0x17e   :  { %v3566_v52 = vmin.f32 %v3174_v40, 1.0  ;;  %v3567_v53 = vmin.f32 %v3175_v41, 1.0  ;;  %v3568_v54 = vmin.f32 %v3176_v42, 1.0  ;;  %v3569_v55 = vmin.f32 %v3177_v43, 1.0  ;;  %v350_v36 = vld [vmem:[#allocation2 + $0x9d0] sm:$0x3f] }
 0x17f   :  { %v3570_v57 = vmin.f32 %v3178_v45, 1.0  ;;  %v3571_v58 = vmin.f32 %v3179_v46, 1.0  ;;  %v3572_v59 = vmin.f32 %v3180_v47, 1.0  ;;  %v3573_v60 = vmin.f32 %v3181_v48, 1.0  ;;  %v351_v41 = vld [vmem:[#allocation2 + $0x9d8] sm:$0x3f] }
 0x180   :  { %3958 = vst [vmem:[#allocation7 + $0x940] sm:$0x3f] %v3566_v52  ;;  %3959 = vst [vmem:[#allocation7 + $0x948] sm:$0x3f] %v3567_v53  ;;  %v1745_v62 = vrot.slane %v466_v44, %v4187_v2  ;;  %v1749_v63 = vrot.slane %v466_v44, %v4189_v3  ;;  %v1753_v0 = vrot.slane %v466_v44, %v4191_v4  ;;  %v352_v46 = vld [vmem:[#allocation2 + $0x9e0] sm:$0x3f] }
 0x181   :  { %3960 = vst [vmem:[#allocation7 + $0x950] sm:$0x3f] %v3568_v54  ;;  %3961 = vst [vmem:[#allocation7 + $0x958] sm:$0x3f] %v3569_v55  ;;  %v1757_v1 = vrot.slane %v466_v44, %v4193_v5  ;;  %v1761_v13 = vrot.slane %v466_v44, %v4195_v6  ;;  %v1765_v14 = vrot.slane %v466_v44, %v4197_v7  ;;  %v354_v52 = vld [vmem:[#allocation2 + $0x9f0] sm:$0x3f] }
 0x182   :  { %3962 = vst [vmem:[#allocation7 + $0x960] sm:$0x3f] %v3570_v57  ;;  %3963 = vst [vmem:[#allocation7 + $0x968] sm:$0x3f] %v3571_v58  ;;  %v1769_v15 = vrot.slane %v466_v44, %v4199_v8  ;;  %v1773_v16 = vrot.slane %v466_v44, %v4201_v9  ;;  %v2790_v17 = vadd.f32 %v1745_v62, %v340_v49  ;;  %v355_v53 = vld [vmem:[#allocation2 + $0x9f8] sm:$0x3f] }
 0x183   :  { %3964 = vst [vmem:[#allocation7 + $0x970] sm:$0x3f] %v3572_v59  ;;  %3965 = vst [vmem:[#allocation7 + $0x978] sm:$0x3f] %v3573_v60  ;;  %v2791_v18 = vadd.f32 %v1749_v63, %v341_v50  ;;  %v2792_v19 = vadd.f32 %v1753_v0, %v342_v51  ;;  %v2793_v20 = vadd.f32 %v1757_v1, %v343_v56  ;;  %v353_v51 = vld [vmem:[#allocation2 + $0x9e8] sm:$0x3f] }
 0x184   :  { %v2794_v21 = vadd.f32 %v1761_v13, %v344_v61  ;;  %v2795_v22 = vadd.f32 %v1765_v14, %v345_v10  ;;  %v2796_v23 = vadd.f32 %v1769_v15, %v346_v11  ;;  %v2797_v24 = vadd.f32 %v1773_v16, %v347_v12  ;;  %v468_v14 = vld [vmem:[#allocation5 + $0x140] sm:$0xff] }
 0x185   :  { %v3182_v25 = vmax.f32 %v2790_v17, 0.0  ;;  %v3183_v26 = vmax.f32 %v2791_v18, 0.0  ;;  %v3184_v27 = vmax.f32 %v2792_v19, 0.0  ;;  %v3185_v28 = vmax.f32 %v2793_v20, 0.0  ;;  %v356_v19 = vld [vmem:[#allocation2 + $0xa00] sm:$0x3f] }
 0x186   :  { %v3186_v30 = vmax.f32 %v2794_v21, 0.0  ;;  %v3187_v31 = vmax.f32 %v2795_v22, 0.0  ;;  %v3188_v32 = vmax.f32 %v2796_v23, 0.0  ;;  %v3189_v33 = vmax.f32 %v2797_v24, 0.0  ;;  %v357_v20 = vld [vmem:[#allocation2 + $0xa08] sm:$0x3f] }
 0x187   :  { %v3574_v37 = vmin.f32 %v3182_v25, 1.0  ;;  %v3575_v38 = vmin.f32 %v3183_v26, 1.0  ;;  %v3576_v39 = vmin.f32 %v3184_v27, 1.0  ;;  %v3577_v40 = vmin.f32 %v3185_v28, 1.0  ;;  %v358_v21 = vld [vmem:[#allocation2 + $0xa10] sm:$0x3f] }
 0x188   :  { %v3578_v42 = vmin.f32 %v3186_v30, 1.0  ;;  %v3579_v43 = vmin.f32 %v3187_v31, 1.0  ;;  %v3580_v44 = vmin.f32 %v3188_v32, 1.0  ;;  %v3581_v45 = vmin.f32 %v3189_v33, 1.0  ;;  %v359_v26 = vld [vmem:[#allocation2 + $0xa18] sm:$0x3f] }
 0x189   :  { %3966 = vst [vmem:[#allocation7 + $0x980] sm:$0x3f] %v3574_v37  ;;  %3967 = vst [vmem:[#allocation7 + $0x988] sm:$0x3f] %v3575_v38  ;;  %v1777_v47 = vrot.slane %v467_v29, %v4187_v2  ;;  %v1781_v48 = vrot.slane %v467_v29, %v4189_v3  ;;  %v1785_v49 = vrot.slane %v467_v29, %v4191_v4  ;;  %v360_v31 = vld [vmem:[#allocation2 + $0xa20] sm:$0x3f] }
 0x18a   :  { %3968 = vst [vmem:[#allocation7 + $0x990] sm:$0x3f] %v3576_v39  ;;  %3969 = vst [vmem:[#allocation7 + $0x998] sm:$0x3f] %v3577_v40  ;;  %v1789_v50 = vrot.slane %v467_v29, %v4193_v5  ;;  %v1793_v54 = vrot.slane %v467_v29, %v4195_v6  ;;  %v1797_v55 = vrot.slane %v467_v29, %v4197_v7  ;;  %v362_v37 = vld [vmem:[#allocation2 + $0xa30] sm:$0x3f] }
 0x18b   :  { %3970 = vst [vmem:[#allocation7 + $0x9a0] sm:$0x3f] %v3578_v42  ;;  %3971 = vst [vmem:[#allocation7 + $0x9a8] sm:$0x3f] %v3579_v43  ;;  %v1801_v56 = vrot.slane %v467_v29, %v4199_v8  ;;  %v1805_v57 = vrot.slane %v467_v29, %v4201_v9  ;;  %v2798_v58 = vadd.f32 %v1777_v47, %v348_v34  ;;  %v363_v38 = vld [vmem:[#allocation2 + $0xa38] sm:$0x3f] }
 0x18c   :  { %3972 = vst [vmem:[#allocation7 + $0x9b0] sm:$0x3f] %v3580_v44  ;;  %3973 = vst [vmem:[#allocation7 + $0x9b8] sm:$0x3f] %v3581_v45  ;;  %v2799_v59 = vadd.f32 %v1781_v48, %v349_v35  ;;  %v2800_v60 = vadd.f32 %v1785_v49, %v350_v36  ;;  %v2801_v61 = vadd.f32 %v1789_v50, %v351_v41  ;;  %v361_v36 = vld [vmem:[#allocation2 + $0xa28] sm:$0x3f] }
 0x18d   :  { %v2802_v62 = vadd.f32 %v1793_v54, %v352_v46  ;;  %v2803_v63 = vadd.f32 %v1797_v55, %v353_v51  ;;  %v2804_v0 = vadd.f32 %v1801_v56, %v354_v52  ;;  %v2805_v1 = vadd.f32 %v1805_v57, %v355_v53  ;;  %v469_v55 = vld [vmem:[#allocation5 + $0x148] sm:$0xff] }
 0x18e   :  { %v3190_v10 = vmax.f32 %v2798_v58, 0.0  ;;  %v3191_v11 = vmax.f32 %v2799_v59, 0.0  ;;  %v3192_v12 = vmax.f32 %v2800_v60, 0.0  ;;  %v3193_v13 = vmax.f32 %v2801_v61, 0.0  ;;  %v364_v60 = vld [vmem:[#allocation2 + $0xa40] sm:$0x3f] }
 0x18f   :  { %v3194_v15 = vmax.f32 %v2802_v62, 0.0  ;;  %v3195_v16 = vmax.f32 %v2803_v63, 0.0  ;;  %v3196_v17 = vmax.f32 %v2804_v0, 0.0  ;;  %v3197_v18 = vmax.f32 %v2805_v1, 0.0  ;;  %v365_v61 = vld [vmem:[#allocation2 + $0xa48] sm:$0x3f] }
 0x190   :  { %v3582_v22 = vmin.f32 %v3190_v10, 1.0  ;;  %v3583_v23 = vmin.f32 %v3191_v11, 1.0  ;;  %v3584_v24 = vmin.f32 %v3192_v12, 1.0  ;;  %v3585_v25 = vmin.f32 %v3193_v13, 1.0  ;;  %v366_v62 = vld [vmem:[#allocation2 + $0xa50] sm:$0x3f] }
 0x191   :  { %v3586_v27 = vmin.f32 %v3194_v15, 1.0  ;;  %v3587_v28 = vmin.f32 %v3195_v16, 1.0  ;;  %v3588_v29 = vmin.f32 %v3196_v17, 1.0  ;;  %v3589_v30 = vmin.f32 %v3197_v18, 1.0  ;;  %v367_v11 = vld [vmem:[#allocation2 + $0xa58] sm:$0x3f] }
 0x192   :  { %3974 = vst [vmem:[#allocation7 + $0x9c0] sm:$0x3f] %v3582_v22  ;;  %3975 = vst [vmem:[#allocation7 + $0x9c8] sm:$0x3f] %v3583_v23  ;;  %v1809_v32 = vrot.slane %v468_v14, %v4187_v2  ;;  %v1813_v33 = vrot.slane %v468_v14, %v4189_v3  ;;  %v1817_v34 = vrot.slane %v468_v14, %v4191_v4  ;;  %v368_v16 = vld [vmem:[#allocation2 + $0xa60] sm:$0x3f] }
 0x193   :  { %3976 = vst [vmem:[#allocation7 + $0x9d0] sm:$0x3f] %v3584_v24  ;;  %3977 = vst [vmem:[#allocation7 + $0x9d8] sm:$0x3f] %v3585_v25  ;;  %v1821_v35 = vrot.slane %v468_v14, %v4193_v5  ;;  %v1825_v39 = vrot.slane %v468_v14, %v4195_v6  ;;  %v1829_v40 = vrot.slane %v468_v14, %v4197_v7  ;;  %v370_v22 = vld [vmem:[#allocation2 + $0xa70] sm:$0x3f] }
 0x194   :  { %3978 = vst [vmem:[#allocation7 + $0x9e0] sm:$0x3f] %v3586_v27  ;;  %3979 = vst [vmem:[#allocation7 + $0x9e8] sm:$0x3f] %v3587_v28  ;;  %v1833_v41 = vrot.slane %v468_v14, %v4199_v8  ;;  %v1837_v42 = vrot.slane %v468_v14, %v4201_v9  ;;  %v2806_v43 = vadd.f32 %v1809_v32, %v356_v19  ;;  %v371_v23 = vld [vmem:[#allocation2 + $0xa78] sm:$0x3f] }
 0x195   :  { %3980 = vst [vmem:[#allocation7 + $0x9f0] sm:$0x3f] %v3588_v29  ;;  %3981 = vst [vmem:[#allocation7 + $0x9f8] sm:$0x3f] %v3589_v30  ;;  %v2807_v44 = vadd.f32 %v1813_v33, %v357_v20  ;;  %v2808_v45 = vadd.f32 %v1817_v34, %v358_v21  ;;  %v2809_v46 = vadd.f32 %v1821_v35, %v359_v26  ;;  %v369_v21 = vld [vmem:[#allocation2 + $0xa68] sm:$0x3f] }
 0x196   :  { %v2810_v47 = vadd.f32 %v1825_v39, %v360_v31  ;;  %v2811_v48 = vadd.f32 %v1829_v40, %v361_v36  ;;  %v2812_v49 = vadd.f32 %v1833_v41, %v362_v37  ;;  %v2813_v50 = vadd.f32 %v1837_v42, %v363_v38  ;;  %v470_v40 = vld [vmem:[#allocation5 + $0x150] sm:$0xff] }
 0x197   :  { %v3198_v51 = vmax.f32 %v2806_v43, 0.0  ;;  %v3199_v52 = vmax.f32 %v2807_v44, 0.0  ;;  %v3200_v53 = vmax.f32 %v2808_v45, 0.0  ;;  %v3201_v54 = vmax.f32 %v2809_v46, 0.0  ;;  %v372_v45 = vld [vmem:[#allocation2 + $0xa80] sm:$0x3f] }
 0x198   :  { %v3202_v56 = vmax.f32 %v2810_v47, 0.0  ;;  %v3203_v57 = vmax.f32 %v2811_v48, 0.0  ;;  %v3204_v58 = vmax.f32 %v2812_v49, 0.0  ;;  %v3205_v59 = vmax.f32 %v2813_v50, 0.0  ;;  %v373_v46 = vld [vmem:[#allocation2 + $0xa88] sm:$0x3f] }
 0x199   :  { %v3590_v63 = vmin.f32 %v3198_v51, 1.0  ;;  %v3591_v0 = vmin.f32 %v3199_v52, 1.0  ;;  %v3592_v1 = vmin.f32 %v3200_v53, 1.0  ;;  %v3593_v10 = vmin.f32 %v3201_v54, 1.0  ;;  %v374_v47 = vld [vmem:[#allocation2 + $0xa90] sm:$0x3f] }
 0x19a   :  { %v3594_v12 = vmin.f32 %v3202_v56, 1.0  ;;  %v3595_v13 = vmin.f32 %v3203_v57, 1.0  ;;  %v3596_v14 = vmin.f32 %v3204_v58, 1.0  ;;  %v3597_v15 = vmin.f32 %v3205_v59, 1.0  ;;  %v375_v52 = vld [vmem:[#allocation2 + $0xa98] sm:$0x3f] }
 0x19b   :  { %3982 = vst [vmem:[#allocation7 + $0xa00] sm:$0x3f] %v3590_v63  ;;  %3983 = vst [vmem:[#allocation7 + $0xa08] sm:$0x3f] %v3591_v0  ;;  %v1841_v17 = vrot.slane %v469_v55, %v4187_v2  ;;  %v1845_v18 = vrot.slane %v469_v55, %v4189_v3  ;;  %v1849_v19 = vrot.slane %v469_v55, %v4191_v4  ;;  %v376_v57 = vld [vmem:[#allocation2 + $0xaa0] sm:$0x3f] }
 0x19c   :  { %3984 = vst [vmem:[#allocation7 + $0xa10] sm:$0x3f] %v3592_v1  ;;  %3985 = vst [vmem:[#allocation7 + $0xa18] sm:$0x3f] %v3593_v10  ;;  %v1853_v20 = vrot.slane %v469_v55, %v4193_v5  ;;  %v1857_v24 = vrot.slane %v469_v55, %v4195_v6  ;;  %v1861_v25 = vrot.slane %v469_v55, %v4197_v7  ;;  %v378_v63 = vld [vmem:[#allocation2 + $0xab0] sm:$0x3f] }
 0x19d   :  { %3986 = vst [vmem:[#allocation7 + $0xa20] sm:$0x3f] %v3594_v12  ;;  %3987 = vst [vmem:[#allocation7 + $0xa28] sm:$0x3f] %v3595_v13  ;;  %v1865_v26 = vrot.slane %v469_v55, %v4199_v8  ;;  %v1869_v27 = vrot.slane %v469_v55, %v4201_v9  ;;  %v2814_v28 = vadd.f32 %v1841_v17, %v364_v60  ;;  %v379_v0 = vld [vmem:[#allocation2 + $0xab8] sm:$0x3f] }
 0x19e   :  { %3988 = vst [vmem:[#allocation7 + $0xa30] sm:$0x3f] %v3596_v14  ;;  %3989 = vst [vmem:[#allocation7 + $0xa38] sm:$0x3f] %v3597_v15  ;;  %v2815_v29 = vadd.f32 %v1845_v18, %v365_v61  ;;  %v2816_v30 = vadd.f32 %v1849_v19, %v366_v62  ;;  %v2817_v31 = vadd.f32 %v1853_v20, %v367_v11  ;;  %v377_v62 = vld [vmem:[#allocation2 + $0xaa8] sm:$0x3f] }
 0x19f   :  { %v2818_v32 = vadd.f32 %v1857_v24, %v368_v16  ;;  %v2819_v33 = vadd.f32 %v1861_v25, %v369_v21  ;;  %v2820_v34 = vadd.f32 %v1865_v26, %v370_v22  ;;  %v2821_v35 = vadd.f32 %v1869_v27, %v371_v23  ;;  %v471_v25 = vld [vmem:[#allocation5 + $0x158] sm:$0xff] }
 0x1a0   :  { %v3206_v36 = vmax.f32 %v2814_v28, 0.0  ;;  %v3207_v37 = vmax.f32 %v2815_v29, 0.0  ;;  %v3208_v38 = vmax.f32 %v2816_v30, 0.0  ;;  %v3209_v39 = vmax.f32 %v2817_v31, 0.0  ;;  %v380_v30 = vld [vmem:[#allocation2 + $0xac0] sm:$0x3f] }
 0x1a1   :  { %v3210_v41 = vmax.f32 %v2818_v32, 0.0  ;;  %v3211_v42 = vmax.f32 %v2819_v33, 0.0  ;;  %v3212_v43 = vmax.f32 %v2820_v34, 0.0  ;;  %v3213_v44 = vmax.f32 %v2821_v35, 0.0  ;;  %v381_v31 = vld [vmem:[#allocation2 + $0xac8] sm:$0x3f] }
 0x1a2   :  { %v3598_v48 = vmin.f32 %v3206_v36, 1.0  ;;  %v3599_v49 = vmin.f32 %v3207_v37, 1.0  ;;  %v3600_v50 = vmin.f32 %v3208_v38, 1.0  ;;  %v3601_v51 = vmin.f32 %v3209_v39, 1.0  ;;  %v382_v32 = vld [vmem:[#allocation2 + $0xad0] sm:$0x3f] }
 0x1a3   :  { %v3602_v53 = vmin.f32 %v3210_v41, 1.0  ;;  %v3603_v54 = vmin.f32 %v3211_v42, 1.0  ;;  %v3604_v55 = vmin.f32 %v3212_v43, 1.0  ;;  %v3605_v56 = vmin.f32 %v3213_v44, 1.0  ;;  %v383_v37 = vld [vmem:[#allocation2 + $0xad8] sm:$0x3f] }
 0x1a4   :  { %3990 = vst [vmem:[#allocation7 + $0xa40] sm:$0x3f] %v3598_v48  ;;  %3991 = vst [vmem:[#allocation7 + $0xa48] sm:$0x3f] %v3599_v49  ;;  %v1873_v58 = vrot.slane %v470_v40, %v4187_v2  ;;  %v1877_v59 = vrot.slane %v470_v40, %v4189_v3  ;;  %v1881_v60 = vrot.slane %v470_v40, %v4191_v4  ;;  %v384_v42 = vld [vmem:[#allocation2 + $0xae0] sm:$0x3f] }
 0x1a5   :  { %3992 = vst [vmem:[#allocation7 + $0xa50] sm:$0x3f] %v3600_v50  ;;  %3993 = vst [vmem:[#allocation7 + $0xa58] sm:$0x3f] %v3601_v51  ;;  %v1885_v61 = vrot.slane %v470_v40, %v4193_v5  ;;  %v1889_v1 = vrot.slane %v470_v40, %v4195_v6  ;;  %v1893_v10 = vrot.slane %v470_v40, %v4197_v7  ;;  %v386_v48 = vld [vmem:[#allocation2 + $0xaf0] sm:$0x3f] }
 0x1a6   :  { %3994 = vst [vmem:[#allocation7 + $0xa60] sm:$0x3f] %v3602_v53  ;;  %3995 = vst [vmem:[#allocation7 + $0xa68] sm:$0x3f] %v3603_v54  ;;  %v1897_v11 = vrot.slane %v470_v40, %v4199_v8  ;;  %v1901_v12 = vrot.slane %v470_v40, %v4201_v9  ;;  %v2822_v13 = vadd.f32 %v1873_v58, %v372_v45  ;;  %v387_v49 = vld [vmem:[#allocation2 + $0xaf8] sm:$0x3f] }
 0x1a7   :  { %3996 = vst [vmem:[#allocation7 + $0xa70] sm:$0x3f] %v3604_v55  ;;  %3997 = vst [vmem:[#allocation7 + $0xa78] sm:$0x3f] %v3605_v56  ;;  %v2823_v14 = vadd.f32 %v1877_v59, %v373_v46  ;;  %v2824_v15 = vadd.f32 %v1881_v60, %v374_v47  ;;  %v2825_v16 = vadd.f32 %v1885_v61, %v375_v52  ;;  %v385_v47 = vld [vmem:[#allocation2 + $0xae8] sm:$0x3f] }
 0x1a8   :  { %v2826_v17 = vadd.f32 %v1889_v1, %v376_v57  ;;  %v2827_v18 = vadd.f32 %v1893_v10, %v377_v62  ;;  %v2828_v19 = vadd.f32 %v1897_v11, %v378_v63  ;;  %v2829_v20 = vadd.f32 %v1901_v12, %v379_v0  ;;  %v472_v10 = vld [vmem:[#allocation5 + $0x160] sm:$0xff] }
 0x1a9   :  { %v3214_v21 = vmax.f32 %v2822_v13, 0.0  ;;  %v3215_v22 = vmax.f32 %v2823_v14, 0.0  ;;  %v3216_v23 = vmax.f32 %v2824_v15, 0.0  ;;  %v3217_v24 = vmax.f32 %v2825_v16, 0.0  ;;  %v388_v15 = vld [vmem:[#allocation2 + $0xb00] sm:$0x3f] }
 0x1aa   :  { %v3218_v26 = vmax.f32 %v2826_v17, 0.0  ;;  %v3219_v27 = vmax.f32 %v2827_v18, 0.0  ;;  %v3220_v28 = vmax.f32 %v2828_v19, 0.0  ;;  %v3221_v29 = vmax.f32 %v2829_v20, 0.0  ;;  %v389_v16 = vld [vmem:[#allocation2 + $0xb08] sm:$0x3f] }
 0x1ab   :  { %v3606_v33 = vmin.f32 %v3214_v21, 1.0  ;;  %v3607_v34 = vmin.f32 %v3215_v22, 1.0  ;;  %v3608_v35 = vmin.f32 %v3216_v23, 1.0  ;;  %v3609_v36 = vmin.f32 %v3217_v24, 1.0  ;;  %v390_v17 = vld [vmem:[#allocation2 + $0xb10] sm:$0x3f] }
 0x1ac   :  { %v3610_v38 = vmin.f32 %v3218_v26, 1.0  ;;  %v3611_v39 = vmin.f32 %v3219_v27, 1.0  ;;  %v3612_v40 = vmin.f32 %v3220_v28, 1.0  ;;  %v3613_v41 = vmin.f32 %v3221_v29, 1.0  ;;  %v391_v22 = vld [vmem:[#allocation2 + $0xb18] sm:$0x3f] }
 0x1ad   :  { %3998 = vst [vmem:[#allocation7 + $0xa80] sm:$0x3f] %v3606_v33  ;;  %3999 = vst [vmem:[#allocation7 + $0xa88] sm:$0x3f] %v3607_v34  ;;  %v1905_v43 = vrot.slane %v471_v25, %v4187_v2  ;;  %v1909_v44 = vrot.slane %v471_v25, %v4189_v3  ;;  %v1913_v45 = vrot.slane %v471_v25, %v4191_v4  ;;  %v392_v27 = vld [vmem:[#allocation2 + $0xb20] sm:$0x3f] }
 0x1ae   :  { %4000 = vst [vmem:[#allocation7 + $0xa90] sm:$0x3f] %v3608_v35  ;;  %4001 = vst [vmem:[#allocation7 + $0xa98] sm:$0x3f] %v3609_v36  ;;  %v1917_v46 = vrot.slane %v471_v25, %v4193_v5  ;;  %v1921_v50 = vrot.slane %v471_v25, %v4195_v6  ;;  %v1925_v51 = vrot.slane %v471_v25, %v4197_v7  ;;  %v394_v33 = vld [vmem:[#allocation2 + $0xb30] sm:$0x3f] }
 0x1af   :  { %4002 = vst [vmem:[#allocation7 + $0xaa0] sm:$0x3f] %v3610_v38  ;;  %4003 = vst [vmem:[#allocation7 + $0xaa8] sm:$0x3f] %v3611_v39  ;;  %v1929_v52 = vrot.slane %v471_v25, %v4199_v8  ;;  %v1933_v53 = vrot.slane %v471_v25, %v4201_v9  ;;  %v2830_v54 = vadd.f32 %v1905_v43, %v380_v30  ;;  %v395_v34 = vld [vmem:[#allocation2 + $0xb38] sm:$0x3f] }
 0x1b0   :  { %4004 = vst [vmem:[#allocation7 + $0xab0] sm:$0x3f] %v3612_v40  ;;  %4005 = vst [vmem:[#allocation7 + $0xab8] sm:$0x3f] %v3613_v41  ;;  %v2831_v55 = vadd.f32 %v1909_v44, %v381_v31  ;;  %v2832_v56 = vadd.f32 %v1913_v45, %v382_v32  ;;  %v2833_v57 = vadd.f32 %v1917_v46, %v383_v37  ;;  %v393_v32 = vld [vmem:[#allocation2 + $0xb28] sm:$0x3f] }
 0x1b1   :  { %v2834_v58 = vadd.f32 %v1921_v50, %v384_v42  ;;  %v2835_v59 = vadd.f32 %v1925_v51, %v385_v47  ;;  %v2836_v60 = vadd.f32 %v1929_v52, %v386_v48  ;;  %v2837_v61 = vadd.f32 %v1933_v53, %v387_v49  ;;  %v473_v51 = vld [vmem:[#allocation5 + $0x168] sm:$0xff] }
 0x1b2   :  { %v3222_v62 = vmax.f32 %v2830_v54, 0.0  ;;  %v3223_v63 = vmax.f32 %v2831_v55, 0.0  ;;  %v3224_v0 = vmax.f32 %v2832_v56, 0.0  ;;  %v3225_v1 = vmax.f32 %v2833_v57, 0.0  ;;  %v396_v56 = vld [vmem:[#allocation2 + $0xb40] sm:$0x3f] }
 0x1b3   :  { %v3226_v11 = vmax.f32 %v2834_v58, 0.0  ;;  %v3227_v12 = vmax.f32 %v2835_v59, 0.0  ;;  %v3228_v13 = vmax.f32 %v2836_v60, 0.0  ;;  %v3229_v14 = vmax.f32 %v2837_v61, 0.0  ;;  %v397_v57 = vld [vmem:[#allocation2 + $0xb48] sm:$0x3f] }
 0x1b4   :  { %v3614_v18 = vmin.f32 %v3222_v62, 1.0  ;;  %v3615_v19 = vmin.f32 %v3223_v63, 1.0  ;;  %v3616_v20 = vmin.f32 %v3224_v0, 1.0  ;;  %v3617_v21 = vmin.f32 %v3225_v1, 1.0  ;;  %v398_v58 = vld [vmem:[#allocation2 + $0xb50] sm:$0x3f] }
 0x1b5   :  { %v3618_v23 = vmin.f32 %v3226_v11, 1.0  ;;  %v3619_v24 = vmin.f32 %v3227_v12, 1.0  ;;  %v3620_v25 = vmin.f32 %v3228_v13, 1.0  ;;  %v3621_v26 = vmin.f32 %v3229_v14, 1.0  ;;  %v399_v63 = vld [vmem:[#allocation2 + $0xb58] sm:$0x3f] }
 0x1b6   :  { %4006 = vst [vmem:[#allocation7 + $0xac0] sm:$0x3f] %v3614_v18  ;;  %4007 = vst [vmem:[#allocation7 + $0xac8] sm:$0x3f] %v3615_v19  ;;  %v1937_v28 = vrot.slane %v472_v10, %v4187_v2  ;;  %v1941_v29 = vrot.slane %v472_v10, %v4189_v3  ;;  %v1945_v30 = vrot.slane %v472_v10, %v4191_v4  ;;  %v400_v12 = vld [vmem:[#allocation2 + $0xb60] sm:$0x3f] }
 0x1b7   :  { %4008 = vst [vmem:[#allocation7 + $0xad0] sm:$0x3f] %v3616_v20  ;;  %4009 = vst [vmem:[#allocation7 + $0xad8] sm:$0x3f] %v3617_v21  ;;  %v1949_v31 = vrot.slane %v472_v10, %v4193_v5  ;;  %v1953_v35 = vrot.slane %v472_v10, %v4195_v6  ;;  %v1957_v36 = vrot.slane %v472_v10, %v4197_v7  ;;  %v402_v18 = vld [vmem:[#allocation2 + $0xb70] sm:$0x3f] }
 0x1b8   :  { %4010 = vst [vmem:[#allocation7 + $0xae0] sm:$0x3f] %v3618_v23  ;;  %4011 = vst [vmem:[#allocation7 + $0xae8] sm:$0x3f] %v3619_v24  ;;  %v1961_v37 = vrot.slane %v472_v10, %v4199_v8  ;;  %v1965_v38 = vrot.slane %v472_v10, %v4201_v9  ;;  %v2838_v39 = vadd.f32 %v1937_v28, %v388_v15  ;;  %v403_v19 = vld [vmem:[#allocation2 + $0xb78] sm:$0x3f] }
 0x1b9   :  { %4012 = vst [vmem:[#allocation7 + $0xaf0] sm:$0x3f] %v3620_v25  ;;  %4013 = vst [vmem:[#allocation7 + $0xaf8] sm:$0x3f] %v3621_v26  ;;  %v2839_v40 = vadd.f32 %v1941_v29, %v389_v16  ;;  %v2840_v41 = vadd.f32 %v1945_v30, %v390_v17  ;;  %v2841_v42 = vadd.f32 %v1949_v31, %v391_v22  ;;  %v401_v17 = vld [vmem:[#allocation2 + $0xb68] sm:$0x3f] }
 0x1ba   :  { %v2842_v43 = vadd.f32 %v1953_v35, %v392_v27  ;;  %v2843_v44 = vadd.f32 %v1957_v36, %v393_v32  ;;  %v2844_v45 = vadd.f32 %v1961_v37, %v394_v33  ;;  %v2845_v46 = vadd.f32 %v1965_v38, %v395_v34  ;;  %v474_v36 = vld [vmem:[#allocation5 + $0x170] sm:$0xff] }
 0x1bb   :  { %v3230_v47 = vmax.f32 %v2838_v39, 0.0  ;;  %v3231_v48 = vmax.f32 %v2839_v40, 0.0  ;;  %v3232_v49 = vmax.f32 %v2840_v41, 0.0  ;;  %v3233_v50 = vmax.f32 %v2841_v42, 0.0  ;;  %v404_v41 = vld [vmem:[#allocation2 + $0xb80] sm:$0x3f] }
 0x1bc   :  { %v3234_v52 = vmax.f32 %v2842_v43, 0.0  ;;  %v3235_v53 = vmax.f32 %v2843_v44, 0.0  ;;  %v3236_v54 = vmax.f32 %v2844_v45, 0.0  ;;  %v3237_v55 = vmax.f32 %v2845_v46, 0.0  ;;  %v405_v42 = vld [vmem:[#allocation2 + $0xb88] sm:$0x3f] }
 0x1bd   :  { %v3622_v59 = vmin.f32 %v3230_v47, 1.0  ;;  %v3623_v60 = vmin.f32 %v3231_v48, 1.0  ;;  %v3624_v61 = vmin.f32 %v3232_v49, 1.0  ;;  %v3625_v62 = vmin.f32 %v3233_v50, 1.0  ;;  %v406_v43 = vld [vmem:[#allocation2 + $0xb90] sm:$0x3f] }
 0x1be   :  { %v3626_v0 = vmin.f32 %v3234_v52, 1.0  ;;  %v3627_v1 = vmin.f32 %v3235_v53, 1.0  ;;  %v3628_v10 = vmin.f32 %v3236_v54, 1.0  ;;  %v3629_v11 = vmin.f32 %v3237_v55, 1.0  ;;  %v407_v48 = vld [vmem:[#allocation2 + $0xb98] sm:$0x3f] }
 0x1bf   :  { %4014 = vst [vmem:[#allocation7 + $0xb00] sm:$0x3f] %v3622_v59  ;;  %4015 = vst [vmem:[#allocation7 + $0xb08] sm:$0x3f] %v3623_v60  ;;  %v1969_v13 = vrot.slane %v473_v51, %v4187_v2  ;;  %v1973_v14 = vrot.slane %v473_v51, %v4189_v3  ;;  %v1977_v15 = vrot.slane %v473_v51, %v4191_v4  ;;  %v408_v53 = vld [vmem:[#allocation2 + $0xba0] sm:$0x3f] }
 0x1c0   :  { %4016 = vst [vmem:[#allocation7 + $0xb10] sm:$0x3f] %v3624_v61  ;;  %4017 = vst [vmem:[#allocation7 + $0xb18] sm:$0x3f] %v3625_v62  ;;  %v1981_v16 = vrot.slane %v473_v51, %v4193_v5  ;;  %v1985_v20 = vrot.slane %v473_v51, %v4195_v6  ;;  %v1989_v21 = vrot.slane %v473_v51, %v4197_v7  ;;  %v410_v59 = vld [vmem:[#allocation2 + $0xbb0] sm:$0x3f] }
 0x1c1   :  { %4018 = vst [vmem:[#allocation7 + $0xb20] sm:$0x3f] %v3626_v0  ;;  %4019 = vst [vmem:[#allocation7 + $0xb28] sm:$0x3f] %v3627_v1  ;;  %v1993_v22 = vrot.slane %v473_v51, %v4199_v8  ;;  %v1997_v23 = vrot.slane %v473_v51, %v4201_v9  ;;  %v2846_v24 = vadd.f32 %v1969_v13, %v396_v56  ;;  %v411_v60 = vld [vmem:[#allocation2 + $0xbb8] sm:$0x3f] }
 0x1c2   :  { %4020 = vst [vmem:[#allocation7 + $0xb30] sm:$0x3f] %v3628_v10  ;;  %4021 = vst [vmem:[#allocation7 + $0xb38] sm:$0x3f] %v3629_v11  ;;  %v2847_v25 = vadd.f32 %v1973_v14, %v397_v57  ;;  %v2848_v26 = vadd.f32 %v1977_v15, %v398_v58  ;;  %v2849_v27 = vadd.f32 %v1981_v16, %v399_v63  ;;  %v409_v58 = vld [vmem:[#allocation2 + $0xba8] sm:$0x3f] }
 0x1c3   :  { %v2850_v28 = vadd.f32 %v1985_v20, %v400_v12  ;;  %v2851_v29 = vadd.f32 %v1989_v21, %v401_v17  ;;  %v2852_v30 = vadd.f32 %v1993_v22, %v402_v18  ;;  %v2853_v31 = vadd.f32 %v1997_v23, %v403_v19  ;;  %v475_v21 = vld [vmem:[#allocation5 + $0x178] sm:$0xff] }
 0x1c4   :  { %v3238_v32 = vmax.f32 %v2846_v24, 0.0  ;;  %v3239_v33 = vmax.f32 %v2847_v25, 0.0  ;;  %v3240_v34 = vmax.f32 %v2848_v26, 0.0  ;;  %v3241_v35 = vmax.f32 %v2849_v27, 0.0  ;;  %v412_v26 = vld [vmem:[#allocation2 + $0xbc0] sm:$0x3f] }
 0x1c5   :  { %v3242_v37 = vmax.f32 %v2850_v28, 0.0  ;;  %v3243_v38 = vmax.f32 %v2851_v29, 0.0  ;;  %v3244_v39 = vmax.f32 %v2852_v30, 0.0  ;;  %v3245_v40 = vmax.f32 %v2853_v31, 0.0  ;;  %v413_v27 = vld [vmem:[#allocation2 + $0xbc8] sm:$0x3f] }
 0x1c6   :  { %v3630_v44 = vmin.f32 %v3238_v32, 1.0  ;;  %v3631_v45 = vmin.f32 %v3239_v33, 1.0  ;;  %v3632_v46 = vmin.f32 %v3240_v34, 1.0  ;;  %v3633_v47 = vmin.f32 %v3241_v35, 1.0  ;;  %v414_v28 = vld [vmem:[#allocation2 + $0xbd0] sm:$0x3f] }
 0x1c7   :  { %v3634_v49 = vmin.f32 %v3242_v37, 1.0  ;;  %v3635_v50 = vmin.f32 %v3243_v38, 1.0  ;;  %v3636_v51 = vmin.f32 %v3244_v39, 1.0  ;;  %v3637_v52 = vmin.f32 %v3245_v40, 1.0  ;;  %v415_v33 = vld [vmem:[#allocation2 + $0xbd8] sm:$0x3f] }
 0x1c8   :  { %4022 = vst [vmem:[#allocation7 + $0xb40] sm:$0x3f] %v3630_v44  ;;  %4023 = vst [vmem:[#allocation7 + $0xb48] sm:$0x3f] %v3631_v45  ;;  %v2001_v54 = vrot.slane %v474_v36, %v4187_v2  ;;  %v2005_v55 = vrot.slane %v474_v36, %v4189_v3  ;;  %v2009_v56 = vrot.slane %v474_v36, %v4191_v4  ;;  %v416_v38 = vld [vmem:[#allocation2 + $0xbe0] sm:$0x3f] }
 0x1c9   :  { %4024 = vst [vmem:[#allocation7 + $0xb50] sm:$0x3f] %v3632_v46  ;;  %4025 = vst [vmem:[#allocation7 + $0xb58] sm:$0x3f] %v3633_v47  ;;  %v2013_v57 = vrot.slane %v474_v36, %v4193_v5  ;;  %v2017_v61 = vrot.slane %v474_v36, %v4195_v6  ;;  %v2021_v62 = vrot.slane %v474_v36, %v4197_v7  ;;  %v418_v44 = vld [vmem:[#allocation2 + $0xbf0] sm:$0x3f] }
 0x1ca   :  { %4026 = vst [vmem:[#allocation7 + $0xb60] sm:$0x3f] %v3634_v49  ;;  %4027 = vst [vmem:[#allocation7 + $0xb68] sm:$0x3f] %v3635_v50  ;;  %v2025_v63 = vrot.slane %v474_v36, %v4199_v8  ;;  %v2029_v0 = vrot.slane %v474_v36, %v4201_v9  ;;  %v2854_v1 = vadd.f32 %v2001_v54, %v404_v41  ;;  %v419_v45 = vld [vmem:[#allocation2 + $0xbf8] sm:$0x3f] }
 0x1cb   :  { %4028 = vst [vmem:[#allocation7 + $0xb70] sm:$0x3f] %v3636_v51  ;;  %4029 = vst [vmem:[#allocation7 + $0xb78] sm:$0x3f] %v3637_v52  ;;  %v2855_v10 = vadd.f32 %v2005_v55, %v405_v42  ;;  %v2856_v11 = vadd.f32 %v2009_v56, %v406_v43  ;;  %v2857_v12 = vadd.f32 %v2013_v57, %v407_v48  ;;  %v417_v43 = vld [vmem:[#allocation2 + $0xbe8] sm:$0x3f] }
 0x1cc   :  { %v2858_v13 = vadd.f32 %v2017_v61, %v408_v53  ;;  %v2859_v14 = vadd.f32 %v2021_v62, %v409_v58  ;;  %v2860_v15 = vadd.f32 %v2025_v63, %v410_v59  ;;  %v2861_v16 = vadd.f32 %v2029_v0, %v411_v60  ;;  %v476_v62 = vld [vmem:[#allocation5 + $0x180] sm:$0xff] }
 0x1cd   :  { %v3246_v17 = vmax.f32 %v2854_v1, 0.0  ;;  %v3247_v18 = vmax.f32 %v2855_v10, 0.0  ;;  %v3248_v19 = vmax.f32 %v2856_v11, 0.0  ;;  %v3249_v20 = vmax.f32 %v2857_v12, 0.0  ;;  %v420_v11 = vld [vmem:[#allocation2 + $0xc00] sm:$0x3f] }
 0x1ce   :  { %v3250_v22 = vmax.f32 %v2858_v13, 0.0  ;;  %v3251_v23 = vmax.f32 %v2859_v14, 0.0  ;;  %v3252_v24 = vmax.f32 %v2860_v15, 0.0  ;;  %v3253_v25 = vmax.f32 %v2861_v16, 0.0  ;;  %v421_v12 = vld [vmem:[#allocation2 + $0xc08] sm:$0x3f] }
 0x1cf   :  { %v3638_v29 = vmin.f32 %v3246_v17, 1.0  ;;  %v3639_v30 = vmin.f32 %v3247_v18, 1.0  ;;  %v3640_v31 = vmin.f32 %v3248_v19, 1.0  ;;  %v3641_v32 = vmin.f32 %v3249_v20, 1.0  ;;  %v422_v13 = vld [vmem:[#allocation2 + $0xc10] sm:$0x3f] }
 0x1d0   :  { %v3642_v34 = vmin.f32 %v3250_v22, 1.0  ;;  %v3643_v35 = vmin.f32 %v3251_v23, 1.0  ;;  %v3644_v36 = vmin.f32 %v3252_v24, 1.0  ;;  %v3645_v37 = vmin.f32 %v3253_v25, 1.0  ;;  %v423_v18 = vld [vmem:[#allocation2 + $0xc18] sm:$0x3f] }
 0x1d1   :  { %4030 = vst [vmem:[#allocation7 + $0xb80] sm:$0x3f] %v3638_v29  ;;  %4031 = vst [vmem:[#allocation7 + $0xb88] sm:$0x3f] %v3639_v30  ;;  %v2033_v39 = vrot.slane %v475_v21, %v4187_v2  ;;  %v2037_v40 = vrot.slane %v475_v21, %v4189_v3  ;;  %v2041_v41 = vrot.slane %v475_v21, %v4191_v4  ;;  %v424_v23 = vld [vmem:[#allocation2 + $0xc20] sm:$0x3f] }
 0x1d2   :  { %4032 = vst [vmem:[#allocation7 + $0xb90] sm:$0x3f] %v3640_v31  ;;  %4033 = vst [vmem:[#allocation7 + $0xb98] sm:$0x3f] %v3641_v32  ;;  %v2045_v42 = vrot.slane %v475_v21, %v4193_v5  ;;  %v2049_v46 = vrot.slane %v475_v21, %v4195_v6  ;;  %v2053_v47 = vrot.slane %v475_v21, %v4197_v7  ;;  %v426_v29 = vld [vmem:[#allocation2 + $0xc30] sm:$0x3f] }
 0x1d3   :  { %4034 = vst [vmem:[#allocation7 + $0xba0] sm:$0x3f] %v3642_v34  ;;  %4035 = vst [vmem:[#allocation7 + $0xba8] sm:$0x3f] %v3643_v35  ;;  %v2057_v48 = vrot.slane %v475_v21, %v4199_v8  ;;  %v2061_v49 = vrot.slane %v475_v21, %v4201_v9  ;;  %v2862_v50 = vadd.f32 %v2033_v39, %v412_v26  ;;  %v427_v30 = vld [vmem:[#allocation2 + $0xc38] sm:$0x3f] }
 0x1d4   :  { %4036 = vst [vmem:[#allocation7 + $0xbb0] sm:$0x3f] %v3644_v36  ;;  %4037 = vst [vmem:[#allocation7 + $0xbb8] sm:$0x3f] %v3645_v37  ;;  %v2863_v51 = vadd.f32 %v2037_v40, %v413_v27  ;;  %v2864_v52 = vadd.f32 %v2041_v41, %v414_v28  ;;  %v2865_v53 = vadd.f32 %v2045_v42, %v415_v33  ;;  %v425_v28 = vld [vmem:[#allocation2 + $0xc28] sm:$0x3f] }
 0x1d5   :  { %v2866_v54 = vadd.f32 %v2049_v46, %v416_v38  ;;  %v2867_v55 = vadd.f32 %v2053_v47, %v417_v43  ;;  %v2868_v56 = vadd.f32 %v2057_v48, %v418_v44  ;;  %v2869_v57 = vadd.f32 %v2061_v49, %v419_v45 }
 0x1d6   :  { %v3254_v58 = vmax.f32 %v2862_v50, 0.0  ;;  %v3255_v59 = vmax.f32 %v2863_v51, 0.0  ;;  %v3256_v60 = vmax.f32 %v2864_v52, 0.0  ;;  %v3257_v61 = vmax.f32 %v2865_v53, 0.0 }
 0x1d7   :  { %v3258_v63 = vmax.f32 %v2866_v54, 0.0  ;;  %v3259_v0 = vmax.f32 %v2867_v55, 0.0  ;;  %v3260_v1 = vmax.f32 %v2868_v56, 0.0  ;;  %v3261_v10 = vmax.f32 %v2869_v57, 0.0 }
 0x1d8   :  { %v3646_v14 = vmin.f32 %v3254_v58, 1.0  ;;  %v3647_v15 = vmin.f32 %v3255_v59, 1.0  ;;  %v3648_v16 = vmin.f32 %v3256_v60, 1.0  ;;  %v3649_v17 = vmin.f32 %v3257_v61, 1.0 }
 0x1d9   :  { %v3650_v19 = vmin.f32 %v3258_v63, 1.0  ;;  %v3651_v20 = vmin.f32 %v3259_v0, 1.0  ;;  %v3652_v21 = vmin.f32 %v3260_v1, 1.0  ;;  %v3653_v22 = vmin.f32 %v3261_v10, 1.0 }
 0x1da   :  { %4038 = vst [vmem:[#allocation7 + $0xbc0] sm:$0x3f] %v3646_v14  ;;  %4039 = vst [vmem:[#allocation7 + $0xbc8] sm:$0x3f] %v3647_v15  ;;  %v2065_v24 = vrot.slane %v476_v62, %v4187_v2  ;;  %v2069_v25 = vrot.slane %v476_v62, %v4189_v3  ;;  %v2073_v26 = vrot.slane %v476_v62, %v4191_v4 }
 0x1db   :  { %4040 = vst [vmem:[#allocation7 + $0xbd0] sm:$0x3f] %v3648_v16  ;;  %4041 = vst [vmem:[#allocation7 + $0xbd8] sm:$0x3f] %v3649_v17  ;;  %v2077_v27 = vrot.slane %v476_v62, %v4193_v5  ;;  %v2081_v31 = vrot.slane %v476_v62, %v4195_v6  ;;  %v2085_v32 = vrot.slane %v476_v62, %v4197_v7 }
 0x1dc   :  { %4042 = vst [vmem:[#allocation7 + $0xbe0] sm:$0x3f] %v3650_v19  ;;  %4043 = vst [vmem:[#allocation7 + $0xbe8] sm:$0x3f] %v3651_v20  ;;  %v2089_v33 = vrot.slane %v476_v62, %v4199_v8  ;;  %v2093_v2 = vrot.slane %v476_v62, %v4201_v9  ;;  %v2870_v3 = vadd.f32 %v2065_v24, %v420_v11 }
 0x1dd   :  { %4044 = vst [vmem:[#allocation7 + $0xbf0] sm:$0x3f] %v3652_v21  ;;  %4045 = vst [vmem:[#allocation7 + $0xbf8] sm:$0x3f] %v3653_v22  ;;  %v2871_v34 = vadd.f32 %v2069_v25, %v421_v12  ;;  %v2872_v4 = vadd.f32 %v2073_v26, %v422_v13  ;;  %v2873_v35 = vadd.f32 %v2077_v27, %v423_v18 }
 0x1de   :  { %v2874_v5 = vadd.f32 %v2081_v31, %v424_v23  ;;  %v2875_v36 = vadd.f32 %v2085_v32, %v425_v28  ;;  %v2876_v37 = vadd.f32 %v2089_v33, %v426_v29  ;;  %v2877_v38 = vadd.f32 %v2093_v2, %v427_v30 }
 0x1df   :  { %v3262_v39 = vmax.f32 %v2870_v3, 0.0  ;;  %v3263_v40 = vmax.f32 %v2871_v34, 0.0  ;;  %v3264_v41 = vmax.f32 %v2872_v4, 0.0  ;;  %v3265_v42 = vmax.f32 %v2873_v35, 0.0 }
 0x1e0   :  { %v3266_v6 = vmax.f32 %v2874_v5, 0.0  ;;  %v3267_v7 = vmax.f32 %v2875_v36, 0.0  ;;  %v3268_v43 = vmax.f32 %v2876_v37, 0.0  ;;  %v3269_v8 = vmax.f32 %v2877_v38, 0.0 }
 0x1e1   :  { %v3654_v44 = vmin.f32 %v3262_v39, 1.0  ;;  %v3655_v9 = vmin.f32 %v3263_v40, 1.0  ;;  %v3656_v45 = vmin.f32 %v3264_v41, 1.0  ;;  %v3657_v46 = vmin.f32 %v3265_v42, 1.0 }
 0x1e2   :  { %v3658_v47 = vmin.f32 %v3266_v6, 1.0  ;;  %v3659_v48 = vmin.f32 %v3267_v7, 1.0  ;;  %v3660_v49 = vmin.f32 %v3268_v43, 1.0  ;;  %v3661_v50 = vmin.f32 %v3269_v8, 1.0 }
 0x1e3   :  { %4046 = vst [vmem:[#allocation7 + $0xc00] sm:$0x3f] %v3654_v44  ;;  %4047 = vst [vmem:[#allocation7 + $0xc08] sm:$0x3f] %v3655_v9 }
 0x1e4   :  { %4048 = vst [vmem:[#allocation7 + $0xc10] sm:$0x3f] %v3656_v45  ;;  %4049 = vst [vmem:[#allocation7 + $0xc18] sm:$0x3f] %v3657_v46 }
 0x1e5   :  { %4050 = vst [vmem:[#allocation7 + $0xc20] sm:$0x3f] %v3658_v47  ;;  %4051 = vst [vmem:[#allocation7 + $0xc28] sm:$0x3f] %v3659_v48 }
 0x1e6   :  { %4052 = vst [vmem:[#allocation7 + $0xc30] sm:$0x3f] %v3660_v49  ;;  %4053 = vst [vmem:[#allocation7 + $0xc38] sm:$0x3f] %v3661_v50 }
 0x1e7   :  { %4128 = shalt.err (!%p4125_p6)
}
 0x1e8   :  { %s4129_s8 = scalar_lea.hbm %s4609_s2, 50176 }
 0x1e9   :  { %p4130_p7 = scmp.ne.s32.totalorder %s4609_s2, %s4129_s8  ;;  %p4133_p8 = scmp.lt.u32.totalorder %s4129_s8, %s4609_s2 }
 0x1eb   :  { %p4135_p9 = pnand %p4133_p8, %p4130_p7 }
 0x1ed   :  { %4138 = shalt.err (!%p4135_p9)
}
 0x1ee   :  { %4063 = dma.vmem_to_hbm [thread:$0]  %s4061_s4, 50176, %s4609_s2, [#allocation4]  }
 0x1ef   :  { %4143 = dma.done.wait [#allocation4], 50176  }
 0x1f0   :  { %4144 = vsyncadd [#allocation4], 4294917120 }
 0x1f1   :  { %4067 = vsyncpa [#allocation3], 1 }
 0x1f2   :  { %4068 = vsyncpa [#allocation6], 1 }
 0x1f3   :  { %4069 = vsyncpa [#allocation4], 1 }

</bundles_post_ra>
